<compile_context>
chip_gen: v6e
topology: v6e:2x2x1
jax: 0.10.0
libtpu: 0.0.40
codegen_flags: <defaults>
</compile_context>

<pallas_src>
import functools
import math

import jax
import jax.numpy as jnp
from jax import lax
from jax.experimental import pallas as pl
from jax.experimental.pallas import tpu as pltpu

MASKED_VALUE = 0.0  # stand-in for uniMASK's global MASKED_VALUE constant


# ----------------------------------------------------------------------------- helpers
def _layernorm(x, g, b, eps=1e-5):
    mu = jnp.mean(x, axis=-1, keepdims=True)
    xc = x - mu
    var = jnp.mean(xc * xc, axis=-1, keepdims=True)
    return xc * lax.rsqrt(var + eps) * g + b


def _preprocess(states, actions, rtgs, rtg_input_mask):
    """NaN masking + attention-mask construction (glue; mirrors DecisionTransformer.forward)."""
    act_nan = jnp.isnan(actions[:, :, 0])
    st_nan = jnp.isnan(states[:, :, 0])
    actions_att_mask = 1.0 - act_nan.astype(jnp.float32)
    states_att_mask = 1.0 - st_nan.astype(jnp.float32)
    # rtg NaNs are replaced *before* its attention mask is computed -> all ones (as in the torch code)
    rtg_c = jnp.where(jnp.isnan(rtgs), MASKED_VALUE, rtgs)
    rtg_c = jnp.where(rtg_input_mask[:, :, None] == 0, MASKED_VALUE, rtg_c)
    returns_att_mask = jnp.ones_like(actions_att_mask)
    act_c = jnp.where(act_nan[:, :, None], MASKED_VALUE, actions)
    st_c = jnp.where(st_nan[:, :, None], MASKED_VALUE, states)
    B, T = act_nan.shape
    stacked_mask = jnp.stack([returns_att_mask, states_att_mask, actions_att_mask], axis=1)  # (B,3,T)
    key_mask = jnp.transpose(stacked_mask, (0, 2, 1)).reshape(B, 3 * T)                      # (B,L)
    return rtg_c, st_c, act_c, key_mask


def _pick_batch_block(B, L):
    """Fold as many batch elements as possible into the matmul M dim, subject to:
       - keep >= 2 steps on the "parallel" grid axis when B >= 2 (v7x: 2 TensorCores/chip),
       - prefer (bb*L) % 16 == 0 (bf16 sublane alignment of the matmul M dim),
       - generation-aware row cap (v7x: 64 MiB VMEM/TC vs 128 MiB on v5e/v6e)."""
    try:
        vmem = int(pltpu.get_tpu_info().vmem_capacity_bytes)
    except Exception:
        vmem = 128 * 1024 * 1024
    max_rows = 1024 if vmem >= 100 * 2 ** 20 else 512
    cands = [d for d in range(1, B + 1) if B % d == 0 and d * L <= max_rows]
    if not cands:
        return 1

    def score(d):
        return ((B // d) >= 2 or B == 1, (d * L) % 16 == 0, d)

    return max(cands, key=score)


# ----------------------------------------------------------------------------- Pallas kernel
def dt_kernel(x_ref, kmask_ref,
              causal_ref, Wemb_ref, bemb_ref, lneg_ref, lneb_ref, wpe_ref,
              lnfg_ref, lnfb_ref, Wpred_ref, bpred_ref,
              ln1g_ref, ln1b_ref, Wqkv_ref, bqkv_ref, Wo_ref, bo_ref,
              ln2g_ref, ln2b_ref, Wfc_ref, bfc_ref, Wpj_ref, bpj_ref,
              out_ref, h_ref, *, nheads, bb, a_dim, action_tanh):
    f32 = jnp.float32
    bf16 = jnp.bfloat16
    E = Wemb_ref.shape[1]
    L = causal_ref.shape[0]
    hd = E // nheads
    M = bb * L
    l = pl.program_id(1)
    nlayers = pl.num_programs(1)

    # --- embedding + embed_ln + learned position embeddings: first layer step only ---
    @pl.when(l == 0)
    def _embed():
        e = jnp.dot(x_ref[...], Wemb_ref[...], preferred_element_type=f32)   # (M, E) f32 acc
        e = e.reshape(bb, L, E) + bemb_ref[...]           # per-factor Linear bias, added in f32
        e = _layernorm(e, lneg_ref[...], lneb_ref[...])   # embed_ln
        e = e + wpe_ref[...]                              # GPT2 pos-emb (broadcast add, no tile)
        h_ref[...] = e.reshape(M, E)

    # --- additive attention bias: hoisted causal + per-batch key padding (GPT2 semantics) ---
    pad_add = (1.0 - kmask_ref[...]) * (-1e4)             # (bb, 1, L)
    bias_b = causal_ref[...][None, :, :] + pad_add        # (bb, L, L)

    inv_sqrt_hd = 1.0 / math.sqrt(hd)

    def split_heads(t2, scale=None):
        # (M, E) -> (bb*nheads, L, hd).  Lane-slice + major-dim concat is the Mosaic-safe
        # relayout (L % 8 == 0 keeps the leading-dim reshape layout-free).
        # TODO(synk): a single reshape+transpose split would need a non-minor transpose
        # which Mosaic does not lower; keep slice+concat.
        parts = []
        for hh in range(nheads):
            p = t2[:, hh * hd:(hh + 1) * hd]
            if scale is not None:
                p = p * scale
            parts.append(p.astype(bf16).reshape(bb, 1, L, hd))
        return jnp.concatenate(parts, axis=1).reshape(bb * nheads, L, hd)

    def merge_heads(t3):
        # (bb*nheads, L, hd) -> (M, E)
        t4 = t3.reshape(bb, nheads, L, hd)
        return jnp.concatenate([t4[:, hh] for hh in range(nheads)], axis=-1).reshape(M, E)

    # --- one transformer layer per inner grid step (weights streamed per layer) ---
    h = h_ref[...]
    xl = _layernorm(h, ln1g_ref[0], ln1b_ref[0]).astype(bf16)
    qkv = jnp.dot(xl, Wqkv_ref[0], preferred_element_type=f32) + bqkv_ref[0]
    q = split_heads(qkv[:, :E], inv_sqrt_hd)              # 1/sqrt(hd) folded into q
    k = split_heads(qkv[:, E:2 * E])
    v = split_heads(qkv[:, 2 * E:])
    sc = jnp.einsum('bqd,bkd->bqk', q, k, preferred_element_type=f32)          # (bb*nh, L, L)
    sc = (sc.reshape(bb, nheads, L, L) + bias_b[:, None]).reshape(bb * nheads, L, L)
    mx = jnp.max(sc, axis=-1, keepdims=True)
    ex = jnp.exp(sc - mx)
    p = ex * pl.reciprocal(jnp.sum(ex, axis=-1, keepdims=True), approx=False)  # exact softmax
    ctx = jnp.einsum('bqk,bkd->bqd', p.astype(bf16), v, preferred_element_type=f32)
    attn = jnp.dot(merge_heads(ctx).astype(bf16), Wo_ref[0],
                   preferred_element_type=f32) + bo_ref[0]
    h = h + attn
    # MLP block (activation_function='relu')
    xl2 = _layernorm(h, ln2g_ref[0], ln2b_ref[0]).astype(bf16)
    ff = jnp.dot(xl2, Wfc_ref[0], preferred_element_type=f32) + bfc_ref[0]
    ff = jnp.maximum(ff, 0.0).astype(bf16)
    ff = jnp.dot(ff, Wpj_ref[0], preferred_element_type=f32) + bpj_ref[0]
    h = h + ff
    h_ref[...] = h

    # --- GPT2 ln_f + fused prediction heads: last layer step only ---
    @pl.when(l == nlayers - 1)
    def _heads():
        hf = _layernorm(h, lnfg_ref[...], lnfb_ref[...]).astype(bf16)
        out = jnp.dot(hf, Wpred_ref[...], preferred_element_type=f32) + bpred_ref[...]
        if action_tanh:
            col = lax.broadcasted_iota(jnp.int32, out.shape, 1)
            out = jnp.where(col < a_dim, jnp.tanh(out), out)
        out_ref[...] = out.astype(out_ref.dtype)          # lane-dense (rows, 128) bf16 store


# ----------------------------------------------------------------------------- wrapper
def dt_forward_pallas(params, states, actions, rtgs, rtg_input_mask, *,
                      nheads, nlayers, action_tanh):
    rtg_c, st_c, act_c, key_mask = _preprocess(states, actions, rtgs, rtg_input_mask)
    B, T, r_dim = rtg_c.shape
    s_dim = st_c.shape[-1]
    a_dim = act_c.shape[-1]
    E = params["Wer"].shape[1]
    F = params["Wfc"].shape[2]
    NL = nlayers
    L = 3 * T
    assert L <= params["wpe"].shape[0], "sequence longer than learned position table"
    d_tot = r_dim + s_dim + a_dim
    out_dim = a_dim + r_dim + s_dim
    DP = ((d_tot + 127) // 128) * 128            # lane-padded input slab width
    OUT_P = ((out_dim + 127) // 128) * 128       # lane-padded output slab width
    bb = _pick_batch_block(B, L)
    assert B % bb == 0
    M = bb * L

    f32, bf16 = jnp.float32, jnp.bfloat16

    # interleaved (rtg | state | action per timestep), lane-padded input slab
    x4 = jnp.zeros((B, T, 3, DP), f32)
    x4 = x4.at[:, :, 0, :r_dim].set(rtg_c)
    x4 = x4.at[:, :, 1, r_dim:r_dim + s_dim].set(st_c)
    x4 = x4.at[:, :, 2, r_dim + s_dim:d_tot].set(act_c)
    x_flat = x4.reshape(B * L, DP).astype(bf16)

    # block-stacked embedding weight; per-factor biases stay f32 and are added in-kernel
    W_emb = jnp.zeros((DP, E), f32)
    W_emb = W_emb.at[:r_dim].set(params["Wer"])
    W_emb = W_emb.at[r_dim:r_dim + s_dim].set(params["Wes"])
    W_emb = W_emb.at[r_dim + s_dim:d_tot].set(params["Wea"])
    W_emb = W_emb.astype(bf16)
    bemb_L = jnp.tile(jnp.concatenate([params["ber"], params["bes"], params["bea"]], axis=0),
                      (T, 1))                                                    # (L, E) f32

    # fused prediction heads: columns = [action | return | state | zero padding]
    W_pred = jnp.zeros((E, OUT_P), f32)
    W_pred = W_pred.at[:, :a_dim].set(params["Wpa"])
    W_pred = W_pred.at[:, a_dim:a_dim + r_dim].set(params["Wpr"])
    W_pred = W_pred.at[:, a_dim + r_dim:out_dim].set(params["Wps"])
    W_pred = W_pred.astype(bf16)
    b_pred = jnp.zeros((1, OUT_P), f32)
    b_pred = b_pred.at[:, :a_dim].set(params["bpa"])
    b_pred = b_pred.at[:, a_dim:a_dim + r_dim].set(params["bpr"])
    b_pred = b_pred.at[:, a_dim + r_dim:out_dim].set(params["bps"])

    wpe_L = params["wpe"][:L]
    qi = jnp.arange(L)[:, None]
    ki = jnp.arange(L)[None, :]
    causal = jnp.where(ki <= qi, 0.0, -1e4).astype(f32)            # hoisted causal additive mask
    kmask3 = key_mask.reshape(B, 1, L).astype(f32)                 # (B, 1, L)

    inv_weights = [causal, W_emb, bemb_L, params["lne_g"], params["lne_b"], wpe_L,
                   params["lnfg"], params["lnfb"], W_pred, b_pred]
    layer_weights = [params["ln1g"], params["ln1b"],
                     params["Wqkv"].astype(bf16), params["bqkv"],
                     params["Wo"].astype(bf16), params["bo"],
                     params["ln2g"], params["ln2b"],
                     params["Wfc"].astype(bf16), params["bfc"],
                     params["Wpj"].astype(bf16), params["bpj"]]

    # explicit scoped-VMEM budget from the real footprint (invariant weights + one
    # double-buffered layer slice + double-buffered x/out/kmask blocks + scratch + temps)
    def _nbytes(a):
        return int(a.size) * a.dtype.itemsize
    est = (2 * sum(_nbytes(w) for w in inv_weights)
           + 2 * sum(_nbytes(w) // NL for w in layer_weights)
           + 2 * (M * DP * 2 + M * OUT_P * 2 + bb * L * 4)
           + 4 * M * E                                                         # residual scratch
           + 4 * (3 * M * E + 2 * bb * nheads * L * L + M * F + 4 * M * E))    # activation temps
    vmem_limit = int(min(110 * 2 ** 20, max(32 * 2 ** 20, 2 * est + (8 << 20))))

    kernel = functools.partial(dt_kernel, nheads=nheads, bb=bb, a_dim=a_dim,
                               action_tanh=action_tanh)

    x_spec = pl.BlockSpec((M, DP), lambda b, l: (b, 0))
    kmask_spec = pl.BlockSpec((bb, 1, L), lambda b, l: (b, 0, 0))
    out_spec = pl.BlockSpec((M, OUT_P), lambda b, l: (b, 0))

    def layer_spec(a):
        return pl.BlockSpec((1,) + a.shape[1:], lambda b, l: (l, 0, 0))

    def build(single_buffer_weights):
        def inv_spec(a):
            if single_buffer_weights:
                return pl.BlockSpec(a.shape, lambda b, l: (0, 0),
                                    pipeline_mode=pl.Buffered(1))
            return pl.BlockSpec(a.shape, lambda b, l: (0, 0))
        return pl.pallas_call(
            kernel,
            out_shape=jax.ShapeDtypeStruct((B * L, OUT_P), bf16),
            grid_spec=pltpu.PrefetchScalarGridSpec(
                num_scalar_prefetch=0,
                grid=(B // bb, NL),
                in_specs=[x_spec, kmask_spec]
                         + [inv_spec(w) for w in inv_weights]
                         + [layer_spec(w) for w in layer_weights],
                out_specs=out_spec,
                scratch_shapes=[pltpu.VMEM((M, E), jnp.float32)]),   # residual stream accumulator
            compiler_params=pltpu.CompilerParams(
                dimension_semantics=("parallel", "arbitrary"),
                vmem_limit_bytes=vmem_limit),
        )

    args = (x_flat, kmask3, *inv_weights, *layer_weights)
    try:
        full = jax.block_until_ready(build(True)(*args))
    except Exception:
        # pl.Buffered(1) not accepted by this jax/libtpu build -> default double buffering
        full = jax.block_until_ready(build(False)(*args))

    # de-interleave + head/slot selection (matches x[:, -2] / x[:, -1] / x[:, 0] in the torch code)
    full = full.astype(jnp.float32).reshape(B, L, OUT_P)
    action_preds = full[:, 1::3, :a_dim]                           # from the state-slot tokens
    return_preds = full[:, 2::3, a_dim:a_dim + r_dim]              # from the action-slot tokens
    state_preds = full[:, 0::3, a_dim + r_dim:a_dim + r_dim + s_dim]   # from the rtg-slot tokens
    return jnp.concatenate([action_preds, return_preds, state_preds], axis=2)


# ----------------------------------------------------------------------------- pure-JAX reference
def dt_forward_reference(params, states, actions, rtgs, rtg_input_mask, *,
                         nheads, nlayers, action_tanh):
    rtg_c, st_c, act_c, key_mask = _preprocess(states, actions, rtgs, rtg_input_mask)
    B, T, r_dim = rtg_c.shape
    a_dim = act_c.shape[-1]
    E = params["Wer"].shape[1]
    L = 3 * T
    hd = E // nheads
    hp = jax.lax.Precision.HIGHEST
    dot = functools.partial(jnp.matmul, precision=hp)

    rtg_e = dot(rtg_c, params["Wer"]) + params["ber"][0]
    st_e = dot(st_c, params["Wes"]) + params["bes"][0]
    act_e = dot(act_c, params["Wea"]) + params["bea"][0]
    h = jnp.stack([rtg_e, st_e, act_e], axis=2).reshape(B, L, E)
    h = _layernorm(h, params["lne_g"][0], params["lne_b"][0])
    h = h + params["wpe"][:L][None]

    pad = (1.0 - key_mask)[:, None, :] * (-1e4)
    qi = jnp.arange(L)[:, None]
    ki = jnp.arange(L)[None, :]
    bias = jnp.where(ki <= qi, 0.0, -1e4)[None] + pad              # (B, L, L)

    for l in range(nlayers):
        xl = _layernorm(h, params["ln1g"][l, 0], params["ln1b"][l, 0])
        qkv = dot(xl, params["Wqkv"][l]) + params["bqkv"][l, 0]
        q, k, v = qkv[..., :E], qkv[..., E:2 * E], qkv[..., 2 * E:]
        q = q.reshape(B, L, nheads, hd)
        k = k.reshape(B, L, nheads, hd)
        v = v.reshape(B, L, nheads, hd)
        sc = jnp.einsum("bqhd,bkhd->bhqk", q, k, precision=hp) / math.sqrt(hd)
        p = jax.nn.softmax(sc + bias[:, None], axis=-1)
        attn = jnp.einsum("bhqk,bkhd->bqhd", p, v, precision=hp).reshape(B, L, E)
        attn = dot(attn, params["Wo"][l]) + params["bo"][l, 0]
        h = h + attn
        xl2 = _layernorm(h, params["ln2g"][l, 0], params["ln2b"][l, 0])
        m = jnp.maximum(dot(xl2, params["Wfc"][l]) + params["bfc"][l, 0], 0.0)
        m = dot(m, params["Wpj"][l]) + params["bpj"][l, 0]
        h = h + m

    h = _layernorm(h, params["lnfg"][0], params["lnfb"][0])
    x = h.reshape(B, T, 3, E)
    return_preds = dot(x[:, :, 2], params["Wpr"]) + params["bpr"][0]
    action_preds = dot(x[:, :, 1], params["Wpa"]) + params["bpa"][0]
    if action_tanh:
        action_preds = jnp.tanh(action_preds)
    state_preds = dot(x[:, :, 0], params["Wps"]) + params["bps"][0]
    return jnp.concatenate([action_preds, return_preds, state_preds], axis=2)


# ----------------------------------------------------------------------------- params
def init_params(key, *, s_dim, a_dim, r_dim, embed_dim, n_inner, nlayers, max_ep_len):
    ks = jax.random.split(key, 24)
    E, F, NL = embed_dim, n_inner, nlayers

    def w(k, shape):
        return (jax.random.normal(k, shape, jnp.float32) * 0.02)

    return dict(
        Wer=w(ks[0], (r_dim, E)), ber=w(ks[1], (1, E)),
        Wes=w(ks[2], (s_dim, E)), bes=w(ks[3], (1, E)),
        Wea=w(ks[4], (a_dim, E)), bea=w(ks[5], (1, E)),
        lne_g=jnp.ones((1, E), jnp.float32), lne_b=jnp.zeros((1, E), jnp.float32),
        wpe=w(ks[6], (max_ep_len, E)),
        ln1g=jnp.ones((NL, 1, E), jnp.float32), ln1b=jnp.zeros((NL, 1, E), jnp.float32),
        Wqkv=w(ks[7], (NL, E, 3 * E)), bqkv=w(ks[8], (NL, 1, 3 * E)),
        Wo=w(ks[9], (NL, E, E)), bo=w(ks[10], (NL, 1, E)),
        ln2g=jnp.ones((NL, 1, E), jnp.float32), ln2b=jnp.zeros((NL, 1, E), jnp.float32),
        Wfc=w(ks[11], (NL, E, F)), bfc=w(ks[12], (NL, 1, F)),
        Wpj=w(ks[13], (NL, F, E)), bpj=w(ks[14], (NL, 1, E)),
        lnfg=jnp.ones((1, E), jnp.float32), lnfb=jnp.zeros((1, E), jnp.float32),
        Wpr=w(ks[15], (E, r_dim)), bpr=w(ks[16], (1, r_dim)),
        Wpa=w(ks[17], (E, a_dim)), bpa=w(ks[18], (1, a_dim)),
        Wps=w(ks[19], (E, s_dim)), bps=w(ks[20], (1, s_dim)),
    )


# ----------------------------------------------------------------------------- main
if __name__ == "__main__":
    # model config (small, consistent with DecisionTransformer.__init__)
    B, T = 2, 8                       # batch, seq_len
    s_dim, a_dim, r_dim = 6, 4, 1     # input_dims = {'state': 6, 'action': 4, 'rtg': 1}
    embed_dim, n_inner = 32, 64       # embed_dim, feedforward_nhid
    nheads, nlayers = 2, 2
    max_ep_len = 64
    action_tanh = True
    # TODO(synk): timestep_encoding=True branch (nn.Embedding(max_ep_len, embed_dim)) not exercised;
    # default timestep_encoding=False path is implemented.  Dropout treated as inference identity.

    key = jax.random.PRNGKey(0)
    kp, kd = jax.random.split(key)
    params = init_params(kp, s_dim=s_dim, a_dim=a_dim, r_dim=r_dim,
                         embed_dim=embed_dim, n_inner=n_inner,
                         nlayers=nlayers, max_ep_len=max_ep_len)

    k1, k2, k3, k4, k5, k6 = jax.random.split(kd, 6)
    states = jax.random.normal(k1, (B, T, s_dim), jnp.float32)
    actions = jax.random.normal(k2, (B, T, a_dim), jnp.float32)
    rtgs = jax.random.normal(k3, (B, T, r_dim), jnp.float32)
    # inject NaNs to emulate uniMASK's masked entries
    actions = jnp.where(jax.random.bernoulli(k4, 0.25, (B, T))[:, :, None], jnp.nan, actions)
    states = jnp.where(jax.random.bernoulli(k5, 0.25, (B, T))[:, :, None], jnp.nan, states)
    rtg_input_mask = jax.random.bernoulli(k6, 0.75, (B, T)).astype(jnp.float32)

    out = dt_forward_pallas(params, states, actions, rtgs, rtg_input_mask,
                            nheads=nheads, nlayers=nlayers, action_tanh=action_tanh)
    out = jax.block_until_ready(out)

    ref = dt_forward_reference(params, states, actions, rtgs, rtg_input_mask,
                               nheads=nheads, nlayers=nlayers, action_tanh=action_tanh)
    ref = jax.block_until_ready(ref)

    assert out.shape == (B, T, a_dim + r_dim + s_dim), out.shape
    assert bool(jnp.isfinite(out).all())
    max_err = float(jnp.max(jnp.abs(out - ref)))
    assert max_err < 2e-2, f"kernel vs reference max abs err {max_err}"
    print("KERNEL_OK")
</pallas_src>

<mosaic_0001>
module attributes {stable_mosaic.version = 11 : i64} {
  func.func @dt_kernel(%arg0: i32, %arg1: i32, %arg2: memref<24x128xbf16, #tpu.memory_space<vmem>>, %arg3: memref<1x1x24xf32, #tpu.memory_space<vmem>>, %arg4: memref<24x24xf32, #tpu.memory_space<vmem>>, %arg5: memref<128x32xbf16, #tpu.memory_space<vmem>>, %arg6: memref<24x32xf32, #tpu.memory_space<vmem>>, %arg7: memref<1x32xf32, #tpu.memory_space<vmem>>, %arg8: memref<1x32xf32, #tpu.memory_space<vmem>>, %arg9: memref<24x32xf32, #tpu.memory_space<vmem>>, %arg10: memref<1x32xf32, #tpu.memory_space<vmem>>, %arg11: memref<1x32xf32, #tpu.memory_space<vmem>>, %arg12: memref<32x128xbf16, #tpu.memory_space<vmem>>, %arg13: memref<1x128xf32, #tpu.memory_space<vmem>>, %arg14: memref<1x1x32xf32, #tpu.memory_space<vmem>>, %arg15: memref<1x1x32xf32, #tpu.memory_space<vmem>>, %arg16: memref<1x32x96xbf16, #tpu.memory_space<vmem>>, %arg17: memref<1x1x96xf32, #tpu.memory_space<vmem>>, %arg18: memref<1x32x32xbf16, #tpu.memory_space<vmem>>, %arg19: memref<1x1x32xf32, #tpu.memory_space<vmem>>, %arg20: memref<1x1x32xf32, #tpu.memory_space<vmem>>, %arg21: memref<1x1x32xf32, #tpu.memory_space<vmem>>, %arg22: memref<1x32x64xbf16, #tpu.memory_space<vmem>>, %arg23: memref<1x1x64xf32, #tpu.memory_space<vmem>>, %arg24: memref<1x64x32xbf16, #tpu.memory_space<vmem>>, %arg25: memref<1x1x32xf32, #tpu.memory_space<vmem>>, %arg26: memref<24x128xbf16, #tpu.memory_space<vmem>>, %arg27: memref<24x32xf32, #tpu.memory_space<vmem>>) attributes {dimension_semantics = [#tpu.dimension_semantics<parallel>, #tpu.dimension_semantics<arbitrary>], iteration_bounds = array<i64: 2, 2>, scalar_prefetch = 0 : i64, scratch_operands = 1 : i64, tpu.core_type = #tpu.core_type<tc>, window_params = [{transform_indices = @transform_0, window_bounds = array<i64: 24, 128>}, {transform_indices = @transform_1, window_bounds = array<i64: 1, 1, 24>}, {pipeline_mode = #tpu.pipeline_mode<synchronous>, transform_indices = @transform_2, window_bounds = array<i64: 24, 24>}, {pipeline_mode = #tpu.pipeline_mode<synchronous>, transform_indices = @transform_3, window_bounds = array<i64: 128, 32>}, {pipeline_mode = #tpu.pipeline_mode<synchronous>, transform_indices = @transform_4, window_bounds = array<i64: 24, 32>}, {pipeline_mode = #tpu.pipeline_mode<synchronous>, transform_indices = @transform_5, window_bounds = array<i64: 1, 32>}, {pipeline_mode = #tpu.pipeline_mode<synchronous>, transform_indices = @transform_6, window_bounds = array<i64: 1, 32>}, {pipeline_mode = #tpu.pipeline_mode<synchronous>, transform_indices = @transform_7, window_bounds = array<i64: 24, 32>}, {pipeline_mode = #tpu.pipeline_mode<synchronous>, transform_indices = @transform_8, window_bounds = array<i64: 1, 32>}, {pipeline_mode = #tpu.pipeline_mode<synchronous>, transform_indices = @transform_9, window_bounds = array<i64: 1, 32>}, {pipeline_mode = #tpu.pipeline_mode<synchronous>, transform_indices = @transform_10, window_bounds = array<i64: 32, 128>}, {pipeline_mode = #tpu.pipeline_mode<synchronous>, transform_indices = @transform_11, window_bounds = array<i64: 1, 128>}, {transform_indices = @transform_12, window_bounds = array<i64: 1, 1, 32>}, {transform_indices = @transform_13, window_bounds = array<i64: 1, 1, 32>}, {transform_indices = @transform_14, window_bounds = array<i64: 1, 32, 96>}, {transform_indices = @transform_15, window_bounds = array<i64: 1, 1, 96>}, {transform_indices = @transform_16, window_bounds = array<i64: 1, 32, 32>}, {transform_indices = @transform_17, window_bounds = array<i64: 1, 1, 32>}, {transform_indices = @transform_18, window_bounds = array<i64: 1, 1, 32>}, {transform_indices = @transform_19, window_bounds = array<i64: 1, 1, 32>}, {transform_indices = @transform_20, window_bounds = array<i64: 1, 32, 64>}, {transform_indices = @transform_21, window_bounds = array<i64: 1, 1, 64>}, {transform_indices = @transform_22, window_bounds = array<i64: 1, 64, 32>}, {transform_indices = @transform_23, window_bounds = array<i64: 1, 1, 32>}, {transform_indices = @transform_24, window_bounds = array<i64: 24, 128>}]} {
    %c0_i32 = arith.constant 0 : i32
    %0 = arith.cmpi eq, %arg1, %c0_i32 : i32
    %1 = arith.extui %0 : i1 to i32
    %c0_i32_0 = arith.constant 0 : i32
    %2 = arith.cmpi ne, %1, %c0_i32_0 : i32
    scf.if %2 {
      %c0_68 = arith.constant 0 : index
      %c0_69 = arith.constant 0 : index
      %157 = vector.load %arg2[%c0_68, %c0_69] : memref<24x128xbf16, #tpu.memory_space<vmem>>, vector<24x128xbf16>
      %c0_70 = arith.constant 0 : index
      %c0_71 = arith.constant 0 : index
      %158 = vector.load %arg5[%c0_70, %c0_71] : memref<128x32xbf16, #tpu.memory_space<vmem>>, vector<128x32xbf16>
      %cst_72 = arith.constant dense<0.000000e+00> : vector<24x32xf32>
      %159 = tpu.matmul %157, %158, %cst_72 {dimension_numbers = #tpu.dot_dimension_numbers<[1], [0], [0], [1], [0, 0, 1, 1], [], []>} : vector<24x128xbf16>, vector<128x32xbf16>, vector<24x32xf32> -> vector<24x32xf32>
      %160 = vector.shape_cast %159 : vector<24x32xf32> to vector<1x24x32xf32>
      %c0_73 = arith.constant 0 : index
      %c0_74 = arith.constant 0 : index
      %161 = vector.load %arg6[%c0_73, %c0_74] : memref<24x32xf32, #tpu.memory_space<vmem>>, vector<24x32xf32>
      %162 = vector.shape_cast %161 : vector<24x32xf32> to vector<1x24x32xf32>
      %163 = arith.addf %160, %162 : vector<1x24x32xf32>
      %c0_75 = arith.constant 0 : index
      %c0_76 = arith.constant 0 : index
      %164 = vector.load %arg7[%c0_75, %c0_76] : memref<1x32xf32, #tpu.memory_space<vmem>>, vector<1x32xf32>
      %c0_77 = arith.constant 0 : index
      %c0_78 = arith.constant 0 : index
      %165 = vector.load %arg8[%c0_77, %c0_78] : memref<1x32xf32, #tpu.memory_space<vmem>>, vector<1x32xf32>
      %cst_79 = arith.constant dense<0.000000e+00> : vector<1x24xf32>
      %166 = vector.multi_reduction <add>, %163, %cst_79 [2] : vector<1x24x32xf32> to vector<1x24xf32>
      %167 = vector.shape_cast %166 : vector<1x24xf32> to vector<1x24x1xf32>
      %cst_80 = arith.constant 3.200000e+01 : f32
      %168 = vector.broadcast %cst_80 : f32 to vector<1x24x1xf32>
      %169 = arith.divf %167, %168 : vector<1x24x1xf32>
      %170 = vector.broadcast %169 : vector<1x24x1xf32> to vector<1x24x32xf32>
      %171 = arith.subf %163, %170 : vector<1x24x32xf32>
      %172 = arith.mulf %171, %171 : vector<1x24x32xf32>
      %cst_81 = arith.constant dense<0.000000e+00> : vector<1x24xf32>
      %173 = vector.multi_reduction <add>, %172, %cst_81 [2] : vector<1x24x32xf32> to vector<1x24xf32>
      %174 = vector.shape_cast %173 : vector<1x24xf32> to vector<1x24x1xf32>
      %cst_82 = arith.constant 3.200000e+01 : f32
      %175 = vector.broadcast %cst_82 : f32 to vector<1x24x1xf32>
      %176 = arith.divf %174, %175 : vector<1x24x1xf32>
      %cst_83 = arith.constant 9.99999974E-6 : f32
      %177 = vector.broadcast %cst_83 : f32 to vector<1x24x1xf32>
      %178 = arith.addf %176, %177 : vector<1x24x1xf32>
      %179 = math.rsqrt %178 : vector<1x24x1xf32>
      %180 = vector.broadcast %179 : vector<1x24x1xf32> to vector<1x24x32xf32>
      %181 = arith.mulf %171, %180 : vector<1x24x32xf32>
      %182 = vector.shape_cast %164 : vector<1x32xf32> to vector<1x1x32xf32>
      %183 = vector.broadcast %182 : vector<1x1x32xf32> to vector<1x24x32xf32>
      %184 = arith.mulf %181, %183 : vector<1x24x32xf32>
      %185 = vector.shape_cast %165 : vector<1x32xf32> to vector<1x1x32xf32>
      %186 = vector.broadcast %185 : vector<1x1x32xf32> to vector<1x24x32xf32>
      %187 = arith.addf %184, %186 : vector<1x24x32xf32>
      %c0_84 = arith.constant 0 : index
      %c0_85 = arith.constant 0 : index
      %188 = vector.load %arg9[%c0_84, %c0_85] : memref<24x32xf32, #tpu.memory_space<vmem>>, vector<24x32xf32>
      %189 = vector.shape_cast %188 : vector<24x32xf32> to vector<1x24x32xf32>
      %190 = arith.addf %187, %189 : vector<1x24x32xf32>
      %191 = vector.shape_cast %190 : vector<1x24x32xf32> to vector<24x32xf32>
      %c0_86 = arith.constant 0 : index
      %c0_87 = arith.constant 0 : index
      %192 = vector.load %arg27[%c0_86, %c0_87] : memref<24x32xf32, #tpu.memory_space<vmem>>, vector<24x32xf32>
      tpu.vector_store %arg27[%c0_86, %c0_87], %191 {strides = array<i32>} : memref<24x32xf32, #tpu.memory_space<vmem>>, vector<24x32xf32>,
    } else {
    }
    %c0 = arith.constant 0 : index
    %c0_1 = arith.constant 0 : index
    %c0_2 = arith.constant 0 : index
    %3 = vector.load %arg3[%c0, %c0_1, %c0_2] : memref<1x1x24xf32, #tpu.memory_space<vmem>>, vector<1x1x24xf32>
    %cst = arith.constant 1.000000e+00 : f32
    %4 = vector.broadcast %cst : f32 to vector<1x1x24xf32>
    %5 = arith.subf %4, %3 : vector<1x1x24xf32>
    %cst_3 = arith.constant -1.000000e+04 : f32
    %6 = vector.broadcast %cst_3 : f32 to vector<1x1x24xf32>
    %7 = arith.mulf %5, %6 : vector<1x1x24xf32>
    %c0_4 = arith.constant 0 : index
    %c0_5 = arith.constant 0 : index
    %8 = vector.load %arg4[%c0_4, %c0_5] : memref<24x24xf32, #tpu.memory_space<vmem>>, vector<24x24xf32>
    %9 = vector.shape_cast %8 : vector<24x24xf32> to vector<1x24x24xf32>
    %10 = vector.broadcast %7 : vector<1x1x24xf32> to vector<1x24x24xf32>
    %11 = arith.addf %9, %10 : vector<1x24x24xf32>
    %c0_6 = arith.constant 0 : index
    %c0_7 = arith.constant 0 : index
    %12 = vector.load %arg27[%c0_6, %c0_7] : memref<24x32xf32, #tpu.memory_space<vmem>>, vector<24x32xf32>
    %c0_8 = arith.constant 0 : index
    %c0_9 = arith.constant 0 : index
    %c0_10 = arith.constant 0 : index
    %13 = vector.load %arg14[%c0_8, %c0_9, %c0_10] : memref<1x1x32xf32, #tpu.memory_space<vmem>>, vector<1x1x32xf32>
    %14 = vector.shape_cast %13 : vector<1x1x32xf32> to vector<1x32xf32>
    %c0_11 = arith.constant 0 : index
    %c0_12 = arith.constant 0 : index
    %c0_13 = arith.constant 0 : index
    %15 = vector.load %arg15[%c0_11, %c0_12, %c0_13] : memref<1x1x32xf32, #tpu.memory_space<vmem>>, vector<1x1x32xf32>
    %16 = vector.shape_cast %15 : vector<1x1x32xf32> to vector<1x32xf32>
    %cst_14 = arith.constant dense<0.000000e+00> : vector<24xf32>
    %17 = vector.multi_reduction <add>, %12, %cst_14 [1] : vector<24x32xf32> to vector<24xf32>
    %18 = vector.shape_cast %17 : vector<24xf32> to vector<24x1xf32>
    %cst_15 = arith.constant 3.200000e+01 : f32
    %19 = vector.broadcast %cst_15 : f32 to vector<24x1xf32>
    %20 = arith.divf %18, %19 : vector<24x1xf32>
    %21 = vector.broadcast %20 : vector<24x1xf32> to vector<24x32xf32>
    %22 = arith.subf %12, %21 : vector<24x32xf32>
    %23 = arith.mulf %22, %22 : vector<24x32xf32>
    %cst_16 = arith.constant dense<0.000000e+00> : vector<24xf32>
    %24 = vector.multi_reduction <add>, %23, %cst_16 [1] : vector<24x32xf32> to vector<24xf32>
    %25 = vector.shape_cast %24 : vector<24xf32> to vector<24x1xf32>
    %cst_17 = arith.constant 3.200000e+01 : f32
    %26 = vector.broadcast %cst_17 : f32 to vector<24x1xf32>
    %27 = arith.divf %25, %26 : vector<24x1xf32>
    %cst_18 = arith.constant 9.99999974E-6 : f32
    %28 = vector.broadcast %cst_18 : f32 to vector<24x1xf32>
    %29 = arith.addf %27, %28 : vector<24x1xf32>
    %30 = math.rsqrt %29 : vector<24x1xf32>
    %31 = vector.broadcast %30 : vector<24x1xf32> to vector<24x32xf32>
    %32 = arith.mulf %22, %31 : vector<24x32xf32>
    %33 = vector.broadcast %14 : vector<1x32xf32> to vector<24x32xf32>
    %34 = arith.mulf %32, %33 : vector<24x32xf32>
    %35 = vector.broadcast %16 : vector<1x32xf32> to vector<24x32xf32>
    %36 = arith.addf %34, %35 : vector<24x32xf32>
    %37 = arith.truncf %36 : vector<24x32xf32> to vector<24x32xbf16>
    %c0_19 = arith.constant 0 : index
    %c0_20 = arith.constant 0 : index
    %c0_21 = arith.constant 0 : index
    %38 = vector.load %arg16[%c0_19, %c0_20, %c0_21] : memref<1x32x96xbf16, #tpu.memory_space<vmem>>, vector<1x32x96xbf16>
    %39 = vector.shape_cast %38 : vector<1x32x96xbf16> to vector<32x96xbf16>
    %cst_22 = arith.constant dense<0.000000e+00> : vector<24x96xf32>
    %40 = tpu.matmul %37, %39, %cst_22 {dimension_numbers = #tpu.dot_dimension_numbers<[1], [0], [0], [1], [0, 0, 1, 1], [], []>} : vector<24x32xbf16>, vector<32x96xbf16>, vector<24x96xf32> -> vector<24x96xf32>
    %c0_23 = arith.constant 0 : index
    %c0_24 = arith.constant 0 : index
    %c0_25 = arith.constant 0 : index
    %41 = vector.load %arg17[%c0_23, %c0_24, %c0_25] : memref<1x1x96xf32, #tpu.memory_space<vmem>>, vector<1x1x96xf32>
    %42 = vector.shape_cast %41 : vector<1x1x96xf32> to vector<1x96xf32>
    %43 = vector.broadcast %42 : vector<1x96xf32> to vector<24x96xf32>
    %44 = arith.addf %40, %43 : vector<24x96xf32>
    %45 = vector.extract_strided_slice %44 {offsets = [0, 0], sizes = [24, 32], strides = [1, 1]} : vector<24x96xf32> to vector<24x32xf32>
    %46 = vector.extract_strided_slice %45 {offsets = [0, 0], sizes = [24, 16], strides = [1, 1]} : vector<24x32xf32> to vector<24x16xf32>
    %cst_26 = arith.constant 2.500000e-01 : f32
    %47 = vector.broadcast %cst_26 : f32 to vector<24x16xf32>
    %48 = arith.mulf %46, %47 : vector<24x16xf32>
    %49 = arith.truncf %48 : vector<24x16xf32> to vector<24x16xbf16>
    %50 = vector.shape_cast %49 : vector<24x16xbf16> to vector<1x1x24x16xbf16>
    %51 = vector.extract_strided_slice %45 {offsets = [0, 16], sizes = [24, 16], strides = [1, 1]} : vector<24x32xf32> to vector<24x16xf32>
    %cst_27 = arith.constant 2.500000e-01 : f32
    %52 = vector.broadcast %cst_27 : f32 to vector<24x16xf32>
    %53 = arith.mulf %51, %52 : vector<24x16xf32>
    %54 = arith.truncf %53 : vector<24x16xf32> to vector<24x16xbf16>
    %55 = vector.shape_cast %54 : vector<24x16xbf16> to vector<1x1x24x16xbf16>
    %56 = tpu.concatenate %50, %55 in 1 : vector<1x1x24x16xbf16>, vector<1x1x24x16xbf16> -> vector<1x2x24x16xbf16>
    %57 = vector.shape_cast %56 : vector<1x2x24x16xbf16> to vector<2x24x16xbf16>
    %58 = vector.extract_strided_slice %44 {offsets = [0, 32], sizes = [24, 32], strides = [1, 1]} : vector<24x96xf32> to vector<24x32xf32>
    %59 = vector.extract_strided_slice %58 {offsets = [0, 0], sizes = [24, 16], strides = [1, 1]} : vector<24x32xf32> to vector<24x16xf32>
    %60 = arith.truncf %59 : vector<24x16xf32> to vector<24x16xbf16>
    %61 = vector.shape_cast %60 : vector<24x16xbf16> to vector<1x1x24x16xbf16>
    %62 = vector.extract_strided_slice %58 {offsets = [0, 16], sizes = [24, 16], strides = [1, 1]} : vector<24x32xf32> to vector<24x16xf32>
    %63 = arith.truncf %62 : vector<24x16xf32> to vector<24x16xbf16>
    %64 = vector.shape_cast %63 : vector<24x16xbf16> to vector<1x1x24x16xbf16>
    %65 = tpu.concatenate %61, %64 in 1 : vector<1x1x24x16xbf16>, vector<1x1x24x16xbf16> -> vector<1x2x24x16xbf16>
    %66 = vector.shape_cast %65 : vector<1x2x24x16xbf16> to vector<2x24x16xbf16>
    %67 = vector.extract_strided_slice %44 {offsets = [0, 64], sizes = [24, 32], strides = [1, 1]} : vector<24x96xf32> to vector<24x32xf32>
    %68 = vector.extract_strided_slice %67 {offsets = [0, 0], sizes = [24, 16], strides = [1, 1]} : vector<24x32xf32> to vector<24x16xf32>
    %69 = arith.truncf %68 : vector<24x16xf32> to vector<24x16xbf16>
    %70 = vector.shape_cast %69 : vector<24x16xbf16> to vector<1x1x24x16xbf16>
    %71 = vector.extract_strided_slice %67 {offsets = [0, 16], sizes = [24, 16], strides = [1, 1]} : vector<24x32xf32> to vector<24x16xf32>
    %72 = arith.truncf %71 : vector<24x16xf32> to vector<24x16xbf16>
    %73 = vector.shape_cast %72 : vector<24x16xbf16> to vector<1x1x24x16xbf16>
    %74 = tpu.concatenate %70, %73 in 1 : vector<1x1x24x16xbf16>, vector<1x1x24x16xbf16> -> vector<1x2x24x16xbf16>
    %75 = vector.shape_cast %74 : vector<1x2x24x16xbf16> to vector<2x24x16xbf16>
    "tpu.trace_start"() <{level = 10 : i32, message = "bqd,bkd->bqk"}> : () -> ()
    %cst_28 = arith.constant dense<0.000000e+00> : vector<2x24x24xf32>
    %76 = tpu.matmul %57, %66, %cst_28 {dimension_numbers = #tpu.dot_dimension_numbers<[2], [2], [1], [1], [0, 0, 0, 1, 1, 1], [0], [0]>} : vector<2x24x16xbf16>, vector<2x24x16xbf16>, vector<2x24x24xf32> -> vector<2x24x24xf32>
    "tpu.trace_stop"() : () -> ()
    %77 = vector.shape_cast %76 : vector<2x24x24xf32> to vector<1x2x24x24xf32>
    %78 = vector.shape_cast %11 : vector<1x24x24xf32> to vector<1x1x24x24xf32>
    %79 = vector.broadcast %78 : vector<1x1x24x24xf32> to vector<1x2x24x24xf32>
    %80 = arith.addf %77, %79 : vector<1x2x24x24xf32>
    %81 = vector.shape_cast %80 : vector<1x2x24x24xf32> to vector<2x24x24xf32>
    %cst_29 = arith.constant dense<0xFF800000> : vector<2x24xf32>
    %82 = vector.multi_reduction <maximumf>, %81, %cst_29 [2] : vector<2x24x24xf32> to vector<2x24xf32>
    %83 = vector.shape_cast %82 : vector<2x24xf32> to vector<2x24x1xf32>
    %84 = vector.broadcast %83 : vector<2x24x1xf32> to vector<2x24x24xf32>
    %85 = arith.subf %81, %84 : vector<2x24x24xf32>
    %86 = math.exp %85 : vector<2x24x24xf32>
    %cst_30 = arith.constant dense<0.000000e+00> : vector<2x24xf32>
    %87 = vector.multi_reduction <add>, %86, %cst_30 [2] : vector<2x24x24xf32> to vector<2x24xf32>
    %88 = vector.shape_cast %87 : vector<2x24xf32> to vector<2x24x1xf32>
    %89 = tpu.reciprocal %88 : vector<2x24x1xf32> -> vector<2x24x1xf32>
    %90 = vector.broadcast %89 : vector<2x24x1xf32> to vector<2x24x24xf32>
    %91 = arith.mulf %86, %90 : vector<2x24x24xf32>
    %92 = arith.truncf %91 : vector<2x24x24xf32> to vector<2x24x24xbf16>
    "tpu.trace_start"() <{level = 10 : i32, message = "bqk,bkd->bqd"}> : () -> ()
    %cst_31 = arith.constant dense<0.000000e+00> : vector<2x24x16xf32>
    %93 = tpu.matmul %92, %75, %cst_31 {dimension_numbers = #tpu.dot_dimension_numbers<[2], [1], [1], [2], [0, 0, 0, 1, 1, 2], [0], [0]>} : vector<2x24x24xbf16>, vector<2x24x16xbf16>, vector<2x24x16xf32> -> vector<2x24x16xf32>
    "tpu.trace_stop"() : () -> ()
    %94 = vector.shape_cast %93 : vector<2x24x16xf32> to vector<1x2x24x16xf32>
    %95 = vector.extract_strided_slice %94 {offsets = [0, 0, 0, 0], sizes = [1, 1, 24, 16], strides = [1, 1, 1, 1]} : vector<1x2x24x16xf32> to vector<1x1x24x16xf32>
    %96 = vector.shape_cast %95 : vector<1x1x24x16xf32> to vector<1x24x16xf32>
    %97 = vector.extract_strided_slice %94 {offsets = [0, 1, 0, 0], sizes = [1, 1, 24, 16], strides = [1, 1, 1, 1]} : vector<1x2x24x16xf32> to vector<1x1x24x16xf32>
    %98 = vector.shape_cast %97 : vector<1x1x24x16xf32> to vector<1x24x16xf32>
    %99 = tpu.concatenate %96, %98 in 2 : vector<1x24x16xf32>, vector<1x24x16xf32> -> vector<1x24x32xf32>
    %100 = vector.shape_cast %99 : vector<1x24x32xf32> to vector<24x32xf32>
    %101 = arith.truncf %100 : vector<24x32xf32> to vector<24x32xbf16>
    %c0_32 = arith.constant 0 : index
    %c0_33 = arith.constant 0 : index
    %c0_34 = arith.constant 0 : index
    %102 = vector.load %arg18[%c0_32, %c0_33, %c0_34] : memref<1x32x32xbf16, #tpu.memory_space<vmem>>, vector<1x32x32xbf16>
    %103 = vector.shape_cast %102 : vector<1x32x32xbf16> to vector<32x32xbf16>
    %cst_35 = arith.constant dense<0.000000e+00> : vector<24x32xf32>
    %104 = tpu.matmul %101, %103, %cst_35 {dimension_numbers = #tpu.dot_dimension_numbers<[1], [0], [0], [1], [0, 0, 1, 1], [], []>} : vector<24x32xbf16>, vector<32x32xbf16>, vector<24x32xf32> -> vector<24x32xf32>
    %c0_36 = arith.constant 0 : index
    %c0_37 = arith.constant 0 : index
    %c0_38 = arith.constant 0 : index
    %105 = vector.load %arg19[%c0_36, %c0_37, %c0_38] : memref<1x1x32xf32, #tpu.memory_space<vmem>>, vector<1x1x32xf32>
    %106 = vector.shape_cast %105 : vector<1x1x32xf32> to vector<1x32xf32>
    %107 = vector.broadcast %106 : vector<1x32xf32> to vector<24x32xf32>
    %108 = arith.addf %104, %107 : vector<24x32xf32>
    %109 = arith.addf %12, %108 : vector<24x32xf32>
    %c0_39 = arith.constant 0 : index
    %c0_40 = arith.constant 0 : index
    %c0_41 = arith.constant 0 : index
    %110 = vector.load %arg20[%c0_39, %c0_40, %c0_41] : memref<1x1x32xf32, #tpu.memory_space<vmem>>, vector<1x1x32xf32>
    %111 = vector.shape_cast %110 : vector<1x1x32xf32> to vector<1x32xf32>
    %c0_42 = arith.constant 0 : index
    %c0_43 = arith.constant 0 : index
    %c0_44 = arith.constant 0 : index
    %112 = vector.load %arg21[%c0_42, %c0_43, %c0_44] : memref<1x1x32xf32, #tpu.memory_space<vmem>>, vector<1x1x32xf32>
    %113 = vector.shape_cast %112 : vector<1x1x32xf32> to vector<1x32xf32>
    %cst_45 = arith.constant dense<0.000000e+00> : vector<24xf32>
    %114 = vector.multi_reduction <add>, %109, %cst_45 [1] : vector<24x32xf32> to vector<24xf32>
    %115 = vector.shape_cast %114 : vector<24xf32> to vector<24x1xf32>
    %cst_46 = arith.constant 3.200000e+01 : f32
    %116 = vector.broadcast %cst_46 : f32 to vector<24x1xf32>
    %117 = arith.divf %115, %116 : vector<24x1xf32>
    %118 = vector.broadcast %117 : vector<24x1xf32> to vector<24x32xf32>
    %119 = arith.subf %109, %118 : vector<24x32xf32>
    %120 = arith.mulf %119, %119 : vector<24x32xf32>
    %cst_47 = arith.constant dense<0.000000e+00> : vector<24xf32>
    %121 = vector.multi_reduction <add>, %120, %cst_47 [1] : vector<24x32xf32> to vector<24xf32>
    %122 = vector.shape_cast %121 : vector<24xf32> to vector<24x1xf32>
    %cst_48 = arith.constant 3.200000e+01 : f32
    %123 = vector.broadcast %cst_48 : f32 to vector<24x1xf32>
    %124 = arith.divf %122, %123 : vector<24x1xf32>
    %cst_49 = arith.constant 9.99999974E-6 : f32
    %125 = vector.broadcast %cst_49 : f32 to vector<24x1xf32>
    %126 = arith.addf %124, %125 : vector<24x1xf32>
    %127 = math.rsqrt %126 : vector<24x1xf32>
    %128 = vector.broadcast %127 : vector<24x1xf32> to vector<24x32xf32>
    %129 = arith.mulf %119, %128 : vector<24x32xf32>
    %130 = vector.broadcast %111 : vector<1x32xf32> to vector<24x32xf32>
    %131 = arith.mulf %129, %130 : vector<24x32xf32>
    %132 = vector.broadcast %113 : vector<1x32xf32> to vector<24x32xf32>
    %133 = arith.addf %131, %132 : vector<24x32xf32>
    %134 = arith.truncf %133 : vector<24x32xf32> to vector<24x32xbf16>
    %c0_50 = arith.constant 0 : index
    %c0_51 = arith.constant 0 : index
    %c0_52 = arith.constant 0 : index
    %135 = vector.load %arg22[%c0_50, %c0_51, %c0_52] : memref<1x32x64xbf16, #tpu.memory_space<vmem>>, vector<1x32x64xbf16>
    %136 = vector.shape_cast %135 : vector<1x32x64xbf16> to vector<32x64xbf16>
    %cst_53 = arith.constant dense<0.000000e+00> : vector<24x64xf32>
    %137 = tpu.matmul %134, %136, %cst_53 {dimension_numbers = #tpu.dot_dimension_numbers<[1], [0], [0], [1], [0, 0, 1, 1], [], []>} : vector<24x32xbf16>, vector<32x64xbf16>, vector<24x64xf32> -> vector<24x64xf32>
    %c0_54 = arith.constant 0 : index
    %c0_55 = arith.constant 0 : index
    %c0_56 = arith.constant 0 : index
    %138 = vector.load %arg23[%c0_54, %c0_55, %c0_56] : memref<1x1x64xf32, #tpu.memory_space<vmem>>, vector<1x1x64xf32>
    %139 = vector.shape_cast %138 : vector<1x1x64xf32> to vector<1x64xf32>
    %140 = vector.broadcast %139 : vector<1x64xf32> to vector<24x64xf32>
    %141 = arith.addf %137, %140 : vector<24x64xf32>
    %cst_57 = arith.constant 0.000000e+00 : f32
    %142 = vector.broadcast %cst_57 : f32 to vector<24x64xf32>
    %143 = arith.maximumf %141, %142 : vector<24x64xf32>
    %144 = arith.truncf %143 : vector<24x64xf32> to vector<24x64xbf16>
    %c0_58 = arith.constant 0 : index
    %c0_59 = arith.constant 0 : index
    %c0_60 = arith.constant 0 : index
    %145 = vector.load %arg24[%c0_58, %c0_59, %c0_60] : memref<1x64x32xbf16, #tpu.memory_space<vmem>>, vector<1x64x32xbf16>
    %146 = vector.shape_cast %145 : vector<1x64x32xbf16> to vector<64x32xbf16>
    %cst_61 = arith.constant dense<0.000000e+00> : vector<24x32xf32>
    %147 = tpu.matmul %144, %146, %cst_61 {dimension_numbers = #tpu.dot_dimension_numbers<[1], [0], [0], [1], [0, 0, 1, 1], [], []>} : vector<24x64xbf16>, vector<64x32xbf16>, vector<24x32xf32> -> vector<24x32xf32>
    %c0_62 = arith.constant 0 : index
    %c0_63 = arith.constant 0 : index
    %c0_64 = arith.constant 0 : index
    %148 = vector.load %arg25[%c0_62, %c0_63, %c0_64] : memref<1x1x32xf32, #tpu.memory_space<vmem>>, vector<1x1x32xf32>
    %149 = vector.shape_cast %148 : vector<1x1x32xf32> to vector<1x32xf32>
    %150 = vector.broadcast %149 : vector<1x32xf32> to vector<24x32xf32>
    %151 = arith.addf %147, %150 : vector<24x32xf32>
    %152 = arith.addf %109, %151 : vector<24x32xf32>
    %c0_65 = arith.constant 0 : index
    %c0_66 = arith.constant 0 : index
    %153 = vector.load %arg27[%c0_65, %c0_66] : memref<24x32xf32, #tpu.memory_space<vmem>>, vector<24x32xf32>
    tpu.vector_store %arg27[%c0_65, %c0_66], %152 {strides = array<i32>} : memref<24x32xf32, #tpu.memory_space<vmem>>, vector<24x32xf32>,
    %c1_i32 = arith.constant 1 : i32
    %154 = arith.cmpi eq, %arg1, %c1_i32 : i32
    %155 = arith.extui %154 : i1 to i32
    %c0_i32_67 = arith.constant 0 : i32
    %156 = arith.cmpi ne, %155, %c0_i32_67 : i32
    scf.if %156 {
      %c0_68 = arith.constant 0 : index
      %c0_69 = arith.constant 0 : index
      %157 = vector.load %arg10[%c0_68, %c0_69] : memref<1x32xf32, #tpu.memory_space<vmem>>, vector<1x32xf32>
      %c0_70 = arith.constant 0 : index
      %c0_71 = arith.constant 0 : index
      %158 = vector.load %arg11[%c0_70, %c0_71] : memref<1x32xf32, #tpu.memory_space<vmem>>, vector<1x32xf32>
      %cst_72 = arith.constant dense<0.000000e+00> : vector<24xf32>
      %159 = vector.multi_reduction <add>, %152, %cst_72 [1] : vector<24x32xf32> to vector<24xf32>
      %160 = vector.shape_cast %159 : vector<24xf32> to vector<24x1xf32>
      %cst_73 = arith.constant 3.200000e+01 : f32
      %161 = vector.broadcast %cst_73 : f32 to vector<24x1xf32>
      %162 = arith.divf %160, %161 : vector<24x1xf32>
      %163 = vector.broadcast %162 : vector<24x1xf32> to vector<24x32xf32>
      %164 = arith.subf %152, %163 : vector<24x32xf32>
      %165 = arith.mulf %164, %164 : vector<24x32xf32>
      %cst_74 = arith.constant dense<0.000000e+00> : vector<24xf32>
      %166 = vector.multi_reduction <add>, %165, %cst_74 [1] : vector<24x32xf32> to vector<24xf32>
      %167 = vector.shape_cast %166 : vector<24xf32> to vector<24x1xf32>
      %cst_75 = arith.constant 3.200000e+01 : f32
      %168 = vector.broadcast %cst_75 : f32 to vector<24x1xf32>
      %169 = arith.divf %167, %168 : vector<24x1xf32>
      %cst_76 = arith.constant 9.99999974E-6 : f32
      %170 = vector.broadcast %cst_76 : f32 to vector<24x1xf32>
      %171 = arith.addf %169, %170 : vector<24x1xf32>
      %172 = math.rsqrt %171 : vector<24x1xf32>
      %173 = vector.broadcast %172 : vector<24x1xf32> to vector<24x32xf32>
      %174 = arith.mulf %164, %173 : vector<24x32xf32>
      %175 = vector.broadcast %157 : vector<1x32xf32> to vector<24x32xf32>
      %176 = arith.mulf %174, %175 : vector<24x32xf32>
      %177 = vector.broadcast %158 : vector<1x32xf32> to vector<24x32xf32>
      %178 = arith.addf %176, %177 : vector<24x32xf32>
      %179 = arith.truncf %178 : vector<24x32xf32> to vector<24x32xbf16>
      %c0_77 = arith.constant 0 : index
      %c0_78 = arith.constant 0 : index
      %180 = vector.load %arg12[%c0_77, %c0_78] : memref<32x128xbf16, #tpu.memory_space<vmem>>, vector<32x128xbf16>
      %cst_79 = arith.constant dense<0.000000e+00> : vector<24x128xf32>
      %181 = tpu.matmul %179, %180, %cst_79 {dimension_numbers = #tpu.dot_dimension_numbers<[1], [0], [0], [1], [0, 0, 1, 1], [], []>} : vector<24x32xbf16>, vector<32x128xbf16>, vector<24x128xf32> -> vector<24x128xf32>
      %c0_80 = arith.constant 0 : index
      %c0_81 = arith.constant 0 : index
      %182 = vector.load %arg13[%c0_80, %c0_81] : memref<1x128xf32, #tpu.memory_space<vmem>>, vector<1x128xf32>
      %183 = vector.broadcast %182 : vector<1x128xf32> to vector<24x128xf32>
      %184 = arith.addf %181, %183 : vector<24x128xf32>
      %185 = tpu.iota {dimensions = array<i32: 1>} : vector<24x128xi32>
      %c4_i32 = arith.constant 4 : i32
      %186 = vector.broadcast %c4_i32 : i32 to vector<24x128xi32>
      %187 = arith.cmpi slt, %185, %186 : vector<24x128xi32>
      %188 = math.tanh %184 : vector<24x128xf32>
      %189 = arith.select %187, %188, %184 : vector<24x128xi1>, vector<24x128xf32>
      %190 = arith.truncf %189 : vector<24x128xf32> to vector<24x128xbf16>
      %c0_82 = arith.constant 0 : index
      %c0_83 = arith.constant 0 : index
      %191 = vector.load %arg26[%c0_82, %c0_83] : memref<24x128xbf16, #tpu.memory_space<vmem>>, vector<24x128xbf16>
      tpu.vector_store %arg26[%c0_82, %c0_83], %190 {strides = array<i32>} : memref<24x128xbf16, #tpu.memory_space<vmem>>, vector<24x128xbf16>,
    } else {
    }
    return
  }
  func.func @transform_0(%arg0: i32, %arg1: i32) -> (i32, i32) {
    %c0_i32 = arith.constant 0 : i32
    %c0_i32_0 = arith.constant 0 : i32
    return %arg0, %c0_i32 : i32, i32
  }
  func.func @transform_1(%arg0: i32, %arg1: i32) -> (i32, i32, i32) {
    %c0_i32 = arith.constant 0 : i32
    %c0_i32_0 = arith.constant 0 : i32
    %c0_i32_1 = arith.constant 0 : i32
    return %arg0, %c0_i32, %c0_i32_0 : i32, i32, i32
  }
  func.func @transform_2(%arg0: i32, %arg1: i32) -> (i32, i32) {
    %c0_i32 = arith.constant 0 : i32
    %c0_i32_0 = arith.constant 0 : i32
    %c0_i32_1 = arith.constant 0 : i32
    return %c0_i32, %c0_i32_0 : i32, i32
  }
  func.func @transform_3(%arg0: i32, %arg1: i32) -> (i32, i32) {
    %c0_i32 = arith.constant 0 : i32
    %c0_i32_0 = arith.constant 0 : i32
    %c0_i32_1 = arith.constant 0 : i32
    return %c0_i32, %c0_i32_0 : i32, i32
  }
  func.func @transform_4(%arg0: i32, %arg1: i32) -> (i32, i32) {
    %c0_i32 = arith.constant 0 : i32
    %c0_i32_0 = arith.constant 0 : i32
    %c0_i32_1 = arith.constant 0 : i32
    return %c0_i32, %c0_i32_0 : i32, i32
  }
  func.func @transform_5(%arg0: i32, %arg1: i32) -> (i32, i32) {
    %c0_i32 = arith.constant 0 : i32
    %c0_i32_0 = arith.constant 0 : i32
    %c0_i32_1 = arith.constant 0 : i32
    return %c0_i32, %c0_i32_0 : i32, i32
  }
  func.func @transform_6(%arg0: i32, %arg1: i32) -> (i32, i32) {
    %c0_i32 = arith.constant 0 : i32
    %c0_i32_0 = arith.constant 0 : i32
    %c0_i32_1 = arith.constant 0 : i32
    return %c0_i32, %c0_i32_0 : i32, i32
  }
  func.func @transform_7(%arg0: i32, %arg1: i32) -> (i32, i32) {
    %c0_i32 = arith.constant 0 : i32
    %c0_i32_0 = arith.constant 0 : i32
    %c0_i32_1 = arith.constant 0 : i32
    return %c0_i32, %c0_i32_0 : i32, i32
  }
  func.func @transform_8(%arg0: i32, %arg1: i32) -> (i32, i32) {
    %c0_i32 = arith.constant 0 : i32
    %c0_i32_0 = arith.constant 0 : i32
    %c0_i32_1 = arith.constant 0 : i32
    return %c0_i32, %c0_i32_0 : i32, i32
  }
  func.func @transform_9(%arg0: i32, %arg1: i32) -> (i32, i32) {
    %c0_i32 = arith.constant 0 : i32
    %c0_i32_0 = arith.constant 0 : i32
    %c0_i32_1 = arith.constant 0 : i32
    return %c0_i32, %c0_i32_0 : i32, i32
  }
  func.func @transform_10(%arg0: i32, %arg1: i32) -> (i32, i32) {
    %c0_i32 = arith.constant 0 : i32
    %c0_i32_0 = arith.constant 0 : i32
    %c0_i32_1 = arith.constant 0 : i32
    return %c0_i32, %c0_i32_0 : i32, i32
  }
  func.func @transform_11(%arg0: i32, %arg1: i32) -> (i32, i32) {
    %c0_i32 = arith.constant 0 : i32
    %c0_i32_0 = arith.constant 0 : i32
    %c0_i32_1 = arith.constant 0 : i32
    return %c0_i32, %c0_i32_0 : i32, i32
  }
  func.func @transform_12(%arg0: i32, %arg1: i32) -> (i32, i32, i32) {
    %c0_i32 = arith.constant 0 : i32
    %c0_i32_0 = arith.constant 0 : i32
    %c0_i32_1 = arith.constant 0 : i32
    return %arg1, %c0_i32, %c0_i32_0 : i32, i32, i32
  }
  func.func @transform_13(%arg0: i32, %arg1: i32) -> (i32, i32, i32) {
    %c0_i32 = arith.constant 0 : i32
    %c0_i32_0 = arith.constant 0 : i32
    %c0_i32_1 = arith.constant 0 : i32
    return %arg1, %c0_i32, %c0_i32_0 : i32, i32, i32
  }
  func.func @transform_14(%arg0: i32, %arg1: i32) -> (i32, i32, i32) {
    %c0_i32 = arith.constant 0 : i32
    %c0_i32_0 = arith.constant 0 : i32
    %c0_i32_1 = arith.constant 0 : i32
    return %arg1, %c0_i32, %c0_i32_0 : i32, i32, i32
  }
  func.func @transform_15(%arg0: i32, %arg1: i32) -> (i32, i32, i32) {
    %c0_i32 = arith.constant 0 : i32
    %c0_i32_0 = arith.constant 0 : i32
    %c0_i32_1 = arith.constant 0 : i32
    return %arg1, %c0_i32, %c0_i32_0 : i32, i32, i32
  }
  func.func @transform_16(%arg0: i32, %arg1: i32) -> (i32, i32, i32) {
    %c0_i32 = arith.constant 0 : i32
    %c0_i32_0 = arith.constant 0 : i32
    %c0_i32_1 = arith.constant 0 : i32
    return %arg1, %c0_i32, %c0_i32_0 : i32, i32, i32
  }
  func.func @transform_17(%arg0: i32, %arg1: i32) -> (i32, i32, i32) {
    %c0_i32 = arith.constant 0 : i32
    %c0_i32_0 = arith.constant 0 : i32
    %c0_i32_1 = arith.constant 0 : i32
    return %arg1, %c0_i32, %c0_i32_0 : i32, i32, i32
  }
  func.func @transform_18(%arg0: i32, %arg1: i32) -> (i32, i32, i32) {
    %c0_i32 = arith.constant 0 : i32
    %c0_i32_0 = arith.constant 0 : i32
    %c0_i32_1 = arith.constant 0 : i32
    return %arg1, %c0_i32, %c0_i32_0 : i32, i32, i32
  }
  func.func @transform_19(%arg0: i32, %arg1: i32) -> (i32, i32, i32) {
    %c0_i32 = arith.constant 0 : i32
    %c0_i32_0 = arith.constant 0 : i32
    %c0_i32_1 = arith.constant 0 : i32
    return %arg1, %c0_i32, %c0_i32_0 : i32, i32, i32
  }
  func.func @transform_20(%arg0: i32, %arg1: i32) -> (i32, i32, i32) {
    %c0_i32 = arith.constant 0 : i32
    %c0_i32_0 = arith.constant 0 : i32
    %c0_i32_1 = arith.constant 0 : i32
    return %arg1, %c0_i32, %c0_i32_0 : i32, i32, i32
  }
  func.func @transform_21(%arg0: i32, %arg1: i32) -> (i32, i32, i32) {
    %c0_i32 = arith.constant 0 : i32
    %c0_i32_0 = arith.constant 0 : i32
    %c0_i32_1 = arith.constant 0 : i32
    return %arg1, %c0_i32, %c0_i32_0 : i32, i32, i32
  }
  func.func @transform_22(%arg0: i32, %arg1: i32) -> (i32, i32, i32) {
    %c0_i32 = arith.constant 0 : i32
    %c0_i32_0 = arith.constant 0 : i32
    %c0_i32_1 = arith.constant 0 : i32
    return %arg1, %c0_i32, %c0_i32_0 : i32, i32, i32
  }
  func.func @transform_23(%arg0: i32, %arg1: i32) -> (i32, i32, i32) {
    %c0_i32 = arith.constant 0 : i32
    %c0_i32_0 = arith.constant 0 : i32
    %c0_i32_1 = arith.constant 0 : i32
    return %arg1, %c0_i32, %c0_i32_0 : i32, i32, i32
  }
  func.func @transform_24(%arg0: i32, %arg1: i32) -> (i32, i32) {
    %c0_i32 = arith.constant 0 : i32
    %c0_i32_0 = arith.constant 0 : i32
    return %arg0, %c0_i32 : i32, i32
  }
}

module attributes {stable_mosaic.version = 11 : i64} {
  func.func @dt_kernel(%arg0: i32, %arg1: i32, %arg2: memref<24x128xbf16, #tpu.memory_space<vmem>>, %arg3: memref<1x1x24xf32, #tpu.memory_space<vmem>>, %arg4: memref<24x24xf32, #tpu.memory_space<vmem>>, %arg5: memref<128x32xbf16, #tpu.memory_space<vmem>>, %arg6: memref<24x32xf32, #tpu.memory_space<vmem>>, %arg7: memref<1x32xf32, #tpu.memory_space<vmem>>, %arg8: memref<1x32xf32, #tpu.memory_space<vmem>>, %arg9: memref<24x32xf32, #tpu.memory_space<vmem>>, %arg10: memref<1x32xf32, #tpu.memory_space<vmem>>, %arg11: memref<1x32xf32, #tpu.memory_space<vmem>>, %arg12: memref<32x128xbf16, #tpu.memory_space<vmem>>, %arg13: memref<1x128xf32, #tpu.memory_space<vmem>>, %arg14: memref<1x1x32xf32, #tpu.memory_space<vmem>>, %arg15: memref<1x1x32xf32, #tpu.memory_space<vmem>>, %arg16: memref<1x32x96xbf16, #tpu.memory_space<vmem>>, %arg17: memref<1x1x96xf32, #tpu.memory_space<vmem>>, %arg18: memref<1x32x32xbf16, #tpu.memory_space<vmem>>, %arg19: memref<1x1x32xf32, #tpu.memory_space<vmem>>, %arg20: memref<1x1x32xf32, #tpu.memory_space<vmem>>, %arg21: memref<1x1x32xf32, #tpu.memory_space<vmem>>, %arg22: memref<1x32x64xbf16, #tpu.memory_space<vmem>>, %arg23: memref<1x1x64xf32, #tpu.memory_space<vmem>>, %arg24: memref<1x64x32xbf16, #tpu.memory_space<vmem>>, %arg25: memref<1x1x32xf32, #tpu.memory_space<vmem>>, %arg26: memref<24x128xbf16, #tpu.memory_space<vmem>>, %arg27: memref<24x32xf32, #tpu.memory_space<vmem>>) attributes {dimension_semantics = [#tpu.dimension_semantics<parallel>, #tpu.dimension_semantics<arbitrary>], iteration_bounds = array<i64: 2, 2>, scalar_prefetch = 0 : i64, scratch_operands = 1 : i64, tpu.core_type = #tpu.core_type<tc>, window_params = [{transform_indices = @transform_0, window_bounds = array<i64: 24, 128>}, {transform_indices = @transform_1, window_bounds = array<i64: 1, 1, 24>}, {pipeline_mode = #tpu.pipeline_mode<synchronous>, transform_indices = @transform_2, window_bounds = array<i64: 24, 24>}, {pipeline_mode = #tpu.pipeline_mode<synchronous>, transform_indices = @transform_3, window_bounds = array<i64: 128, 32>}, {pipeline_mode = #tpu.pipeline_mode<synchronous>, transform_indices = @transform_4, window_bounds = array<i64: 24, 32>}, {pipeline_mode = #tpu.pipeline_mode<synchronous>, transform_indices = @transform_5, window_bounds = array<i64: 1, 32>}, {pipeline_mode = #tpu.pipeline_mode<synchronous>, transform_indices = @transform_6, window_bounds = array<i64: 1, 32>}, {pipeline_mode = #tpu.pipeline_mode<synchronous>, transform_indices = @transform_7, window_bounds = array<i64: 24, 32>}, {pipeline_mode = #tpu.pipeline_mode<synchronous>, transform_indices = @transform_8, window_bounds = array<i64: 1, 32>}, {pipeline_mode = #tpu.pipeline_mode<synchronous>, transform_indices = @transform_9, window_bounds = array<i64: 1, 32>}, {pipeline_mode = #tpu.pipeline_mode<synchronous>, transform_indices = @transform_10, window_bounds = array<i64: 32, 128>}, {pipeline_mode = #tpu.pipeline_mode<synchronous>, transform_indices = @transform_11, window_bounds = array<i64: 1, 128>}, {transform_indices = @transform_12, window_bounds = array<i64: 1, 1, 32>}, {transform_indices = @transform_13, window_bounds = array<i64: 1, 1, 32>}, {transform_indices = @transform_14, window_bounds = array<i64: 1, 32, 96>}, {transform_indices = @transform_15, window_bounds = array<i64: 1, 1, 96>}, {transform_indices = @transform_16, window_bounds = array<i64: 1, 32, 32>}, {transform_indices = @transform_17, window_bounds = array<i64: 1, 1, 32>}, {transform_indices = @transform_18, window_bounds = array<i64: 1, 1, 32>}, {transform_indices = @transform_19, window_bounds = array<i64: 1, 1, 32>}, {transform_indices = @transform_20, window_bounds = array<i64: 1, 32, 64>}, {transform_indices = @transform_21, window_bounds = array<i64: 1, 1, 64>}, {transform_indices = @transform_22, window_bounds = array<i64: 1, 64, 32>}, {transform_indices = @transform_23, window_bounds = array<i64: 1, 1, 32>}, {transform_indices = @transform_24, window_bounds = array<i64: 24, 128>}]} {
    %c0_i32 = arith.constant 0 : i32
    %0 = arith.cmpi eq, %arg1, %c0_i32 : i32
    %1 = arith.extui %0 : i1 to i32
    %c0_i32_0 = arith.constant 0 : i32
    %2 = arith.cmpi ne, %1, %c0_i32_0 : i32
    scf.if %2 {
      %c0_68 = arith.constant 0 : index
      %c0_69 = arith.constant 0 : index
      %157 = vector.load %arg2[%c0_68, %c0_69] : memref<24x128xbf16, #tpu.memory_space<vmem>>, vector<24x128xbf16>
      %c0_70 = arith.constant 0 : index
      %c0_71 = arith.constant 0 : index
      %158 = vector.load %arg5[%c0_70, %c0_71] : memref<128x32xbf16, #tpu.memory_space<vmem>>, vector<128x32xbf16>
      %cst_72 = arith.constant dense<0.000000e+00> : vector<24x32xf32>
      %159 = tpu.matmul %157, %158, %cst_72 {dimension_numbers = #tpu.dot_dimension_numbers<[1], [0], [0], [1], [0, 0, 1, 1], [], []>} : vector<24x128xbf16>, vector<128x32xbf16>, vector<24x32xf32> -> vector<24x32xf32>
      %160 = vector.shape_cast %159 : vector<24x32xf32> to vector<1x24x32xf32>
      %c0_73 = arith.constant 0 : index
      %c0_74 = arith.constant 0 : index
      %161 = vector.load %arg6[%c0_73, %c0_74] : memref<24x32xf32, #tpu.memory_space<vmem>>, vector<24x32xf32>
      %162 = vector.shape_cast %161 : vector<24x32xf32> to vector<1x24x32xf32>
      %163 = arith.addf %160, %162 : vector<1x24x32xf32>
      %c0_75 = arith.constant 0 : index
      %c0_76 = arith.constant 0 : index
      %164 = vector.load %arg7[%c0_75, %c0_76] : memref<1x32xf32, #tpu.memory_space<vmem>>, vector<1x32xf32>
      %c0_77 = arith.constant 0 : index
      %c0_78 = arith.constant 0 : index
      %165 = vector.load %arg8[%c0_77, %c0_78] : memref<1x32xf32, #tpu.memory_space<vmem>>, vector<1x32xf32>
      %cst_79 = arith.constant dense<0.000000e+00> : vector<1x24xf32>
      %166 = vector.multi_reduction <add>, %163, %cst_79 [2] : vector<1x24x32xf32> to vector<1x24xf32>
      %167 = vector.shape_cast %166 : vector<1x24xf32> to vector<1x24x1xf32>
      %cst_80 = arith.constant 3.200000e+01 : f32
      %168 = vector.broadcast %cst_80 : f32 to vector<1x24x1xf32>
      %169 = arith.divf %167, %168 : vector<1x24x1xf32>
      %170 = vector.broadcast %169 : vector<1x24x1xf32> to vector<1x24x32xf32>
      %171 = arith.subf %163, %170 : vector<1x24x32xf32>
      %172 = arith.mulf %171, %171 : vector<1x24x32xf32>
      %cst_81 = arith.constant dense<0.000000e+00> : vector<1x24xf32>
      %173 = vector.multi_reduction <add>, %172, %cst_81 [2] : vector<1x24x32xf32> to vector<1x24xf32>
      %174 = vector.shape_cast %173 : vector<1x24xf32> to vector<1x24x1xf32>
      %cst_82 = arith.constant 3.200000e+01 : f32
      %175 = vector.broadcast %cst_82 : f32 to vector<1x24x1xf32>
      %176 = arith.divf %174, %175 : vector<1x24x1xf32>
      %cst_83 = arith.constant 9.99999974E-6 : f32
      %177 = vector.broadcast %cst_83 : f32 to vector<1x24x1xf32>
      %178 = arith.addf %176, %177 : vector<1x24x1xf32>
      %179 = math.rsqrt %178 : vector<1x24x1xf32>
      %180 = vector.broadcast %179 : vector<1x24x1xf32> to vector<1x24x32xf32>
      %181 = arith.mulf %171, %180 : vector<1x24x32xf32>
      %182 = vector.shape_cast %164 : vector<1x32xf32> to vector<1x1x32xf32>
      %183 = vector.broadcast %182 : vector<1x1x32xf32> to vector<1x24x32xf32>
      %184 = arith.mulf %181, %183 : vector<1x24x32xf32>
      %185 = vector.shape_cast %165 : vector<1x32xf32> to vector<1x1x32xf32>
      %186 = vector.broadcast %185 : vector<1x1x32xf32> to vector<1x24x32xf32>
      %187 = arith.addf %184, %186 : vector<1x24x32xf32>
      %c0_84 = arith.constant 0 : index
      %c0_85 = arith.constant 0 : index
      %188 = vector.load %arg9[%c0_84, %c0_85] : memref<24x32xf32, #tpu.memory_space<vmem>>, vector<24x32xf32>
      %189 = vector.shape_cast %188 : vector<24x32xf32> to vector<1x24x32xf32>
      %190 = arith.addf %187, %189 : vector<1x24x32xf32>
      %191 = vector.shape_cast %190 : vector<1x24x32xf32> to vector<24x32xf32>
      %c0_86 = arith.constant 0 : index
      %c0_87 = arith.constant 0 : index
      %192 = vector.load %arg27[%c0_86, %c0_87] : memref<24x32xf32, #tpu.memory_space<vmem>>, vector<24x32xf32>
      tpu.vector_store %arg27[%c0_86, %c0_87], %191 {strides = array<i32>} : memref<24x32xf32, #tpu.memory_space<vmem>>, vector<24x32xf32>,
    } else {
    }
    %c0 = arith.constant 0 : index
    %c0_1 = arith.constant 0 : index
    %c0_2 = arith.constant 0 : index
    %3 = vector.load %arg3[%c0, %c0_1, %c0_2] : memref<1x1x24xf32, #tpu.memory_space<vmem>>, vector<1x1x24xf32>
    %cst = arith.constant 1.000000e+00 : f32
    %4 = vector.broadcast %cst : f32 to vector<1x1x24xf32>
    %5 = arith.subf %4, %3 : vector<1x1x24xf32>
    %cst_3 = arith.constant -1.000000e+04 : f32
    %6 = vector.broadcast %cst_3 : f32 to vector<1x1x24xf32>
    %7 = arith.mulf %5, %6 : vector<1x1x24xf32>
    %c0_4 = arith.constant 0 : index
    %c0_5 = arith.constant 0 : index
    %8 = vector.load %arg4[%c0_4, %c0_5] : memref<24x24xf32, #tpu.memory_space<vmem>>, vector<24x24xf32>
    %9 = vector.shape_cast %8 : vector<24x24xf32> to vector<1x24x24xf32>
    %10 = vector.broadcast %7 : vector<1x1x24xf32> to vector<1x24x24xf32>
    %11 = arith.addf %9, %10 : vector<1x24x24xf32>
    %c0_6 = arith.constant 0 : index
    %c0_7 = arith.constant 0 : index
    %12 = vector.load %arg27[%c0_6, %c0_7] : memref<24x32xf32, #tpu.memory_space<vmem>>, vector<24x32xf32>
    %c0_8 = arith.constant 0 : index
    %c0_9 = arith.constant 0 : index
    %c0_10 = arith.constant 0 : index
    %13 = vector.load %arg14[%c0_8, %c0_9, %c0_10] : memref<1x1x32xf32, #tpu.memory_space<vmem>>, vector<1x1x32xf32>
    %14 = vector.shape_cast %13 : vector<1x1x32xf32> to vector<1x32xf32>
    %c0_11 = arith.constant 0 : index
    %c0_12 = arith.constant 0 : index
    %c0_13 = arith.constant 0 : index
    %15 = vector.load %arg15[%c0_11, %c0_12, %c0_13] : memref<1x1x32xf32, #tpu.memory_space<vmem>>, vector<1x1x32xf32>
    %16 = vector.shape_cast %15 : vector<1x1x32xf32> to vector<1x32xf32>
    %cst_14 = arith.constant dense<0.000000e+00> : vector<24xf32>
    %17 = vector.multi_reduction <add>, %12, %cst_14 [1] : vector<24x32xf32> to vector<24xf32>
    %18 = vector.shape_cast %17 : vector<24xf32> to vector<24x1xf32>
    %cst_15 = arith.constant 3.200000e+01 : f32
    %19 = vector.broadcast %cst_15 : f32 to vector<24x1xf32>
    %20 = arith.divf %18, %19 : vector<24x1xf32>
    %21 = vector.broadcast %20 : vector<24x1xf32> to vector<24x32xf32>
    %22 = arith.subf %12, %21 : vector<24x32xf32>
    %23 = arith.mulf %22, %22 : vector<24x32xf32>
    %cst_16 = arith.constant dense<0.000000e+00> : vector<24xf32>
    %24 = vector.multi_reduction <add>, %23, %cst_16 [1] : vector<24x32xf32> to vector<24xf32>
    %25 = vector.shape_cast %24 : vector<24xf32> to vector<24x1xf32>
    %cst_17 = arith.constant 3.200000e+01 : f32
    %26 = vector.broadcast %cst_17 : f32 to vector<24x1xf32>
    %27 = arith.divf %25, %26 : vector<24x1xf32>
    %cst_18 = arith.constant 9.99999974E-6 : f32
    %28 = vector.broadcast %cst_18 : f32 to vector<24x1xf32>
    %29 = arith.addf %27, %28 : vector<24x1xf32>
    %30 = math.rsqrt %29 : vector<24x1xf32>
    %31 = vector.broadcast %30 : vector<24x1xf32> to vector<24x32xf32>
    %32 = arith.mulf %22, %31 : vector<24x32xf32>
    %33 = vector.broadcast %14 : vector<1x32xf32> to vector<24x32xf32>
    %34 = arith.mulf %32, %33 : vector<24x32xf32>
    %35 = vector.broadcast %16 : vector<1x32xf32> to vector<24x32xf32>
    %36 = arith.addf %34, %35 : vector<24x32xf32>
    %37 = arith.truncf %36 : vector<24x32xf32> to vector<24x32xbf16>
    %c0_19 = arith.constant 0 : index
    %c0_20 = arith.constant 0 : index
    %c0_21 = arith.constant 0 : index
    %38 = vector.load %arg16[%c0_19, %c0_20, %c0_21] : memref<1x32x96xbf16, #tpu.memory_space<vmem>>, vector<1x32x96xbf16>
    %39 = vector.shape_cast %38 : vector<1x32x96xbf16> to vector<32x96xbf16>
    %cst_22 = arith.constant dense<0.000000e+00> : vector<24x96xf32>
    %40 = tpu.matmul %37, %39, %cst_22 {dimension_numbers = #tpu.dot_dimension_numbers<[1], [0], [0], [1], [0, 0, 1, 1], [], []>} : vector<24x32xbf16>, vector<32x96xbf16>, vector<24x96xf32> -> vector<24x96xf32>
    %c0_23 = arith.constant 0 : index
    %c0_24 = arith.constant 0 : index
    %c0_25 = arith.constant 0 : index
    %41 = vector.load %arg17[%c0_23, %c0_24, %c0_25] : memref<1x1x96xf32, #tpu.memory_space<vmem>>, vector<1x1x96xf32>
    %42 = vector.shape_cast %41 : vector<1x1x96xf32> to vector<1x96xf32>
    %43 = vector.broadcast %42 : vector<1x96xf32> to vector<24x96xf32>
    %44 = arith.addf %40, %43 : vector<24x96xf32>
    %45 = vector.extract_strided_slice %44 {offsets = [0, 0], sizes = [24, 32], strides = [1, 1]} : vector<24x96xf32> to vector<24x32xf32>
    %46 = vector.extract_strided_slice %45 {offsets = [0, 0], sizes = [24, 16], strides = [1, 1]} : vector<24x32xf32> to vector<24x16xf32>
    %cst_26 = arith.constant 2.500000e-01 : f32
    %47 = vector.broadcast %cst_26 : f32 to vector<24x16xf32>
    %48 = arith.mulf %46, %47 : vector<24x16xf32>
    %49 = arith.truncf %48 : vector<24x16xf32> to vector<24x16xbf16>
    %50 = vector.shape_cast %49 : vector<24x16xbf16> to vector<1x1x24x16xbf16>
    %51 = vector.extract_strided_slice %45 {offsets = [0, 16], sizes = [24, 16], strides = [1, 1]} : vector<24x32xf32> to vector<24x16xf32>
    %cst_27 = arith.constant 2.500000e-01 : f32
    %52 = vector.broadcast %cst_27 : f32 to vector<24x16xf32>
    %53 = arith.mulf %51, %52 : vector<24x16xf32>
    %54 = arith.truncf %53 : vector<24x16xf32> to vector<24x16xbf16>
    %55 = vector.shape_cast %54 : vector<24x16xbf16> to vector<1x1x24x16xbf16>
    %56 = tpu.concatenate %50, %55 in 1 : vector<1x1x24x16xbf16>, vector<1x1x24x16xbf16> -> vector<1x2x24x16xbf16>
    %57 = vector.shape_cast %56 : vector<1x2x24x16xbf16> to vector<2x24x16xbf16>
    %58 = vector.extract_strided_slice %44 {offsets = [0, 32], sizes = [24, 32], strides = [1, 1]} : vector<24x96xf32> to vector<24x32xf32>
    %59 = vector.extract_strided_slice %58 {offsets = [0, 0], sizes = [24, 16], strides = [1, 1]} : vector<24x32xf32> to vector<24x16xf32>
    %60 = arith.truncf %59 : vector<24x16xf32> to vector<24x16xbf16>
    %61 = vector.shape_cast %60 : vector<24x16xbf16> to vector<1x1x24x16xbf16>
    %62 = vector.extract_strided_slice %58 {offsets = [0, 16], sizes = [24, 16], strides = [1, 1]} : vector<24x32xf32> to vector<24x16xf32>
    %63 = arith.truncf %62 : vector<24x16xf32> to vector<24x16xbf16>
    %64 = vector.shape_cast %63 : vector<24x16xbf16> to vector<1x1x24x16xbf16>
    %65 = tpu.concatenate %61, %64 in 1 : vector<1x1x24x16xbf16>, vector<1x1x24x16xbf16> -> vector<1x2x24x16xbf16>
    %66 = vector.shape_cast %65 : vector<1x2x24x16xbf16> to vector<2x24x16xbf16>
    %67 = vector.extract_strided_slice %44 {offsets = [0, 64], sizes = [24, 32], strides = [1, 1]} : vector<24x96xf32> to vector<24x32xf32>
    %68 = vector.extract_strided_slice %67 {offsets = [0, 0], sizes = [24, 16], strides = [1, 1]} : vector<24x32xf32> to vector<24x16xf32>
    %69 = arith.truncf %68 : vector<24x16xf32> to vector<24x16xbf16>
    %70 = vector.shape_cast %69 : vector<24x16xbf16> to vector<1x1x24x16xbf16>
    %71 = vector.extract_strided_slice %67 {offsets = [0, 16], sizes = [24, 16], strides = [1, 1]} : vector<24x32xf32> to vector<24x16xf32>
    %72 = arith.truncf %71 : vector<24x16xf32> to vector<24x16xbf16>
    %73 = vector.shape_cast %72 : vector<24x16xbf16> to vector<1x1x24x16xbf16>
    %74 = tpu.concatenate %70, %73 in 1 : vector<1x1x24x16xbf16>, vector<1x1x24x16xbf16> -> vector<1x2x24x16xbf16>
    %75 = vector.shape_cast %74 : vector<1x2x24x16xbf16> to vector<2x24x16xbf16>
    "tpu.trace_start"() <{level = 10 : i32, message = "bqd,bkd->bqk"}> : () -> ()
    %cst_28 = arith.constant dense<0.000000e+00> : vector<2x24x24xf32>
    %76 = tpu.matmul %57, %66, %cst_28 {dimension_numbers = #tpu.dot_dimension_numbers<[2], [2], [1], [1], [0, 0, 0, 1, 1, 1], [0], [0]>} : vector<2x24x16xbf16>, vector<2x24x16xbf16>, vector<2x24x24xf32> -> vector<2x24x24xf32>
    "tpu.trace_stop"() : () -> ()
    %77 = vector.shape_cast %76 : vector<2x24x24xf32> to vector<1x2x24x24xf32>
    %78 = vector.shape_cast %11 : vector<1x24x24xf32> to vector<1x1x24x24xf32>
    %79 = vector.broadcast %78 : vector<1x1x24x24xf32> to vector<1x2x24x24xf32>
    %80 = arith.addf %77, %79 : vector<1x2x24x24xf32>
    %81 = vector.shape_cast %80 : vector<1x2x24x24xf32> to vector<2x24x24xf32>
    %cst_29 = arith.constant dense<0xFF800000> : vector<2x24xf32>
    %82 = vector.multi_reduction <maximumf>, %81, %cst_29 [2] : vector<2x24x24xf32> to vector<2x24xf32>
    %83 = vector.shape_cast %82 : vector<2x24xf32> to vector<2x24x1xf32>
    %84 = vector.broadcast %83 : vector<2x24x1xf32> to vector<2x24x24xf32>
    %85 = arith.subf %81, %84 : vector<2x24x24xf32>
    %86 = math.exp %85 : vector<2x24x24xf32>
    %cst_30 = arith.constant dense<0.000000e+00> : vector<2x24xf32>
    %87 = vector.multi_reduction <add>, %86, %cst_30 [2] : vector<2x24x24xf32> to vector<2x24xf32>
    %88 = vector.shape_cast %87 : vector<2x24xf32> to vector<2x24x1xf32>
    %89 = tpu.reciprocal %88 : vector<2x24x1xf32> -> vector<2x24x1xf32>
    %90 = vector.broadcast %89 : vector<2x24x1xf32> to vector<2x24x24xf32>
    %91 = arith.mulf %86, %90 : vector<2x24x24xf32>
    %92 = arith.truncf %91 : vector<2x24x24xf32> to vector<2x24x24xbf16>
    "tpu.trace_start"() <{level = 10 : i32, message = "bqk,bkd->bqd"}> : () -> ()
    %cst_31 = arith.constant dense<0.000000e+00> : vector<2x24x16xf32>
    %93 = tpu.matmul %92, %75, %cst_31 {dimension_numbers = #tpu.dot_dimension_numbers<[2], [1], [1], [2], [0, 0, 0, 1, 1, 2], [0], [0]>} : vector<2x24x24xbf16>, vector<2x24x16xbf16>, vector<2x24x16xf32> -> vector<2x24x16xf32>
    "tpu.trace_stop"() : () -> ()
    %94 = vector.shape_cast %93 : vector<2x24x16xf32> to vector<1x2x24x16xf32>
    %95 = vector.extract_strided_slice %94 {offsets = [0, 0, 0, 0], sizes = [1, 1, 24, 16], strides = [1, 1, 1, 1]} : vector<1x2x24x16xf32> to vector<1x1x24x16xf32>
    %96 = vector.shape_cast %95 : vector<1x1x24x16xf32> to vector<1x24x16xf32>
    %97 = vector.extract_strided_slice %94 {offsets = [0, 1, 0, 0], sizes = [1, 1, 24, 16], strides = [1, 1, 1, 1]} : vector<1x2x24x16xf32> to vector<1x1x24x16xf32>
    %98 = vector.shape_cast %97 : vector<1x1x24x16xf32> to vector<1x24x16xf32>
    %99 = tpu.concatenate %96, %98 in 2 : vector<1x24x16xf32>, vector<1x24x16xf32> -> vector<1x24x32xf32>
    %100 = vector.shape_cast %99 : vector<1x24x32xf32> to vector<24x32xf32>
    %101 = arith.truncf %100 : vector<24x32xf32> to vector<24x32xbf16>
    %c0_32 = arith.constant 0 : index
    %c0_33 = arith.constant 0 : index
    %c0_34 = arith.constant 0 : index
    %102 = vector.load %arg18[%c0_32, %c0_33, %c0_34] : memref<1x32x32xbf16, #tpu.memory_space<vmem>>, vector<1x32x32xbf16>
    %103 = vector.shape_cast %102 : vector<1x32x32xbf16> to vector<32x32xbf16>
    %cst_35 = arith.constant dense<0.000000e+00> : vector<24x32xf32>
    %104 = tpu.matmul %101, %103, %cst_35 {dimension_numbers = #tpu.dot_dimension_numbers<[1], [0], [0], [1], [0, 0, 1, 1], [], []>} : vector<24x32xbf16>, vector<32x32xbf16>, vector<24x32xf32> -> vector<24x32xf32>
    %c0_36 = arith.constant 0 : index
    %c0_37 = arith.constant 0 : index
    %c0_38 = arith.constant 0 : index
    %105 = vector.load %arg19[%c0_36, %c0_37, %c0_38] : memref<1x1x32xf32, #tpu.memory_space<vmem>>, vector<1x1x32xf32>
    %106 = vector.shape_cast %105 : vector<1x1x32xf32> to vector<1x32xf32>
    %107 = vector.broadcast %106 : vector<1x32xf32> to vector<24x32xf32>
    %108 = arith.addf %104, %107 : vector<24x32xf32>
    %109 = arith.addf %12, %108 : vector<24x32xf32>
    %c0_39 = arith.constant 0 : index
    %c0_40 = arith.constant 0 : index
    %c0_41 = arith.constant 0 : index
    %110 = vector.load %arg20[%c0_39, %c0_40, %c0_41] : memref<1x1x32xf32, #tpu.memory_space<vmem>>, vector<1x1x32xf32>
    %111 = vector.shape_cast %110 : vector<1x1x32xf32> to vector<1x32xf32>
    %c0_42 = arith.constant 0 : index
    %c0_43 = arith.constant 0 : index
    %c0_44 = arith.constant 0 : index
    %112 = vector.load %arg21[%c0_42, %c0_43, %c0_44] : memref<1x1x32xf32, #tpu.memory_space<vmem>>, vector<1x1x32xf32>
    %113 = vector.shape_cast %112 : vector<1x1x32xf32> to vector<1x32xf32>
    %cst_45 = arith.constant dense<0.000000e+00> : vector<24xf32>
    %114 = vector.multi_reduction <add>, %109, %cst_45 [1] : vector<24x32xf32> to vector<24xf32>
    %115 = vector.shape_cast %114 : vector<24xf32> to vector<24x1xf32>
    %cst_46 = arith.constant 3.200000e+01 : f32
    %116 = vector.broadcast %cst_46 : f32 to vector<24x1xf32>
    %117 = arith.divf %115, %116 : vector<24x1xf32>
    %118 = vector.broadcast %117 : vector<24x1xf32> to vector<24x32xf32>
    %119 = arith.subf %109, %118 : vector<24x32xf32>
    %120 = arith.mulf %119, %119 : vector<24x32xf32>
    %cst_47 = arith.constant dense<0.000000e+00> : vector<24xf32>
    %121 = vector.multi_reduction <add>, %120, %cst_47 [1] : vector<24x32xf32> to vector<24xf32>
    %122 = vector.shape_cast %121 : vector<24xf32> to vector<24x1xf32>
    %cst_48 = arith.constant 3.200000e+01 : f32
    %123 = vector.broadcast %cst_48 : f32 to vector<24x1xf32>
    %124 = arith.divf %122, %123 : vector<24x1xf32>
    %cst_49 = arith.constant 9.99999974E-6 : f32
    %125 = vector.broadcast %cst_49 : f32 to vector<24x1xf32>
    %126 = arith.addf %124, %125 : vector<24x1xf32>
    %127 = math.rsqrt %126 : vector<24x1xf32>
    %128 = vector.broadcast %127 : vector<24x1xf32> to vector<24x32xf32>
    %129 = arith.mulf %119, %128 : vector<24x32xf32>
    %130 = vector.broadcast %111 : vector<1x32xf32> to vector<24x32xf32>
    %131 = arith.mulf %129, %130 : vector<24x32xf32>
    %132 = vector.broadcast %113 : vector<1x32xf32> to vector<24x32xf32>
    %133 = arith.addf %131, %132 : vector<24x32xf32>
    %134 = arith.truncf %133 : vector<24x32xf32> to vector<24x32xbf16>
    %c0_50 = arith.constant 0 : index
    %c0_51 = arith.constant 0 : index
    %c0_52 = arith.constant 0 : index
    %135 = vector.load %arg22[%c0_50, %c0_51, %c0_52] : memref<1x32x64xbf16, #tpu.memory_space<vmem>>, vector<1x32x64xbf16>
    %136 = vector.shape_cast %135 : vector<1x32x64xbf16> to vector<32x64xbf16>
    %cst_53 = arith.constant dense<0.000000e+00> : vector<24x64xf32>
    %137 = tpu.matmul %134, %136, %cst_53 {dimension_numbers = #tpu.dot_dimension_numbers<[1], [0], [0], [1], [0, 0, 1, 1], [], []>} : vector<24x32xbf16>, vector<32x64xbf16>, vector<24x64xf32> -> vector<24x64xf32>
    %c0_54 = arith.constant 0 : index
    %c0_55 = arith.constant 0 : index
    %c0_56 = arith.constant 0 : index
    %138 = vector.load %arg23[%c0_54, %c0_55, %c0_56] : memref<1x1x64xf32, #tpu.memory_space<vmem>>, vector<1x1x64xf32>
    %139 = vector.shape_cast %138 : vector<1x1x64xf32> to vector<1x64xf32>
    %140 = vector.broadcast %139 : vector<1x64xf32> to vector<24x64xf32>
    %141 = arith.addf %137, %140 : vector<24x64xf32>
    %cst_57 = arith.constant 0.000000e+00 : f32
    %142 = vector.broadcast %cst_57 : f32 to vector<24x64xf32>
    %143 = arith.maximumf %141, %142 : vector<24x64xf32>
    %144 = arith.truncf %143 : vector<24x64xf32> to vector<24x64xbf16>
    %c0_58 = arith.constant 0 : index
    %c0_59 = arith.constant 0 : index
    %c0_60 = arith.constant 0 : index
    %145 = vector.load %arg24[%c0_58, %c0_59, %c0_60] : memref<1x64x32xbf16, #tpu.memory_space<vmem>>, vector<1x64x32xbf16>
    %146 = vector.shape_cast %145 : vector<1x64x32xbf16> to vector<64x32xbf16>
    %cst_61 = arith.constant dense<0.000000e+00> : vector<24x32xf32>
    %147 = tpu.matmul %144, %146, %cst_61 {dimension_numbers = #tpu.dot_dimension_numbers<[1], [0], [0], [1], [0, 0, 1, 1], [], []>} : vector<24x64xbf16>, vector<64x32xbf16>, vector<24x32xf32> -> vector<24x32xf32>
    %c0_62 = arith.constant 0 : index
    %c0_63 = arith.constant 0 : index
    %c0_64 = arith.constant 0 : index
    %148 = vector.load %arg25[%c0_62, %c0_63, %c0_64] : memref<1x1x32xf32, #tpu.memory_space<vmem>>, vector<1x1x32xf32>
    %149 = vector.shape_cast %148 : vector<1x1x32xf32> to vector<1x32xf32>
    %150 = vector.broadcast %149 : vector<1x32xf32> to vector<24x32xf32>
    %151 = arith.addf %147, %150 : vector<24x32xf32>
    %152 = arith.addf %109, %151 : vector<24x32xf32>
    %c0_65 = arith.constant 0 : index
    %c0_66 = arith.constant 0 : index
    %153 = vector.load %arg27[%c0_65, %c0_66] : memref<24x32xf32, #tpu.memory_space<vmem>>, vector<24x32xf32>
    tpu.vector_store %arg27[%c0_65, %c0_66], %152 {strides = array<i32>} : memref<24x32xf32, #tpu.memory_space<vmem>>, vector<24x32xf32>,
    %c1_i32 = arith.constant 1 : i32
    %154 = arith.cmpi eq, %arg1, %c1_i32 : i32
    %155 = arith.extui %154 : i1 to i32
    %c0_i32_67 = arith.constant 0 : i32
    %156 = arith.cmpi ne, %155, %c0_i32_67 : i32
    scf.if %156 {
      %c0_68 = arith.constant 0 : index
      %c0_69 = arith.constant 0 : index
      %157 = vector.load %arg10[%c0_68, %c0_69] : memref<1x32xf32, #tpu.memory_space<vmem>>, vector<1x32xf32>
      %c0_70 = arith.constant 0 : index
      %c0_71 = arith.constant 0 : index
      %158 = vector.load %arg11[%c0_70, %c0_71] : memref<1x32xf32, #tpu.memory_space<vmem>>, vector<1x32xf32>
      %cst_72 = arith.constant dense<0.000000e+00> : vector<24xf32>
      %159 = vector.multi_reduction <add>, %152, %cst_72 [1] : vector<24x32xf32> to vector<24xf32>
      %160 = vector.shape_cast %159 : vector<24xf32> to vector<24x1xf32>
      %cst_73 = arith.constant 3.200000e+01 : f32
      %161 = vector.broadcast %cst_73 : f32 to vector<24x1xf32>
      %162 = arith.divf %160, %161 : vector<24x1xf32>
      %163 = vector.broadcast %162 : vector<24x1xf32> to vector<24x32xf32>
      %164 = arith.subf %152, %163 : vector<24x32xf32>
      %165 = arith.mulf %164, %164 : vector<24x32xf32>
      %cst_74 = arith.constant dense<0.000000e+00> : vector<24xf32>
      %166 = vector.multi_reduction <add>, %165, %cst_74 [1] : vector<24x32xf32> to vector<24xf32>
      %167 = vector.shape_cast %166 : vector<24xf32> to vector<24x1xf32>
      %cst_75 = arith.constant 3.200000e+01 : f32
      %168 = vector.broadcast %cst_75 : f32 to vector<24x1xf32>
      %169 = arith.divf %167, %168 : vector<24x1xf32>
      %cst_76 = arith.constant 9.99999974E-6 : f32
      %170 = vector.broadcast %cst_76 : f32 to vector<24x1xf32>
      %171 = arith.addf %169, %170 : vector<24x1xf32>
      %172 = math.rsqrt %171 : vector<24x1xf32>
      %173 = vector.broadcast %172 : vector<24x1xf32> to vector<24x32xf32>
      %174 = arith.mulf %164, %173 : vector<24x32xf32>
      %175 = vector.broadcast %157 : vector<1x32xf32> to vector<24x32xf32>
      %176 = arith.mulf %174, %175 : vector<24x32xf32>
      %177 = vector.broadcast %158 : vector<1x32xf32> to vector<24x32xf32>
      %178 = arith.addf %176, %177 : vector<24x32xf32>
      %179 = arith.truncf %178 : vector<24x32xf32> to vector<24x32xbf16>
      %c0_77 = arith.constant 0 : index
      %c0_78 = arith.constant 0 : index
      %180 = vector.load %arg12[%c0_77, %c0_78] : memref<32x128xbf16, #tpu.memory_space<vmem>>, vector<32x128xbf16>
      %cst_79 = arith.constant dense<0.000000e+00> : vector<24x128xf32>
      %181 = tpu.matmul %179, %180, %cst_79 {dimension_numbers = #tpu.dot_dimension_numbers<[1], [0], [0], [1], [0, 0, 1, 1], [], []>} : vector<24x32xbf16>, vector<32x128xbf16>, vector<24x128xf32> -> vector<24x128xf32>
      %c0_80 = arith.constant 0 : index
      %c0_81 = arith.constant 0 : index
      %182 = vector.load %arg13[%c0_80, %c0_81] : memref<1x128xf32, #tpu.memory_space<vmem>>, vector<1x128xf32>
      %183 = vector.broadcast %182 : vector<1x128xf32> to vector<24x128xf32>
      %184 = arith.addf %181, %183 : vector<24x128xf32>
      %185 = tpu.iota {dimensions = array<i32: 1>} : vector<24x128xi32>
      %c4_i32 = arith.constant 4 : i32
      %186 = vector.broadcast %c4_i32 : i32 to vector<24x128xi32>
      %187 = arith.cmpi slt, %185, %186 : vector<24x128xi32>
      %188 = math.tanh %184 : vector<24x128xf32>
      %189 = arith.select %187, %188, %184 : vector<24x128xi1>, vector<24x128xf32>
      %190 = arith.truncf %189 : vector<24x128xf32> to vector<24x128xbf16>
      %c0_82 = arith.constant 0 : index
      %c0_83 = arith.constant 0 : index
      %191 = vector.load %arg26[%c0_82, %c0_83] : memref<24x128xbf16, #tpu.memory_space<vmem>>, vector<24x128xbf16>
      tpu.vector_store %arg26[%c0_82, %c0_83], %190 {strides = array<i32>} : memref<24x128xbf16, #tpu.memory_space<vmem>>, vector<24x128xbf16>,
    } else {
    }
    return
  }
  func.func @transform_0(%arg0: i32, %arg1: i32) -> (i32, i32) {
    %c0_i32 = arith.constant 0 : i32
    %c0_i32_0 = arith.constant 0 : i32
    return %arg0, %c0_i32 : i32, i32
  }
  func.func @transform_1(%arg0: i32, %arg1: i32) -> (i32, i32, i32) {
    %c0_i32 = arith.constant 0 : i32
    %c0_i32_0 = arith.constant 0 : i32
    %c0_i32_1 = arith.constant 0 : i32
    return %arg0, %c0_i32, %c0_i32_0 : i32, i32, i32
  }
  func.func @transform_2(%arg0: i32, %arg1: i32) -> (i32, i32) {
    %c0_i32 = arith.constant 0 : i32
    %c0_i32_0 = arith.constant 0 : i32
    %c0_i32_1 = arith.constant 0 : i32
    return %c0_i32, %c0_i32_0 : i32, i32
  }
  func.func @transform_3(%arg0: i32, %arg1: i32) -> (i32, i32) {
    %c0_i32 = arith.constant 0 : i32
    %c0_i32_0 = arith.constant 0 : i32
    %c0_i32_1 = arith.constant 0 : i32
    return %c0_i32, %c0_i32_0 : i32, i32
  }
  func.func @transform_4(%arg0: i32, %arg1: i32) -> (i32, i32) {
    %c0_i32 = arith.constant 0 : i32
    %c0_i32_0 = arith.constant 0 : i32
    %c0_i32_1 = arith.constant 0 : i32
    return %c0_i32, %c0_i32_0 : i32, i32
  }
  func.func @transform_5(%arg0: i32, %arg1: i32) -> (i32, i32) {
    %c0_i32 = arith.constant 0 : i32
    %c0_i32_0 = arith.constant 0 : i32
    %c0_i32_1 = arith.constant 0 : i32
    return %c0_i32, %c0_i32_0 : i32, i32
  }
  func.func @transform_6(%arg0: i32, %arg1: i32) -> (i32, i32) {
    %c0_i32 = arith.constant 0 : i32
    %c0_i32_0 = arith.constant 0 : i32
    %c0_i32_1 = arith.constant 0 : i32
    return %c0_i32, %c0_i32_0 : i32, i32
  }
  func.func @transform_7(%arg0: i32, %arg1: i32) -> (i32, i32) {
    %c0_i32 = arith.constant 0 : i32
    %c0_i32_0 = arith.constant 0 : i32
    %c0_i32_1 = arith.constant 0 : i32
    return %c0_i32, %c0_i32_0 : i32, i32
  }
  func.func @transform_8(%arg0: i32, %arg1: i32) -> (i32, i32) {
    %c0_i32 = arith.constant 0 : i32
    %c0_i32_0 = arith.constant 0 : i32
    %c0_i32_1 = arith.constant 0 : i32
    return %c0_i32, %c0_i32_0 : i32, i32
  }
  func.func @transform_9(%arg0: i32, %arg1: i32) -> (i32, i32) {
    %c0_i32 = arith.constant 0 : i32
    %c0_i32_0 = arith.constant 0 : i32
    %c0_i32_1 = arith.constant 0 : i32
    return %c0_i32, %c0_i32_0 : i32, i32
  }
  func.func @transform_10(%arg0: i32, %arg1: i32) -> (i32, i32) {
    %c0_i32 = arith.constant 0 : i32
    %c0_i32_0 = arith.constant 0 : i32
    %c0_i32_1 = arith.constant 0 : i32
    return %c0_i32, %c0_i32_0 : i32, i32
  }
  func.func @transform_11(%arg0: i32, %arg1: i32) -> (i32, i32) {
    %c0_i32 = arith.constant 0 : i32
    %c0_i32_0 = arith.constant 0 : i32
    %c0_i32_1 = arith.constant 0 : i32
    return %c0_i32, %c0_i32_0 : i32, i32
  }
  func.func @transform_12(%arg0: i32, %arg1: i32) -> (i32, i32, i32) {
    %c0_i32 = arith.constant 0 : i32
    %c0_i32_0 = arith.constant 0 : i32
    %c0_i32_1 = arith.constant 0 : i32
    return %arg1, %c0_i32, %c0_i32_0 : i32, i32, i32
  }
  func.func @transform_13(%arg0: i32, %arg1: i32) -> (i32, i32, i32) {
    %c0_i32 = arith.constant 0 : i32
    %c0_i32_0 = arith.constant 0 : i32
    %c0_i32_1 = arith.constant 0 : i32
    return %arg1, %c0_i32, %c0_i32_0 : i32, i32, i32
  }
  func.func @transform_14(%arg0: i32, %arg1: i32) -> (i32, i32, i32) {
    %c0_i32 = arith.constant 0 : i32
    %c0_i32_0 = arith.constant 0 : i32
    %c0_i32_1 = arith.constant 0 : i32
    return %arg1, %c0_i32, %c0_i32_0 : i32, i32, i32
  }
  func.func @transform_15(%arg0: i32, %arg1: i32) -> (i32, i32, i32) {
    %c0_i32 = arith.constant 0 : i32
    %c0_i32_0 = arith.constant 0 : i32
    %c0_i32_1 = arith.constant 0 : i32
    return %arg1, %c0_i32, %c0_i32_0 : i32, i32, i32
  }
  func.func @transform_16(%arg0: i32, %arg1: i32) -> (i32, i32, i32) {
    %c0_i32 = arith.constant 0 : i32
    %c0_i32_0 = arith.constant 0 : i32
    %c0_i32_1 = arith.constant 0 : i32
    return %arg1, %c0_i32, %c0_i32_0 : i32, i32, i32
  }
  func.func @transform_17(%arg0: i32, %arg1: i32) -> (i32, i32, i32) {
    %c0_i32 = arith.constant 0 : i32
    %c0_i32_0 = arith.constant 0 : i32
    %c0_i32_1 = arith.constant 0 : i32
    return %arg1, %c0_i32, %c0_i32_0 : i32, i32, i32
  }
  func.func @transform_18(%arg0: i32, %arg1: i32) -> (i32, i32, i32) {
    %c0_i32 = arith.constant 0 : i32
    %c0_i32_0 = arith.constant 0 : i32
    %c0_i32_1 = arith.constant 0 : i32
    return %arg1, %c0_i32, %c0_i32_0 : i32, i32, i32
  }
  func.func @transform_19(%arg0: i32, %arg1: i32) -> (i32, i32, i32) {
    %c0_i32 = arith.constant 0 : i32
    %c0_i32_0 = arith.constant 0 : i32
    %c0_i32_1 = arith.constant 0 : i32
    return %arg1, %c0_i32, %c0_i32_0 : i32, i32, i32
  }
  func.func @transform_20(%arg0: i32, %arg1: i32) -> (i32, i32, i32) {
    %c0_i32 = arith.constant 0 : i32
    %c0_i32_0 = arith.constant 0 : i32
    %c0_i32_1 = arith.constant 0 : i32
    return %arg1, %c0_i32, %c0_i32_0 : i32, i32, i32
  }
  func.func @transform_21(%arg0: i32, %arg1: i32) -> (i32, i32, i32) {
    %c0_i32 = arith.constant 0 : i32
    %c0_i32_0 = arith.constant 0 : i32
    %c0_i32_1 = arith.constant 0 : i32
    return %arg1, %c0_i32, %c0_i32_0 : i32, i32, i32
  }
  func.func @transform_22(%arg0: i32, %arg1: i32) -> (i32, i32, i32) {
    %c0_i32 = arith.constant 0 : i32
    %c0_i32_0 = arith.constant 0 : i32
    %c0_i32_1 = arith.constant 0 : i32
    return %arg1, %c0_i32, %c0_i32_0 : i32, i32, i32
  }
  func.func @transform_23(%arg0: i32, %arg1: i32) -> (i32, i32, i32) {
    %c0_i32 = arith.constant 0 : i32
    %c0_i32_0 = arith.constant 0 : i32
    %c0_i32_1 = arith.constant 0 : i32
    return %arg1, %c0_i32, %c0_i32_0 : i32, i32, i32
  }
  func.func @transform_24(%arg0: i32, %arg1: i32) -> (i32, i32) {
    %c0_i32 = arith.constant 0 : i32
    %c0_i32_0 = arith.constant 0 : i32
    return %arg0, %c0_i32 : i32, i32
  }
}

</mosaic_0001>

<bundles_post_ra>
// kernel: tpu_custom_call.1
= control target key start
LH: loop header
LB: loop body
LE: loop exit
PB: predicated region body
PF: predicated region fallthrough
CT: control target
= control target key end

     0   :  { %s4097_s0 = inlined_call_operand.vmem [shape: bf16[48,128], index: 0, kind: input, shape index: {}]   ;;  %s4098_s1 = inlined_call_operand.hbm [shape: f32[2,1,24], index: 1, kind: input, shape index: {}]   ;;  %s4099_s2 = inlined_call_operand.vmem [shape: f32[24,24], index: 2, kind: input, shape index: {}]   ;;  %s4100_s3 = inlined_call_operand.vmem [shape: bf16[128,32], index: 3, kind: input, shape index: {}]   ;;  %s4101_s4 = inlined_call_operand.hbm [shape: f32[24,32], index: 4, kind: input, shape index: {}]   ;;  %s4102_s5 = inlined_call_operand.hbm [shape: f32[1,32], index: 5, kind: input, shape index: {}]   ;;  %s4103_s6 = inlined_call_operand.hbm [shape: f32[1,32], index: 6, kind: input, shape index: {}]   ;;  %s4104_s7 = inlined_call_operand.hbm [shape: f32[24,32], index: 7, kind: input, shape index: {}]   ;;  %s4105_s8 = inlined_call_operand.hbm [shape: f32[1,32], index: 8, kind: input, shape index: {}]   ;;  %s4106_s9 = inlined_call_operand.hbm [shape: f32[1,32], index: 9, kind: input, shape index: {}]   ;;  %s4107_s10 = inlined_call_operand.vmem [shape: bf16[32,128], index: 10, kind: input, shape index: {}]   ;;  %s4108_s11 = inlined_call_operand.hbm [shape: f32[1,128], index: 11, kind: input, shape index: {}]   ;;  %s4109_s12 = inlined_call_operand.vmem [shape: f32[2,1,32], index: 12, kind: input, shape index: {}]   ;;  %s4110_s13 = inlined_call_operand.vmem [shape: f32[2,1,32], index: 13, kind: input, shape index: {}]   ;;  %s4111_s14 = inlined_call_operand.vmem [shape: bf16[2,32,96], index: 14, kind: input, shape index: {}]   ;;  %s4112_s15 = inlined_call_operand.vmem [shape: f32[2,1,96], index: 15, kind: input, shape index: {}]   ;;  %s4113_s16 = inlined_call_operand.vmem [shape: bf16[2,32,32], index: 16, kind: input, shape index: {}]   ;;  %s4114_s17 = inlined_call_operand.vmem [shape: f32[2,1,32], index: 17, kind: input, shape index: {}]   ;;  %s4115_s18 = inlined_call_operand.vmem [shape: f32[2,1,32], index: 18, kind: input, shape index: {}]   ;;  %s4116_s19 = inlined_call_operand.vmem [shape: f32[2,1,32], index: 19, kind: input, shape index: {}]   ;;  %s4117_s20 = inlined_call_operand.vmem [shape: bf16[2,32,64], index: 20, kind: input, shape index: {}]   ;;  %s4118_s21 = inlined_call_operand.vmem [shape: f32[2,1,64], index: 21, kind: input, shape index: {}]   ;;  %s4119_s22 = inlined_call_operand.vmem [shape: bf16[2,64,32], index: 22, kind: input, shape index: {}]   ;;  %s4120_s23 = inlined_call_operand.vmem [shape: f32[2,1,32], index: 23, kind: input, shape index: {}]   ;;  %s4121_s24 = inlined_call_operand.hbm [shape: bf16[48,128], index: 24, kind: output, shape index: {}]  }
   0x1   :  { %4143 = sst [smem:[#allocation37_spill]] %s4097_s0 }
   0x2   :  { %4144 = sst [smem:[#allocation38_spill]] %s4098_s1 }
   0x3   :  { %4145 = sst [smem:[#allocation39_spill]] %s4099_s2 }
   0x4   :  { %4146 = sst [smem:[#allocation40_spill]] %s4100_s3 }
   0x5   :  { %4147 = sst [smem:[#allocation41_spill]] %s4101_s4 }
   0x6   :  { %4148 = sst [smem:[#allocation42_spill]] %s4102_s5 }
   0x7   :  { %4149 = sst [smem:[#allocation43_spill]] %s4103_s6 }
   0x8   :  { %4150 = sst [smem:[#allocation44_spill]] %s4104_s7 }
   0x9   :  { %4151 = sst [smem:[#allocation45_spill]] %s4105_s8 }
   0xa   :  { %4152 = sst [smem:[#allocation46_spill]] %s4106_s9 }
   0xb   :  { %4153 = sst [smem:[#allocation47_spill]] %s4107_s10 }
   0xc   :  { %4154 = sst [smem:[#allocation48_spill]] %s4108_s11 }
   0xd   :  { %4155 = sst [smem:[#allocation49_spill]] %s4111_s14 }
   0xe   :  { %4156 = sst [smem:[#allocation50_spill]] %s4113_s16 }
   0xf   :  { %4157 = sst [smem:[#allocation51_spill]] %s4114_s17 }
  0x10   :  { %4158 = sst [smem:[#allocation52_spill]] %s4115_s18 }
  0x11   :  { %4159 = sst [smem:[#allocation53_spill]] %s4116_s19 }
  0x12   :  { %4160 = sst [smem:[#allocation54_spill]] %s4117_s20 }
  0x13   :  { %4161 = sst [smem:[#allocation55_spill]] %s4118_s21 }
  0x14   :  { %4162 = sst [smem:[#allocation56_spill]] %s4119_s22 }
  0x15   :  { %4163 = sst [smem:[#allocation57_spill]] %s4120_s23 }
  0x16   :  { %4164 = sst [smem:[#allocation58_spill]] %s4121_s24 }
  0x17   :  { %29 = vsyncpa [#allocation4], 0 }
  0x18   :  { %31 = vsyncpa [#allocation4 + $0x1], 0 }
  0x19   :  { %32 = vsyncpa [#allocation7], 0 }
  0x1a   :  { %33 = vsyncpa [#allocation10], 0 }
  0x1b   :  { %34 = vsyncpa [#allocation13], 0 }
  0x1c   :  { %35 = vsyncpa [#allocation16], 0 }
  0x1d   :  { %36 = vsyncpa [#allocation5], 0 }
  0x1e   :  { %38 = vsyncpa [#allocation5 + $0x1], 0  ;;  %s3540_s5 = smov 0   ;;  %s3542_s26 = smov 0  }
  0x1f   :  { %s3544_s27 = smov 0   ;;  %s3546_s28 = smov 0  }
  0x20   :  { %s3548_s6 = smov 0   ;;  %s3550_s2 = smov 0  }
  0x21   :  { %s3552_s29 = smov 0   ;;  %s3554_s0 = smov 0  }
  0x22 LB: > { %4165 = sst [smem:[#allocation24_spill]] %s3369_s5  ;;  %s4124_s7 = sadd.s32 4294967295, %s3397_s0   ;;  %s3397_s0 = sphi %s3554_s0, %s44_s0   ;;  %s3393_s29 = sphi %s3552_s29, %s4235_s29   ;;  %s3389_s2 = sphi %s3550_s2, %s4234_s2   ;;  %s3385_s6 = sphi %s3548_s6, %s4233_s6   ;;  %s3381_s28 = sphi %s3546_s28, %s4232_s28   ;;  %s3377_s27 = sphi %s3544_s27, %s4231_s27   ;;  %s3373_s26 = sphi %s3542_s26, %s4230_s26   ;;  %s3369_s5 = sphi %s3540_s5, %s4229_s5  }
  0x23   : > { %4166 = sst [smem:[#allocation25_spill]] %s3373_s26  ;;  %p2586_p0 = scmp.ge.s32.totalorder %s3397_s0, 1 }
  0x24   : > { %4167 = sst [smem:[#allocation26_spill]] %s3377_s27  ;;  %p3584_p1 = scmp.eq.s32.totalorder %s4124_s7, 0 }
  0x25   : > { %4168 = sst [smem:[#allocation27_spill]] %s3385_s6  ;;  %p661_p2 = scmp.lt.s32.totalorder %s3397_s0, 5 }
  0x26   : > { %4169 = sst [smem:[#allocation28_spill]] %s3389_s2  ;;  %s3399_s25 = smov [#allocation6]  }
  0x27   : > { %4170 = sst [smem:[#allocation29_spill]] %s3393_s29  ;;  %p3589_p3 = pnand %p2586_p0, %p661_p2 }
  0x28   : > { %4171 = sst [smem:[#allocation30_spill]] %s3397_s0  ;;  %s679_s8 = sshll.u32 %s3399_s25, 4  ;;  %s680_s8 = int_to_ptr.vmem [resolvable:$true] %s679_s8 }
  0x29   : > { %s4172_s30 = scalar_select %p3584_p1, 1, 0 }
  0x2a   : > { %s4173_s3 = scalar_select %p3589_p3, 1, 0 }
  0x2b   : > { %p2870_p4 = pneg %p3589_p3  ;;  %s3400_s1 = smov [#allocation9]  }
  0x2c   : > { %s704_s7 = sshll.u32 %s3400_s1, 4  ;;  %s3401_s24 = smov [#allocation12]   ;;  %s705_s7 = int_to_ptr.vmem [resolvable:$true] %s704_s7 }
  0x2d   : > { %p3597_p5 = pnand %p2870_p4, %p3584_p1  ;;  %s728_s10 = sshll.u32 %s3401_s24, 4  ;;  %s729_s10 = int_to_ptr.vmem [resolvable:$true] %s728_s10 }
  0x2e   : > { %s3086_s25 = scalar_lea.vmem %s680_s8, 384  ;;  %p3094_p10 = scmp.lt.s32.totalorder %s680_s8, %s680_s8 }
  0x2f   : > { %p3603_p6 = pneg %p3597_p5  ;;  %p3087_p7 = scmp.ne.s32.totalorder %s680_s8, %s3086_s25 }
  0x30   : > { %p3095_p11 = scmp.lt.s32.totalorder %s3086_s25, %s3086_s25 }
  0x31   : > { %p3089_p8 = pnand %p3087_p7, %p3603_p6 }
  0x32   : > { %p3096_p12 = por %p3095_p11, %p3094_p10 }
  0x33   : > { %p3090_p9 = pneg %p3089_p8 }
  0x35   : > { %p3097_p13 = pnand %p3096_p12, %p3090_p9 }
  0x37   : > { %3100 = shalt.err (!%p3097_p13)
}
  0x38   : > { %s3402_s1 = smov 128   ;;  %s3403_s24 = smov 8  }
  0x39   : > { %s4176_s20 = sld [smem:[#allocation41_spill]]  ;;  %s3112_s19 = scalar_lea.vmem %s705_s7, 16 }
  0x3a   : > { %p3113_p0 = scmp.ne.s32.totalorder %s705_s7, %s3112_s19  ;;  %s3119_s25 = scalar_lea.vmem %s705_s7, 32 }
  0x3b   : > { %p3120_p7 = scmp.lt.s32.totalorder %s705_s7, %s705_s7  ;;  %p3121_p8 = scmp.lt.s32.totalorder %s3119_s25, %s3112_s19 }
  0x3c   : > { %p3115_p2 = pnand %p3113_p0, %p3603_p6 }
  0x3d   : > { %p3122_p9 = por %p3121_p8, %p3120_p7 }
  0x3e   : > { %p3116_p4 = pneg %p3115_p2 }
  0x3f   : > { %2873 = dma.hbm_to_vmem [thread:$0]  (!%p3597_p5), %s4176_s20, 384, %s680_s8, [#allocation7], %s3402_s1, %s3402_s1, %s3403_s24  }
  0x40   : > { %p3123_p10 = pnand %p3122_p9, %p3116_p4 }
  0x42   : > { %3126 = shalt.err (!%p3123_p10)
}
  0x43   : > { %s4177_s16 = sld [smem:[#allocation43_spill]]  ;;  %s3138_s20 = scalar_lea.vmem %s729_s10, 16 }
  0x44   : > { %p3139_p11 = scmp.ne.s32.totalorder %s729_s10, %s3138_s20  ;;  %s3145_s21 = scalar_lea.vmem %s729_s10, 32 }
  0x45   : > { %p3146_p0 = scmp.lt.s32.totalorder %s729_s10, %s729_s10  ;;  %p3147_p2 = scmp.lt.s32.totalorder %s3145_s21, %s3138_s20 }
  0x46   : > { %p3141_p12 = pnand %p3139_p11, %p3603_p6 }
  0x47   : > { %p3148_p3 = por %p3147_p2, %p3146_p0 }
  0x48   : > { %p3142_p13 = pneg %p3141_p12 }
  0x49   : > { %2879 = dma.hbm_to_vmem [thread:$0]  (!%p3597_p5), %s4177_s16, 16, %s705_s7, [#allocation10]  }
  0x4a   : > { %p3149_p7 = pnand %p3148_p3, %p3142_p13 }
  0x4c   : > { %3152 = shalt.err (!%p3149_p7)
}
  0x4d   : > { %s4178_s8 = sld [smem:[#allocation45_spill]]  ;;  %s3404_s16 = smov [#allocation8]  }
  0x4e   : > { %s693_s17 = sshll.u32 %s3404_s16, 4  ;;  %s3405_s18 = smov [#allocation11]   ;;  %s694_s17 = int_to_ptr.vmem [resolvable:$true] %s693_s17 }
  0x4f   : > { %s714_s7 = sshll.u32 %s3405_s18, 4  ;;  %s3164_s25 = scalar_lea.vmem %s694_s17, 16  ;;  %s715_s7 = int_to_ptr.vmem [resolvable:$true] %s714_s7 }
  0x50   : > { %p3165_p4 = scmp.ne.s32.totalorder %s694_s17, %s3164_s25  ;;  %s3171_s20 = scalar_lea.vmem %s694_s17, 32 }
  0x51   : > { %p3172_p3 = scmp.lt.s32.totalorder %s694_s17, %s694_s17  ;;  %p3173_p10 = scmp.lt.s32.totalorder %s3171_s20, %s3164_s25 }
  0x52   : > { %p3167_p8 = pnand %p3165_p4, %p3603_p6 }
  0x53   : > { %2885 = dma.hbm_to_vmem [thread:$0]  (!%p3597_p5), %s4178_s8, 16, %s729_s10, [#allocation13]  }
  0x54   : > { %p3168_p9 = pneg %p3167_p8  ;;  %p3174_p11 = por %p3173_p10, %p3172_p3 }
  0x56   : > { %p3175_p12 = pnand %p3174_p11, %p3168_p9 }
  0x58   : > { %3178 = shalt.err (!%p3175_p12)
}
  0x59   : > { %s4179_s19 = sld [smem:[#allocation42_spill]]  ;;  %s3190_s22 = scalar_lea.vmem %s715_s7, 384 }
  0x5a   : > { %p3191_p13 = scmp.ne.s32.totalorder %s715_s7, %s3190_s22  ;;  %p3198_p7 = scmp.lt.s32.totalorder %s715_s7, %s715_s7 }
  0x5b   : > { %p3199_p4 = scmp.lt.s32.totalorder %s3190_s22, %s3190_s22 }
  0x5c   : > { %p3193_p0 = pnand %p3191_p13, %p3603_p6 }
  0x5d   : > { %p3200_p8 = por %p3199_p4, %p3198_p7 }
  0x5e   : > { %p3194_p2 = pneg %p3193_p0 }
  0x5f   : > { %2876 = dma.hbm_to_vmem [thread:$0]  (!%p3597_p5), %s4179_s19, 16, %s694_s17, [#allocation7]  }
  0x60   : > { %p3201_p1 = pnand %p3200_p8, %p3194_p2 }
  0x62   : > { %3204 = shalt.err (!%p3201_p1)
}
  0x63   : > { %s4180_s18 = sld [smem:[#allocation44_spill]]  ;;  %s3406_s17 = smov [#allocation14]  }
  0x64   : > { %s739_s25 = sshll.u32 %s3406_s17, 4  ;;  %s3407_s20 = smov [#allocation15]   ;;  %s740_s25 = int_to_ptr.vmem [resolvable:$true] %s739_s25 }
  0x65   : > { %s753_s21 = sshll.u32 %s3407_s20, 4  ;;  %s3216_s10 = scalar_lea.vmem %s740_s25, 16  ;;  %s754_s21 = int_to_ptr.vmem [resolvable:$true] %s753_s21 }
  0x66   : > { %p3217_p9 = scmp.ne.s32.totalorder %s740_s25, %s3216_s10  ;;  %s3223_s19 = scalar_lea.vmem %s740_s25, 32 }
  0x67   : > { %p3224_p10 = scmp.lt.s32.totalorder %s740_s25, %s740_s25  ;;  %p3225_p11 = scmp.lt.s32.totalorder %s3223_s19, %s3216_s10 }
  0x68   : > { %p3219_p3 = pnand %p3217_p9, %p3603_p6 }
  0x69   : > { %2882 = dma.hbm_to_vmem [thread:$0]  (!%p3597_p5), %s4180_s18, 384, %s715_s7, [#allocation10], %s3402_s1, %s3402_s1, %s3403_s24  }
  0x6a   : > { %p3220_p1 = pneg %p3219_p3  ;;  %p3226_p12 = por %p3225_p11, %p3224_p10 }
  0x6c   : > { %p3227_p13 = pnand %p3226_p12, %p3220_p1 }
  0x6e   : > { %3230 = shalt.err (!%p3227_p13)
}
  0x6f   : > { %s4181_s9 = sld [smem:[#allocation46_spill]]  ;;  %s3242_s24 = scalar_lea.vmem %s754_s21, 16 }
  0x70   : > { %p3243_p0 = scmp.ne.s32.totalorder %s754_s21, %s3242_s24  ;;  %s3249_s7 = scalar_lea.vmem %s754_s21, 32 }
  0x71   : > { %p3250_p4 = scmp.lt.s32.totalorder %s754_s21, %s754_s21  ;;  %p3251_p8 = scmp.lt.s32.totalorder %s3249_s7, %s3242_s24 }
  0x72   : > { %p3245_p2 = pnand %p3243_p0, %p3603_p6 }
  0x73   : > { %p3252_p9 = por %p3251_p8, %p3250_p4 }
  0x74   : > { %p3246_p7 = pneg %p3245_p2 }
  0x75   : > { %2888 = dma.hbm_to_vmem [thread:$0]  (!%p3597_p5), %s4181_s9, 16, %s740_s25, [#allocation13]  }
  0x76   : > { %p3253_p3 = pnand %p3252_p9, %p3246_p7 }
  0x78   : > { %3256 = shalt.err (!%p3253_p3)
}
  0x79   : > { %s4182_s11 = sld [smem:[#allocation48_spill]]  ;;  %s2585_s23 = sadd.s32 4294967294, %s3397_s0  }
  0x7a   : > { %s53_s4 = sadd.s32 1, %s3389_s2  ;;  %s56_s18 = sadd.s32 1, %s3393_s29 }
  0x7b   : > { %p54_p6 = scmp.ge.s32.totalorder %s53_s4, 2  ;;  %s89_s17 = sadd.s32 1, %s3377_s27 }
  0x7c   : > { %p96_p1 = scmp.ne.s32.totalorder %s3377_s27, %s3373_s26  ;;  %p97_p10 = scmp.eq.s32.totalorder %s3397_s0, 0 }
  0x7d   : > { %s4237_s4 = smov (%p54_p6, %s53_s4), 0  ;;  %s4239_s18 = smov (!%p54_p6, %s56_s18), %s3393_s29 }
  0x7e   : > { %4183 = sst [smem:[#allocation31_spill]] %s4237_s4  ;;  %p58_p11 = scmp.ge.s32.totalorder %s4239_s18, 2 }
  0x7f   : > { %2891 = dma.hbm_to_vmem [thread:$0]  (!%p3597_p5), %s4182_s11, 16, %s754_s21, [#allocation16]  }
  0x80   : > { %p102_p5 = scmp.ne.s32.totalorder %s3373_s26, %s3369_s5  ;;  %s4184_s25 = sadd.s32 4294967295, %s3397_s0  }
  0x81   : > { %p648_p12 = scmp.eq.s32.totalorder %s4184_s25, 3  ;;  %p4185_p13 = scmp.ne.s32.totalorder %s4172_s30, 0 }
  0x82   : > { %p654_p2 = scmp.eq.s32.totalorder %s2585_s23, 3  ;;  %s4241_s18 = smov (%p58_p11, %s4239_s18), 0 }
  0x83   : > { %p3678_p0 = por %p4185_p13, %p102_p5  ;;  %4187 = sst [smem:[#allocation32_spill]] %s4241_s18 }
  0x84   : > { %p3687_p7 = por %p648_p12, %p96_p1  ;;  %p3691_p4 = por %p654_p2, %p102_p5 }
  0x85   : > { %s86_s19 = ssub.s32 %s3393_s29, %s4241_s18  ;;  %p98_p8 = por %p97_p10, %p96_p1 }
  0x86   : > { %s4188_s21 = scalar_select %p3687_p7, 1, 0 }
  0x87   : > { %s4190_s10 = scalar_select %p3691_p4, 1, 0 }
  0x88   : > { %4189 = sst [smem:[#allocation33_spill]] %s4188_s21  ;;  %p87_p9 = scmp.eq.s32.totalorder %s86_s19, 0 }
  0x89   : > { %4191 = sst [smem:[#allocation34_spill]] %s4190_s10  ;;  %s773_s22 = sand.u32 1, %s3377_s27  }
  0x8a   : > { %p2907_p3 = scmp.lt.s32.totalorder %s3397_s0, 4  ;;  %s2595_s24 = sshll.u32 %s3393_s29, 4 }
  0x8b   : > { %s3703_s1 = scalar_select %p87_p9, %s3377_s27, %s89_s17  }
  0x8c   : > { %s776_s7 = scalar_lea.vmem [#allocation3], %s773_s22  ;;  %s4193_s25 = sld [smem:[#allocation38_spill]] }
  0x8d   : > { %4192 = sst [smem:[#allocation35_spill]] %s3703_s1  ;;  %s783_s8 = sshll.u32 %s776_s7, 4  ;;  %s784_s8 = int_to_ptr.vmem [resolvable:$true] %s783_s8 }
  0x8e   : > { %p3709_p6 = pnand %p2907_p3, %p98_p8  ;;  %s774_s18 = scalar_lea.sflag [#allocation4], %s773_s22 }
  0x8f   : > { %s3270_s19 = scalar_lea.vmem %s784_s8, 16  ;;  %s3408_s17 = smov [#allocation3]  }
  0x90   : > { %p3259_p1 = pneg %p3709_p6  ;;  %p3271_p10 = scmp.ne.s32.totalorder %s784_s8, %s3270_s19 }
  0x91   : > { %s3275_s4 = sshll.u32 %s3408_s17, 4  ;;  %s3276_s4 = int_to_ptr.vmem [resolvable:$false] %s3275_s4 }
  0x92   : > { %s781_s9 = scalar_lea.hbm %s4193_s25, %s2595_s24  ;;  %p3273_p5 = pnand %p3271_p10, %p3259_p1 }
  0x93   : > { %s3277_s7 = scalar_lea.vmem %s3276_s4, 32  ;;  %p3278_p12 = scmp.lt.s32.totalorder %s784_s8, %s3276_s4 }
  0x94   : > { %p3274_p11 = pneg %p3273_p5  ;;  %p3279_p13 = scmp.lt.s32.totalorder %s3277_s7, %s3270_s19 }
  0x96   : > { %p3280_p2 = por %p3279_p13, %p3278_p12 }
  0x98   : > { %p3281_p9 = pnand %p3280_p2, %p3274_p11 }
  0x9a   : > { %3284 = shalt.err (!%p3281_p9)
}
  0x9b   : > { %2895 = dma.hbm_to_vmem [thread:$0]  (!%p3709_p6), %s781_s9, 16, %s784_s8, %s774_s18  }
  0x9c   : > { %p4195_p8 = scmp.ne.s32.totalorder %s4173_s3, 0 }
  0x9e   : > { %872 = sbr.rel (%p4195_p8) target bundleno = 3831 (0xef7), region = 116 }
  0xa3   : > { %s3720_s22 = sand.u32 1, %s3373_s26  }
  0xa4   : > { %s875_s24 = scalar_lea.sflag [#allocation4], %s3720_s22 }
  0xa5   : > { %3344 = dma.done.wait (%p3678_p0), %s875_s24, 16  }
  0xa6   : > { %3346 = vsyncadd (%p3678_p0), %s875_s24, 4294967280  ;;  %p4196_p3 = scmp.ne.s32.totalorder %s4172_s30, 0 }
  0xa8   : > { %3348 = dma.done.wait (%p4196_p3), [#allocation7], 400  }
  0xa9   : > { %3350 = vsyncadd (%p4196_p3), [#allocation7], 4294966896 }
  0xaa   : > { %3352 = dma.done.wait (%p4196_p3), [#allocation10], 400  }
  0xab   : > { %3354 = vsyncadd (%p4196_p3), [#allocation10], 4294966896 }
  0xac   : > { %3356 = dma.done.wait (%p4196_p3), [#allocation13], 32  }
  0xad   : > { %3358 = vsyncadd (%p4196_p3), [#allocation13], 4294967264 }
  0xae   : > { %3360 = dma.done.wait (%p4196_p3), [#allocation16], 16  }
  0xaf   : > { %3362 = vsyncadd (%p4196_p3), [#allocation16], 4294967280  ;;  %s2837_s9 = smul.u32 12, %s3720_s22  ;;  %p1024_p0 = scmp.lt.s32.totalorder %s3381_s28, 1 }
  0xb0   : > { %s1018_s11 = smul.u32 3, %s3385_s6  ;;  %s4197_s24 = sld [smem:[#allocation37_spill]] }
  0xb1   : > { %s3748_s3 = scalar_select %p1024_p0, %s3381_s28, 1 }
  0xb2   : > { %p1019_p6 = scmp.lt.s32.totalorder %s1018_s11, 5  ;;  %s4198_s14 = sld [smem:[#allocation49_spill]] }
  0xb3   : > { %s2674_s19 = sshll.u32 %s3748_s3, 4  ;;  %s4199_s20 = sld [smem:[#allocation50_spill]] }
  0xb4   : > { %s4243_s11 = smov (!%p1019_p6, %s1018_s11), 5  ;;  %s4204_s30 = sld [smem:[#allocation54_spill]] }
  0xb5   : > { %s2604_s25 = sshll.u32 %s4243_s11, 2  ;;  %s4206_s11 = sld [smem:[#allocation56_spill]] }
  0xb6   : > { %s3762_s16 = scalar_lea.vmem %s4197_s24, %s2604_s25  ;;  %s4202_s24 = sld [smem:[#allocation52_spill]] }
  0xb7   : > { %p2613_p1 = scmp.ne.s32.totalorder %s3381_s28, 0 }
  0xb8   : > { %s3767_s1 = scalar_lea.vmem %s4198_s14, %s2674_s19  ;;  %s4203_s14 = sld [smem:[#allocation53_spill]] }
  0xb9   : > { %s3776_s8 = scalar_lea.vmem %s4199_s20, %s2674_s19  ;;  %s4205_s20 = sld [smem:[#allocation55_spill]] }
  0xba   : > { %4200 = sst [smem:[#allocation36_spill]] %s3776_s8  ;;  %s3793_s4 = scalar_lea.vmem %s4204_s30, %s2674_s19 }
  0xbb   : > { %s2677_s8 = sshll.u32 %s3748_s3, 5  ;;  %s4208_s29 = sld [smem:[#allocation40_spill]] (!%p2613_p1) }
  0xbc   : > { %s1048_s5 = scalar_lea.vmem %s4202_s24, %s3748_s3  ;;  %s3803_s17 = scalar_lea.vmem %s4206_s11, %s2677_s8 }
  0xbd   : > { %s4207_s24 = sld [smem:[#allocation57_spill]] }
  0xbe   : > { %s1051_s0 = scalar_lea.vmem %s4203_s14, %s3748_s3  ;;  %s3809_s14 = scalar_lea.vmem [#allocation17], %s2837_s9 }
  0xbf   : > { %s1059_s6 = scalar_lea.vmem %s4205_s20, %s3748_s3  ;;  %1073 = sbr.rel (%p2613_p1) target bundleno = 742 (0x2e6), region = 152 }
  0xc1   : > { %s4209_s30 = smov (!%p2613_p1), %s4208_s29 }
  0xc3   : > { %s1067_s2 = scalar_lea.vmem %s4207_s24, %s3748_s3 }
  0xc4   : > { %v2994_v0 = vld [vmem:[%s4208_s29 + $0x38] sm:$0xff]   ;;  %v2995_v1 = vld [vmem:[%s4209_s30 + $0x30] sm:$0xff]   ;;  %v2996_v2 = vld [vmem:[%s4209_s30 + $0x28] sm:$0xff]   ;;  %vm1207_vm0 = vcmask 261120  }
  0xc5   : > { %2735 = vmatprep.subr.bf16.mxu0 %v2994_v0  ;;  %v2997_v3 = vld [vmem:[%s4209_s30 + $0x20] sm:$0xff]   ;;  %v2998_v5 = vld [vmem:[%s4209_s30 + $0x18] sm:$0xff]   ;;  %v2999_v6 = vld [vmem:[%s4209_s30 + $0x10] sm:$0xff]  }
  0xc6   : > { %2736 = vmatpush3.bf16.msra.mxu0 %v2994_v0  ;;  %v3002_v4 = vld [vmem:[%s3762_s16] sm:$0xff]   ;;  %v3000_v7 = vld [vmem:[%s4209_s30 + $0x8] sm:$0xff]   ;;  %v2624_v48 = vld [vmem:[#allocation8] ss:$0 sm:$0xff] }
  0xc7   : > { %2737 = vmatprep.subr.bf16.mxu0 %v2995_v1  ;;  %2751 = vmatprep.mubr.bf16.mxu0 %v3002_v4  ;;  %v3001_v8 = vld [vmem:[%s4209_s30] sm:$0xff]   ;;  %v3003_v9 = vld [vmem:[%s3762_s16 + $0x8] ss:$0 sps:$4 sm:$0xff]   ;;  %v1201_v10 = vld [vmem:[#allocation6 + $0x10] sm:$0xff] }
  0xc8   : > { %v1199_v12 = vld [vmem:[#allocation6] sm:$0xff]  ;;  %v1200_v18 = vld [vmem:[#allocation6 + $0x8] sm:$0xff]  ;;  %v2625_v50 = vld [vmem:[#allocation9] ss:$0 sm:$0xff] }
  0xc9   : > { %v1266_v53 = vld [vmem:[#allocation11] sm:$0xff]  ;;  %v1268_v60 = vld [vmem:[#allocation11 + $0x10] sm:$0xff]  ;;  %v1267_v63 = vld [vmem:[#allocation11 + $0x8] sm:$0xff] }
  0xca   : > { %2738 = vmatpush3.bf16.msra.mxu0 %v2995_v1 }
  0xcb   : > { %2739 = vmatprep.subr.bf16.mxu0 %v2996_v2 }
  0xce   : > { %2740 = vmatpush3.bf16.msra.mxu0 %v2996_v2 }
  0xcf   : > { %2741 = vmatprep.subr.bf16.mxu0 %v2997_v3 }
  0xd2   : > { %2742 = vmatpush3.bf16.msra.mxu0 %v2997_v3 }
  0xd3   : > { %2743 = vmatprep.subr.bf16.mxu0 %v2998_v5 }
  0xd6   : > { %2744 = vmatpush3.bf16.msra.mxu0 %v2998_v5 }
  0xd7   : > { %2745 = vmatprep.subr.bf16.mxu0 %v2999_v6 }
  0xda   : > { %2746 = vmatpush3.bf16.msra.mxu0 %v2999_v6 }
  0xdb   : > { %2747 = vmatprep.subr.bf16.mxu0 %v3000_v7 }
  0xde   : > { %2748 = vmatpush3.bf16.msra.mxu0 %v3000_v7 }
  0xdf   : > { %2749 = vmatprep.subr.bf16.mxu0 %v3001_v8 }
  0xe2   : > { %2750 = vmatpush3.bf16.msra.mxu0 %v3001_v8 }
  0xe5   : > { %2752 = vmatmul.mubr.bf16.vlgmr.msra.gmra.mxu0 %v3003_v9 }
 0x1a5   : > { %v2753_v11 = vpop.f32.mrf.mxu0 }
 0x1a6   : > { %v1204_v13 = vadd.f32 %v2753_v11, %v1201_v10 }
 0x1a7   : > { %v1185_v14 = vpop.f32.mrf.mxu0 }
 0x1a8   : > { %v1202_v15 = vadd.f32 %v1199_v12, %v1185_v14  ;;  %v1214_v16 = vsel %vm1207_vm0, %v1204_v13, 0.0 }
 0x1a9   : > { %1215 = vadd.xlane.f32.xlu1 %v1214_v16  ;;  %v2754_v17 = vpop.f32.mrf.mxu0 }
 0x1aa   : > { %v1208_v19 = vsel %vm1207_vm0, %v1202_v15, 0.0 }
 0x1ab   : > { %1209 = vadd.xlane.f32.xlu0 %v1208_v19  ;;  %v1188_v20 = vpop.f32.mrf.mxu0 }
 0x1ac   : > { %v1203_v21 = vadd.f32 %v1200_v18, %v1188_v20 }
 0x1ae   : > { %v1211_v22 = vsel %vm1207_vm0, %v1203_v21, 0.0 }
 0x1af   : > { %1212 = vadd.xlane.f32.xlu0 %v1211_v22 }
 0x232   : > { %v1216_v23 = vpop.xlane.xlu1 %1215 }
 0x233   : > { %v1220_v24 = vmul.f32 0.03125, %v1216_v23 }
 0x234   : > { %v1210_v25 = vpop.xlane.xlu0 %1209 }
 0x235   : > { %v1218_v26 = vmul.f32 0.03125, %v1210_v25  ;;  %v1223_v27 = vsub.f32 %v1204_v13, %v1220_v24 }
 0x237   : > { %v1221_v28 = vsub.f32 %v1202_v15, %v1218_v26  ;;  %v1226_v34 = vmul.f32 %v1223_v27, %v1223_v27 }
 0x238   : > { %v1213_v29 = vpop.xlane.xlu0 %1212 }
 0x239   : > { %v1219_v30 = vmul.f32 0.03125, %v1213_v29  ;;  %v1224_v31 = vmul.f32 %v1221_v28, %v1221_v28  ;;  %v1233_v36 = vsel %vm1207_vm0, %v1226_v34, 0.0 }
 0x23b   : > { %v1222_v32 = vsub.f32 %v1203_v21, %v1219_v30  ;;  %v1227_v33 = vsel %vm1207_vm0, %v1224_v31, 0.0 }
 0x23c   : > { %1228 = vadd.xlane.f32.xlu1 %v1227_v33 }
 0x23d   : > { %v1225_v35 = vmul.f32 %v1222_v32, %v1222_v32 }
 0x23f   : > { %v1230_v37 = vsel %vm1207_vm0, %v1225_v35, 0.0 }
 0x240   : > { %1234 = vadd.xlane.f32.xlu1 %v1233_v36  ;;  %1231 = vadd.xlane.f32.xlu0 %v1230_v37 }
 0x2c5   : > { %v1229_v38 = vpop.xlane.xlu1 %1228 }
 0x2c6   : > { %v1236_v39 = vmul.f32 0.03125, %v1229_v38 }
 0x2c8   : > { %v1239_v40 = vadd.f32 1e-05, %v1236_v39 }
 0x2c9   : > { %v1235_v41 = vpop.xlane.xlu1 %1234  ;;  %v1232_v42 = vpop.xlane.xlu0 %1231 }
 0x2ca   : > { %3004 = vrsqrt.f32 %v1239_v40  ;;  %v1238_v43 = vmul.f32 0.03125, %v1235_v41  ;;  %v1237_v44 = vmul.f32 0.03125, %v1232_v42 }
 0x2cc   : > { %v1241_v45 = vadd.f32 1e-05, %v1238_v43  ;;  %v1240_v46 = vadd.f32 1e-05, %v1237_v44 }
 0x2ce   : > { %3006 = vrsqrt.f32 %v1241_v45 }
 0x2cf   : > { %3008 = vrsqrt.f32 %v1240_v46 }
 0x2d7   : > { %v3005_v47 = vpop.eup %3004 }
 0x2d8   : > { %v1245_v49 = vmul.f32 %v3005_v47, %v1221_v28 }
 0x2da   : > { %v1254_v51 = vmul.f32 %v2624_v48, %v1245_v49 }
 0x2db   : > { %v3007_v52 = vpop.eup %3006 }
 0x2dc   : > { %v3009_v54 = vpop.eup %3008  ;;  %v1263_v55 = vadd.f32 %v2625_v50, %v1254_v51  ;;  %v1247_v56 = vmul.f32 %v3007_v52, %v1223_v27 }
 0x2dd   : > { %v1246_v57 = vmul.f32 %v3009_v54, %v1222_v32 }
 0x2de   : > { %v1269_v58 = vadd.f32 %v1266_v53, %v1263_v55  ;;  %v1256_v59 = vmul.f32 %v2624_v48, %v1247_v56 }
 0x2df   : > { %v1255_v61 = vmul.f32 %v2624_v48, %v1246_v57 }
 0x2e0   : > { %1272 = vst.msk [vmem:[#allocation2] sm:$0xff] %vm1207_vm0, %v1269_v58  ;;  %v1265_v62 = vadd.f32 %v2625_v50, %v1256_v59 }
 0x2e1   : > { %v1264_v0 = vadd.f32 %v2625_v50, %v1255_v61 }
 0x2e2   : > { %v1271_v1 = vadd.f32 %v1268_v60, %v1265_v62 }
 0x2e3   : > { %v1270_v2 = vadd.f32 %v1267_v63, %v1264_v0 }
 0x2e4   : > { %1274 = vst.msk [vmem:[#allocation2 + $0x10] sm:$0xff] %vm1207_vm0, %v1271_v1 }
 0x2e5   : > { %1273 = vst.msk [vmem:[#allocation2 + $0x8] sm:$0xff] %vm1207_vm0, %v1270_v2 }
 0x2e6 PF: > { %vm1295_vm1 = vcmask 261120   ;;  %v3015_v24 = vld [vmem:[%s3767_s1 + $0x8] sm:$0xff]   ;;  %v3016_v25 = vld [vmem:[%s3767_s1] sm:$0xff]   ;;  %s4210_s29 = scalar_lea.vmem %s4109_s12, %s3748_s3  ;;  %s4211_s8 = scalar_lea.vmem %s4110_s13, %s3748_s3  ;;  %vm1456_vm2 = vcmask 130048   ;;  %vm1587_vm3 = vcmask 195584   ;;  %vm1669_vm4 = vcmask 1043456  }
 0x2e7   : > { %v3847_v3 = vld [vmem:[#allocation2] sm:$0xff]  ;;  %2755 = vmatprep.subr.bf16.mxu0 %v3015_v24  ;;  %s4212_s20 = scalar_lea.vmem %s4112_s15, %s3748_s3  ;;  %s3409_s23 = smov 112   ;;  %vm2062_vm5 = vcmask 523264  }
 0x2e8   : > { %v1296_v6 = vsel %vm1295_vm1, %v3847_v3, 0.0  ;;  %2756 = vmatpush3.bf16.msra.mxu0 %v3015_v24  ;;  %v2626_v37 = vld [vmem:[%s4210_s29] ss:$0 sm:$0xff]  ;;  %s3410_s10 = smov 96   ;;  %s4213_s11 = scalar_lea.vmem [#allocation3], %s3720_s22 }
 0x2e9   : > { %1297 = vadd.xlane.f32.xlu0 %v1296_v6  ;;  %2757 = vmatprep.subr.bf16.mxu0 %v3016_v25  ;;  %v2627_v43 = vld [vmem:[%s4211_s8] ss:$0 sm:$0xff]  ;;  %s4214_s24 = sld [smem:[#allocation39_spill]]  ;;  %s3411_s29 = smov 64  }
 0x2ea   : > { %v2628_v51 = vld [vmem:[%s4212_s20] ss:$0 sm:$0xff]  ;;  %s4215_s27 = sld [smem:[#allocation36_spill]]  ;;  %s3412_s26 = smov 16  }
 0x2eb   : > { %v3849_v4 = vld [vmem:[#allocation2 + $0x10] sm:$0xff]  ;;  %s4216_s9 = sld [smem:[#allocation51_spill]]  ;;  %p2660_p10 = scmp.ne.s32.totalorder %s3381_s28, 1 }
 0x2ec   : > { %v3851_v5 = vld [vmem:[#allocation2 + $0x8] sm:$0xff]  ;;  %v1302_v7 = vsel %vm1295_vm1, %v3849_v4, 0.0  ;;  %2758 = vmatpush3.bf16.msra.mxu0 %v3016_v25 }
 0x2ed   : > { %v1299_v8 = vsel %vm1295_vm1, %v3851_v5, 0.0  ;;  %1303 = vadd.xlane.f32.xlu1 %v1302_v7 }
 0x2ee   : > { %1300 = vadd.xlane.f32.xlu0 %v1299_v8 }
 0x2ef   : > { %v1280_v25 = vld [vmem:[%s4214_s24 + $0x10] sm:$0xff] }
 0x2f1   : > { %s4217_s20 = scalar_lea.vmem %s4216_s9, %s3748_s3  ;;  %s4222_s3 = sld [smem:[#allocation47_spill]] (!%p2660_p10) }
 0x372   : > { %v1298_v9 = vpop.xlane.xlu0 %1297 }
 0x373   : > { %v1306_v11 = vmul.f32 0.03125, %v1298_v9 }
 0x375   : > { %v1309_v13 = vsub.f32 %v3847_v3, %v1306_v11 }
 0x376   : > { %v1304_v10 = vpop.xlane.xlu1 %1303 }
 0x377   : > { %v1308_v12 = vmul.f32 0.03125, %v1304_v10  ;;  %v1301_v15 = vpop.xlane.xlu0 %1300  ;;  %v1312_v17 = vmul.f32 %v1309_v13, %v1309_v13 }
 0x378   : > { %v1307_v16 = vmul.f32 0.03125, %v1301_v15 }
 0x379   : > { %v1311_v14 = vsub.f32 %v3849_v4, %v1308_v12  ;;  %v1315_v20 = vsel %vm1295_vm1, %v1312_v17, 0.0  ;;  %v1282_v17 = vlaneseq }
 0x37a   : > { %v1310_v19 = vsub.f32 %v3851_v5, %v1307_v16  ;;  %1316 = vadd.xlane.f32.xlu1 %v1315_v20 }
 0x37b   : > { %v1314_v18 = vmul.f32 %v1311_v14, %v1311_v14  ;;  %v1283_v20 = vshrl.u32 %v1282_v17, 7 }
 0x37c   : > { %v1313_v22 = vmul.f32 %v1310_v19, %v1310_v19 }
 0x37d   : > { %v1321_v21 = vsel %vm1295_vm1, %v1314_v18, 0.0  ;;  %v1275_v18 = vld [vmem:[%s4213_s11] sm:$0x1] }
 0x37e   : > { %v1318_v23 = vsel %vm1295_vm1, %v1313_v22, 0.0  ;;  %1322 = vadd.xlane.f32.xlu1 %v1321_v21  ;;  %v1284_v22 = vsub.s32 0, %v1283_v20 }
 0x37f   : > { %1319 = vadd.xlane.f32.xlu0 %v1318_v23  ;;  %v1278_v23 = vld [vmem:[%s4214_s24] sm:$0xff] }
 0x403   : > { %v1317_v26 = vpop.xlane.xlu1 %1316 }
 0x404   : > { %v1324_v27 = vmul.f32 0.03125, %v1317_v26 }
 0x406   : > { %v1327_v28 = vadd.f32 1e-05, %v1324_v27 }
 0x407   : > { %v1323_v29 = vpop.xlane.xlu1 %1322 }
 0x408   : > { %v1320_v30 = vpop.xlane.xlu0 %1319  ;;  %3025 = vrsqrt.f32 %v1327_v28  ;;  %v1326_v31 = vmul.f32 0.03125, %v1323_v29  ;;  %v1279_v28 = vld [vmem:[%s4214_s24 + $0x8] sm:$0xff] }
 0x409   : > { %v1325_v32 = vmul.f32 0.03125, %v1320_v30 }
 0x40a   : > { %v1329_v33 = vadd.f32 1e-05, %v1326_v31 }
 0x40b   : > { %v1328_v34 = vadd.f32 1e-05, %v1325_v32 }
 0x40c   : > { %3027 = vrsqrt.f32 %v1329_v33 }
 0x40d   : > { %3029 = vrsqrt.f32 %v1328_v34 }
 0x415   : > { %v3026_v35 = vpop.eup %3025 }
 0x416   : > { %v1333_v36 = vmul.f32 %v3026_v35, %v1309_v13 }
 0x418   : > { %v1342_v42 = vmul.f32 %v2626_v37, %v1333_v36 }
 0x419   : > { %v3028_v38 = vpop.eup %3027 }
 0x41a   : > { %v3030_v39 = vpop.eup %3029  ;;  %v1335_v40 = vmul.f32 %v3028_v38, %v1311_v14  ;;  %v1351_v47 = vadd.f32 %v2627_v43, %v1342_v42 }
 0x41b   : > { %v1334_v41 = vmul.f32 %v3030_v39, %v1310_v19  ;;  %v1276_v19 = vsub.f32 1.0, %v1275_v18 }
 0x41c   : > { %v1344_v44 = vmul.f32 %v2626_v37, %v1335_v40 }
 0x41d   : > { %v1343_v45 = vmul.f32 %v2626_v37, %v1334_v41  ;;  %v1277_v21 = vmul.f32 -10000.0, %v1276_v19 }
 0x41e   : > { %v1353_v46 = vadd.f32 %v2627_v43, %v1344_v44 }
 0x41f   : > { %v1352_v48 = vadd.f32 %v2627_v43, %v1343_v45  ;;  %v1285_v24 = vrot.slane %v1277_v21, %v1284_v22 }
 0x420   : > { %v1355_v49 = vpack.c.bf16 %v1353_v46, %v1353_v46 }
 0x421   : > { %v1354_v50 = vpack.c.bf16 %v1352_v48, %v1351_v47  ;;  %v1287_v26 = vadd.f32 %v1285_v24, %v1278_v23  ;;  %v1289_v29 = vadd.f32 %v1285_v24, %v1280_v25  ;;  %v1288_v32 = vadd.f32 %v1285_v24, %v1279_v28 }
 0x423   : > { %2759 = vmatprep.mubr.msk.bf16.mxu0 %vm1295_vm1, %v1354_v50 }
 0x424   : > { %2760 = vmatmul.mubr.msk.bf16.vlgmr.msra.gmra.mxu0 %vm1295_vm1, %v1355_v49 }
 0x4e4   : > { %v2761_v52 = vpop.f32.mrf.mxu0 }
 0x4e5   : > { %v1428_v53 = vadd.f32 %v2761_v52, %v2628_v51 }
 0x4e6   : > { %v1419_v54 = vpop.f32.mrf.mxu0 }
 0x4e7   : > { %v3884_v55 = vpack.c.bf16 %v1428_v53, %v1428_v53  ;;  %v1420_v57 = vadd.f32 %v2628_v51, %v1419_v54  ;;  %v1435_v1 = vmul.f32 0.25, %v1428_v53 }
 0x4e8   : > { %v2762_v56 = vpop.f32.mrf.mxu0 }
 0x4e9   : > { %1450 = vrot.lane.b32.xlu0 %v3884_v55, %s3409_s23  ;;  %v1433_v60 = vmul.f32 0.25, %v1420_v57  ;;  %v1437_v7 = vpack.c.bf16 %v1435_v1, %v1435_v1 }
 0x4ea   : > { %v1422_v58 = vpop.f32.mrf.mxu0 }
 0x4eb   : > { %v1423_v59 = vadd.f32 %v2628_v51, %v1422_v58 }
 0x4ed   : > { %v1434_v61 = vmul.f32 0.25, %v1423_v59  ;;  %v3887_v62 = vpack.c.bf16 %v1423_v59, %v1420_v57 }
 0x4ef   : > { %1448 = vrot.lane.b32.xlu1 %v3887_v62, %s3409_s23  ;;  %v1436_v63 = vpack.c.bf16 %v1434_v61, %v1433_v60 }
 0x4f1   : > { %1440 = vrot.lane.b32.xlu0 %v1436_v63, %s3409_s23  ;;  %2767 = vmatprep.mubr.msk.bf16.mxu1 %vm1456_vm2, %v1436_v63 }
 0x4f5   : > { %1454 = vrot.lane.b32.xlu0 %v3884_v55, %s3410_s10 }
 0x55b   : > { %v3892_v0 = vpop.permute.xlu0 %1450 }
 0x55c   : > { %1519 = vrot.lane.b32.xlu1 %v3892_v0, %s3410_s10 }
 0x561   : > { %v3895_v2 = vpop.permute.xlu1 %1448 }
 0x562   : > { %1517 = vrot.lane.b32.xlu1 %v3895_v2, %s3410_s10 }
 0x563   : > { %v1441_v6 = vpop.permute.xlu0 %1440 }
 0x564   : > { %2775 = vmatprep.mubr.msk.bf16.mxu0 %vm1456_vm2, %v1441_v6 }
 0x566   : > { %1442 = vrot.lane.b32.xlu1 %v1437_v7, %s3409_s23 }
 0x567   : > { %v1455_v8 = vpop.permute.xlu0 %1454 }
 0x568   : > { %2831 = vmatprep.subr.msk.bf16.mxu1 %vm1456_vm2, %v1455_v8  ;;  %v1467_v9 = vsel %vm1456_vm2, %v1455_v8, 0 }
 0x569   : > { %2764 = vmatpush3.bf16.xpose.msra.mxu1 %v1467_v9 }
 0x56a   : > { %1452 = vrot.lane.b32.xlu1 %v3887_v62, %s3410_s10 }
 0x5ce   : > { %v1520_v10 = vpop.permute.xlu1 %1519 }
 0x5cf   : > { %v1531_v11 = vsel %vm1456_vm2, %v1520_v10, 0  ;;  %2833 = vmatprep.subr.msk.bf16.mxu0 %vm1456_vm2, %v1520_v10 }
 0x5d0   : > { %2772 = vmatpush3.bf16.xpose.msra.mxu0 %v1531_v11 }
 0x5d4   : > { %v1518_v12 = vpop.permute.xlu1 %1517 }
 0x5d5   : > { %2834 = vmatprep.subr.msk.bf16.mxu0 %vm1456_vm2, %v1518_v12  ;;  %v1528_v13 = vsel %vm1456_vm2, %v1518_v12, 0 }
 0x5d8   : > { %2774 = vmatpush3.bf16.xpose.msra.mxu0 %v1528_v13  ;;  %v1443_v14 = vpop.permute.xlu1 %1442 }
 0x5dc   : > { %v1453_v15 = vpop.permute.xlu1 %1452 }
 0x5dd   : > { %2832 = vmatprep.subr.msk.bf16.mxu1 %vm1456_vm2, %v1453_v15  ;;  %v1464_v16 = vsel %vm1456_vm2, %v1453_v15, 0 }
 0x5de   : > { %2766 = vmatpush3.bf16.xpose.msra.mxu1 %v1464_v16 }
 0x5df   : > { %2776 = vmatmul.mubr.msk.bf16.vlgmr.msra.gmra.mxu0 %vm1456_vm2, %v1443_v14 }
 0x5e5   : > { %2768 = vmatmul.mubr.msk.bf16.vlgmr.msra.gmra.mxu1 %vm1456_vm2, %v1437_v7 }
 0x69f   : > { %v2777_v27 = vpop.f32.mrf.mxu0 }
 0x6a0   : > { %v1586_v34 = vadd.f32 %v2777_v27, %v1289_v29 }
 0x6a1   : > { %v1567_v30 = vpop.f32.mrf.mxu0 }
 0x6a2   : > { %v1584_v31 = vadd.f32 %v1567_v30, %v1287_v26  ;;  %v1603_v43 = vsel %vm1587_vm3, %v1586_v34, -inf }
 0x6a3   : > { %v2778_v33 = vpop.f32.mrf.mxu0 }
 0x6a4   : > { %v1597_v35 = vsel %vm1587_vm3, %v1584_v31, -inf }
 0x6a5   : > { %v2769_v36 = vpop.f32.mrf.mxu1  ;;  %v1570_v37 = vpop.f32.mrf.mxu0  ;;  %1598 = vmax.xlane.f32.xlu0 %v1597_v35 }
 0x6a6   : > { %v1585_v38 = vadd.f32 %v1570_v37, %v1288_v32  ;;  %v1583_v40 = vadd.f32 %v2769_v36, %v1289_v29 }
 0x6a7   : > { %v1503_v39 = vpop.f32.mrf.mxu1 }
 0x6a8   : > { %v1581_v41 = vadd.f32 %v1503_v39, %v1287_v26  ;;  %v1600_v42 = vsel %vm1587_vm3, %v1585_v38, -inf  ;;  %v1594_v47 = vsel %vm1587_vm3, %v1583_v40, -inf }
 0x6a9   : > { %v2770_v44 = vpop.f32.mrf.mxu1  ;;  %1601 = vmax.xlane.f32.xlu1 %v1600_v42  ;;  %1604 = vmax.xlane.f32.xlu0 %v1603_v43 }
 0x6aa   : > { %v1588_v48 = vsel %vm1587_vm3, %v1581_v41, -inf }
 0x6ab   : > { %v1506_v45 = vpop.f32.mrf.mxu1 }
 0x6ac   : > { %v1582_v46 = vadd.f32 %v1506_v45, %v1288_v32 }
 0x6ad   : > { %1595 = vmax.xlane.f32.xlu1 %v1594_v47  ;;  %1589 = vmax.xlane.f32.xlu0 %v1588_v48  ;;  %v3017_v48 = vld [vmem:[%s4215_s27 + $0x8] sm:$0xff]  }
 0x6ae   : > { %v1591_v49 = vsel %vm1587_vm3, %v1582_v46, -inf }
 0x6b1   : > { %1592 = vmax.xlane.f32.xlu0 %v1591_v49  ;;  %v3018_v49 = vld [vmem:[%s4215_s27] sm:$0xff]  }
 0x72e   : > { %v1599_v50 = vpop.xlane.xlu0 %1598 }
 0x72f   : > { %v1609_v51 = vsub.f32 %v1584_v31, %v1599_v50 }
 0x731   : > { %v1618_v59 = vmul.f32 1.442695, %v1609_v51 }
 0x732   : > { %v1602_v52 = vpop.xlane.xlu1 %1601  ;;  %v1605_v53 = vpop.xlane.xlu0 %1604 }
 0x733   : > { %v1610_v54 = vsub.f32 %v1585_v38, %v1602_v52  ;;  %v1611_v56 = vsub.f32 %v1586_v34, %v1605_v53 }
 0x735   : > { %v1620_v57 = vmul.f32 1.442695, %v1610_v54  ;;  %v1622_v58 = vmul.f32 1.442695, %v1611_v56 }
 0x736   : > { %v1590_v8 = vpop.xlane.xlu0 %1589  ;;  %v1596_v10 = vpop.xlane.xlu1 %1595 }
 0x737   : > { %3031 = vpow2.f32 %v1620_v57  ;;  %v1606_v9 = vsub.f32 %v1581_v41, %v1590_v8  ;;  %v1608_v12 = vsub.f32 %v1583_v40, %v1596_v10 }
 0x738   : > { %3033 = vpow2.f32 %v1622_v58 }
 0x739   : > { %3035 = vpow2.f32 %v1618_v59  ;;  %v1612_v13 = vmul.f32 1.442695, %v1606_v9  ;;  %v1616_v15 = vmul.f32 1.442695, %v1608_v12  ;;  %v2641_v12 = vld [vmem:[%s4217_s20] ss:$0 sm:$0xff] }
 0x73a   : > { %v1593_v11 = vpop.xlane.xlu0 %1592 }
 0x73b   : > { %v1607_v14 = vsub.f32 %v1582_v46, %v1593_v11  ;;  %3037 = vpow2.f32 %v1612_v13 }
 0x73c   : > { %3039 = vpow2.f32 %v1616_v15 }
 0x73d   : > { %v1614_v16 = vmul.f32 1.442695, %v1607_v14 }
 0x73f   : > { %3041 = vpow2.f32 %v1614_v16 }
 0x744   : > { %v3032_v60 = vpop.eup %3031 }
 0x745   : > { %v3034_v61 = vpop.eup %3033  ;;  %v1636_v63 = vsel %vm1587_vm3, %v3032_v60, 0.0 }
 0x746   : > { %1637 = vadd.xlane.f32.xlu1 %v1636_v63  ;;  %v1639_v1 = vsel %vm1587_vm3, %v3034_v61, 0.0  ;;  %v3036_v6 = vpop.eup %3035 }
 0x747   : > { %1640 = vadd.xlane.f32.xlu0 %v1639_v1  ;;  %v1633_v7 = vsel %vm1587_vm3, %v3036_v6, 0.0 }
 0x748   : > { %v3038_v18 = vpop.eup %3037 }
 0x749   : > { %v1624_v19 = vsel %vm1587_vm3, %v3038_v18, 0.0  ;;  %v3040_v20 = vpop.eup %3039 }
 0x74a   : > { %v1630_v21 = vsel %vm1587_vm3, %v3040_v20, 0.0 }
 0x74b   : > { %1634 = vadd.xlane.f32.xlu0 %v1633_v7 }
 0x757   : > { %1723 = vrot.lane.b32.xlu1 %v3892_v0, %s3411_s29  ;;  %v3042_v0 = vpop.eup %3041 }
 0x761   : > { %1721 = vrot.lane.b32.xlu0 %v3895_v2, %s3411_s29  ;;  %v1627_v2 = vsel %vm1587_vm3, %v3042_v0, 0.0 }
 0x77b   : > { %1625 = vadd.xlane.f32.xlu1 %v1624_v19 }
 0x77f   : > { %1631 = vadd.xlane.f32.xlu1 %v1630_v21 }
 0x780   : > { %1628 = vadd.xlane.f32.xlu0 %v1627_v2 }
 0x790   : > { %1658 = vrot.lane.b32.xlu1 %v3887_v62, %s3411_s29 }
 0x796   : > { %1660 = vrot.lane.b32.xlu0 %v3884_v55, %s3411_s29 }
 0x7cf   : > { %v1638_v22 = vpop.xlane.xlu1 %1637 }
 0x7d0   : > { %v1641_v23 = vpop.xlane.xlu0 %1640 }
 0x7d1   : > { %3043 = vrcp.f32 %v1641_v23 }
 0x7d2   : > { %3045 = vrcp.f32 %v1638_v22 }
 0x7d3   : > { %v1724_v24 = vpop.permute.xlu1 %1723 }
 0x7d4   : > { %v1733_v25 = vsel %vm1669_vm4, %v1724_v24, 0  ;;  %v1635_v26 = vpop.xlane.xlu0 %1634  ;;  %2836 = vmatprep.subr.msk.bf16.mxu0 %vm1669_vm4, %v1724_v24 }
 0x7d5   : > { %3047 = vrcp.f32 %v1635_v26  ;;  %2788 = vmatpush3.bf16.msra.mxu0 %v1733_v25 }
 0x7d8   : > { %v1722_v27 = vpop.permute.xlu0 %1721 }
 0x7d9   : > { %2789 = vmatprep.subr.bf16.mxu0 %v1722_v27 }
 0x7da   : > { %2790 = vmatpush3.bf16.msra.mxu0 %v1722_v27 }
 0x7de   : > { %v3044_v62 = vpop.eup %3043 }
 0x7df   : > { %v3046_v28 = vpop.eup %3045  ;;  %v1653_v55 = vmul.f32 %v3044_v62, %v3034_v61 }
 0x7e0   : > { %v1652_v31 = vmul.f32 %v3046_v28, %v3032_v60 }
 0x7e1   : > { %v1657_v33 = vpack.c.bf16 %v1653_v55, %v1653_v55 }
 0x7e2   : > { %v3048_v29 = vpop.eup %3047 }
 0x7e3   : > { %v1651_v30 = vmul.f32 %v3048_v29, %v3036_v6 }
 0x7e5   : > { %v1656_v32 = vpack.c.bf16 %v1652_v31, %v1651_v30 }
 0x7e7   : > { %2791 = vmatprep.mubr.msk.bf16.mxu0 %vm1587_vm3, %v1656_v32 }
 0x7e8   : > { %2792 = vmatmul.mubr.msk.bf16.vlgmr.msra.gmra.mxu0 %vm1587_vm3, %v1657_v33 }
 0x804   : > { %v1626_v34 = vpop.xlane.xlu1 %1625 }
 0x805   : > { %3049 = vrcp.f32 %v1626_v34  ;;  %v3019_v34 = vld [vmem:[%s3793_s4 + $0x8] sm:$0xff]  }
 0x806   : > { %2803 = vmatprep.subr.bf16.mxu0 %v3019_v34 }
 0x807   : > { %2804 = vmatpush3.bf16.msra.mxu0 %v3019_v34 }
 0x808   : > { %v1632_v35 = vpop.xlane.xlu1 %1631 }
 0x809   : > { %3051 = vrcp.f32 %v1632_v35  ;;  %v1629_v36 = vpop.xlane.xlu0 %1628  ;;  %v3020_v35 = vld [vmem:[%s3793_s4] sm:$0xff]  }
 0x80a   : > { %3053 = vrcp.f32 %v1629_v36  ;;  %2805 = vmatprep.subr.bf16.mxu0 %v3020_v35  ;;  %v3021_v36 = vld [vmem:[%s3803_s17 + $0x18] sm:$0xff]  }
 0x80b   : > { %2806 = vmatpush3.bf16.msra.mxu0 %v3020_v35 }
 0x80c   : > { %v1659_v39 = vpop.permute.xlu1 %1658 }
 0x80d   : > { %v1661_v37 = vpop.permute.xlu0 %1660 }
 0x80e   : > { %v1671_v38 = vsel %vm1669_vm4, %v1661_v37, 0  ;;  %2835 = vmatprep.subr.msk.bf16.mxu1 %vm1669_vm4, %v1661_v37 }
 0x80f   : > { %2780 = vmatpush3.bf16.msra.mxu1 %v1671_v38 }
 0x810   : > { %2781 = vmatprep.subr.bf16.mxu1 %v1659_v39 }
 0x812   : > { %v3050_v40 = vpop.eup %3049 }
 0x813   : > { %2782 = vmatpush3.bf16.msra.mxu1 %v1659_v39  ;;  %v1648_v44 = vmul.f32 %v3050_v40, %v3038_v18 }
 0x814   : > { %2795 = vmatprep.subr.bf16.mxu1 %v3017_v48 }
 0x816   : > { %v3052_v41 = vpop.eup %3051 }
 0x817   : > { %v3054_v42 = vpop.eup %3053  ;;  %v1650_v43 = vmul.f32 %v3052_v41, %v3040_v20 }
 0x818   : > { %v1649_v45 = vmul.f32 %v3054_v42, %v3042_v0 }
 0x819   : > { %v1655_v46 = vpack.c.bf16 %v1650_v43, %v1650_v43 }
 0x81a   : > { %v1654_v47 = vpack.c.bf16 %v1649_v45, %v1648_v44 }
 0x81c   : > { %2783 = vmatprep.mubr.msk.bf16.mxu1 %vm1587_vm3, %v1654_v47 }
 0x81d   : > { %2784 = vmatmul.mubr.msk.bf16.vlgmr.msra.gmra.mxu1 %vm1587_vm3, %v1655_v46 }
 0x81e   : > { %2796 = vmatpush3.bf16.msra.mxu1 %v3017_v48  ;;  %v2646_v48 = vld [vmem:[%s1048_s5] ss:$0 sm:$0xff] }
 0x81f   : > { %2797 = vmatprep.subr.bf16.mxu1 %v3018_v49 }
 0x822   : > { %2798 = vmatpush3.bf16.msra.mxu1 %v3018_v49 }
 0x823   : > { %2811 = vmatprep.subr.bf16.mxu1 %v3021_v36 }
 0x8a8   : > { %v2793_v50 = vpop.f32.mrf.mxu0 }
 0x8aa   : > { %v1769_v51 = vpop.f32.mrf.mxu0 }
 0x8ac   : > { %v2794_v52 = vpop.f32.mrf.mxu0 }
 0x8ae   : > { %v1772_v53 = vpop.f32.mrf.mxu0 }
 0x8af   : > { %v3010_v54 = vpack.i.bf16 %v1772_v53, %v1769_v51 }
 0x8b1   : > { %3011 = vrot.lane.b32.xlu1 %v3010_v54, %s3412_s26  ;;  %v2647_v54 = vld [vmem:[%s1051_s0] ss:$0 sm:$0xff] }
 0x8b5   : > { %1790 = vrot.lane.b32.xlu1 %v2793_v50, %s3412_s26 }
 0x8dd   : > { %v2785_v56 = vpop.f32.mrf.mxu1 }
 0x8df   : > { %v1707_v57 = vpop.f32.mrf.mxu1 }
 0x8e1   : > { %v2786_v58 = vpop.f32.mrf.mxu1 }
 0x8e3   : > { %v1710_v63 = vpop.f32.mrf.mxu1 }
 0x923   : > { %v3012_v59 = vpop.permute.xlu1 %3011 }
 0x924   : > { %v3014_v60 = vunpack.i.h.bf16 %v3012_v59  ;;  %v3013_v61 = vunpack.i.l.bf16 %v3012_v59 }
 0x926   : > { %v1795_v1 = vsel %vm1456_vm2, %v1707_v57, %v3013_v61  ;;  %v1796_v6 = vsel %vm1456_vm2, %v1710_v63, %v3014_v60 }
 0x927   : > { %v1798_v7 = vpack.c.bf16 %v1796_v6, %v1795_v1  ;;  %v1791_v8 = vpop.permute.xlu1 %1790  ;;  %v3022_v1 = vld [vmem:[%s3803_s17 + $0x10] sm:$0xff]   ;;  %v3023_v6 = vld [vmem:[%s3803_s17 + $0x8] sm:$0xff]  }
 0x928   : > { %v1797_v9 = vsel %vm1456_vm2, %v2785_v56, %v1791_v8 }
 0x929   : > { %v1799_v10 = vpack.c.bf16 %v1797_v9, %v1797_v9  ;;  %2799 = vmatprep.mubr.msk.bf16.mxu1 %vm1295_vm1, %v1798_v7  ;;  %v3024_v7 = vld [vmem:[%s3803_s17] sm:$0xff]  }
 0x92a   : > { %v2648_v9 = vld [vmem:[%s1059_s6] ss:$0 sm:$0xff] }
 0x92b   : > { %2800 = vmatmul.mubr.msk.bf16.vlgmr.msra.gmra.mxu1 %vm1295_vm1, %v1799_v10 }
 0x92c   : > { %2812 = vmatpush3.bf16.msra.mxu1 %v3021_v36 }
 0x92d   : > { %2813 = vmatprep.subr.bf16.mxu1 %v3022_v1 }
 0x930   : > { %2814 = vmatpush3.bf16.msra.mxu1 %v3022_v1 }
 0x931   : > { %2815 = vmatprep.subr.bf16.mxu1 %v3023_v6 }
 0x934   : > { %2816 = vmatpush3.bf16.msra.mxu1 %v3023_v6 }
 0x935   : > { %2817 = vmatprep.subr.bf16.mxu1 %v3024_v7 }
 0x938   : > { %2818 = vmatpush3.bf16.msra.mxu1 %v3024_v7 }
 0x9eb   : > { %v2801_v11 = vpop.f32.mrf.mxu1 }
 0x9ec   : > { %v1872_v14 = vadd.f32 %v2801_v11, %v2641_v12 }
 0x9ed   : > { %v1863_v13 = vpop.f32.mrf.mxu1 }
 0x9ee   : > { %v1864_v15 = vadd.f32 %v2641_v12, %v1863_v13  ;;  %v3966_v20 = vadd.f32 %v1872_v14, %v3849_v4 }
 0x9ef   : > { %v2802_v16 = vpop.f32.mrf.mxu1 }
 0x9f0   : > { %v3963_v18 = vadd.f32 %v1864_v15, %v3847_v3  ;;  %v1888_v23 = vsel %vm1295_vm1, %v3966_v20, 0.0 }
 0x9f1   : > { %v1866_v19 = vpop.f32.mrf.mxu1 }
 0x9f2   : > { %v1867_v0 = vadd.f32 %v2641_v12, %v1866_v19  ;;  %v1882_v21 = vsel %vm1295_vm1, %v3963_v18, 0.0 }
 0x9f3   : > { %1883 = vadd.xlane.f32.xlu0 %v1882_v21 }
 0x9f4   : > { %v3971_v2 = vadd.f32 %v1867_v0, %v3851_v5 }
 0x9f6   : > { %v1885_v22 = vsel %vm1295_vm1, %v3971_v2, 0.0 }
 0x9f7   : > { %1886 = vadd.xlane.f32.xlu1 %v1885_v22  ;;  %1889 = vadd.xlane.f32.xlu0 %v1888_v23  ;;  %v2653_v23 = vld [vmem:[%s1067_s2] ss:$0 sm:$0xff] }
 0xa7c   : > { %v1884_v3 = vpop.xlane.xlu0 %1883 }
 0xa7d   : > { %v1891_v24 = vmul.f32 0.03125, %v1884_v3 }
 0xa7f   : > { %v1894_v4 = vsub.f32 %v3963_v18, %v1891_v24 }
 0xa80   : > { %v1887_v25 = vpop.xlane.xlu1 %1886  ;;  %v1890_v26 = vpop.xlane.xlu0 %1889 }
 0xa81   : > { %v1892_v27 = vmul.f32 0.03125, %v1887_v25  ;;  %v1893_v62 = vmul.f32 0.03125, %v1890_v26  ;;  %v1897_v5 = vmul.f32 %v1894_v4, %v1894_v4 }
 0xa83   : > { %v1895_v28 = vsub.f32 %v3971_v2, %v1892_v27  ;;  %v1896_v29 = vsub.f32 %v3966_v20, %v1893_v62  ;;  %v1900_v55 = vsel %vm1295_vm1, %v1897_v5, 0.0 }
 0xa84   : > { %1901 = vadd.xlane.f32.xlu0 %v1900_v55 }
 0xa85   : > { %v1898_v30 = vmul.f32 %v1895_v28, %v1895_v28  ;;  %v1899_v31 = vmul.f32 %v1896_v29, %v1896_v29 }
 0xa87   : > { %v1903_v32 = vsel %vm1295_vm1, %v1898_v30, 0.0  ;;  %v1906_v33 = vsel %vm1295_vm1, %v1899_v31, 0.0 }
 0xa88   : > { %1904 = vadd.xlane.f32.xlu0 %v1903_v32  ;;  %1907 = vadd.xlane.f32.xlu1 %v1906_v33 }
 0xb0d   : > { %v1902_v37 = vpop.xlane.xlu0 %1901 }
 0xb0e   : > { %v1909_v38 = vmul.f32 0.03125, %v1902_v37 }
 0xb10   : > { %v1912_v39 = vadd.f32 1e-05, %v1909_v38 }
 0xb11   : > { %v1908_v40 = vpop.xlane.xlu1 %1907  ;;  %v1905_v41 = vpop.xlane.xlu0 %1904 }
 0xb12   : > { %3055 = vrsqrt.f32 %v1912_v39  ;;  %v1911_v42 = vmul.f32 0.03125, %v1908_v40  ;;  %v1910_v43 = vmul.f32 0.03125, %v1905_v41 }
 0xb14   : > { %v1914_v44 = vadd.f32 1e-05, %v1911_v42  ;;  %v1913_v45 = vadd.f32 1e-05, %v1910_v43 }
 0xb16   : > { %3057 = vrsqrt.f32 %v1914_v44 }
 0xb17   : > { %3059 = vrsqrt.f32 %v1913_v45 }
 0xb1f   : > { %v3056_v46 = vpop.eup %3055 }
 0xb20   : > { %v1918_v47 = vmul.f32 %v3056_v46, %v1894_v4 }
 0xb22   : > { %v1927_v53 = vmul.f32 %v2646_v48, %v1918_v47 }
 0xb23   : > { %v3058_v49 = vpop.eup %3057 }
 0xb24   : > { %v3060_v50 = vpop.eup %3059  ;;  %v1920_v51 = vmul.f32 %v3058_v49, %v1896_v29  ;;  %v1936_v59 = vadd.f32 %v2647_v54, %v1927_v53 }
 0xb25   : > { %v1919_v52 = vmul.f32 %v3060_v50, %v1895_v28 }
 0xb26   : > { %v1929_v56 = vmul.f32 %v2646_v48, %v1920_v51 }
 0xb27   : > { %v1928_v57 = vmul.f32 %v2646_v48, %v1919_v52 }
 0xb28   : > { %v1938_v58 = vadd.f32 %v2647_v54, %v1929_v56 }
 0xb29   : > { %v1937_v60 = vadd.f32 %v2647_v54, %v1928_v57 }
 0xb2a   : > { %v1940_v61 = vpack.c.bf16 %v1938_v58, %v1938_v58 }
 0xb2b   : > { %v1939_v63 = vpack.c.bf16 %v1937_v60, %v1936_v59 }
 0xb2d   : > { %2807 = vmatprep.mubr.msk.bf16.mxu0 %vm1295_vm1, %v1939_v63 }
 0xb2e   : > { %2808 = vmatmul.mubr.msk.bf16.vlgmr.msra.gmra.mxu0 %vm1295_vm1, %v1940_v61 }
 0xbee   : > { %v2809_v8 = vpop.f32.mrf.mxu0 }
 0xbef   : > { %v2013_v11 = vadd.f32 %v2809_v8, %v2648_v9 }
 0xbf0   : > { %v2004_v10 = vpop.f32.mrf.mxu0 }
 0xbf1   : > { %v2005_v13 = vadd.f32 %v2648_v9, %v2004_v10  ;;  %v2020_v16 = vmax.f32 %v2013_v11, 0.0 }
 0xbf2   : > { %v2810_v12 = vpop.f32.mrf.mxu0 }
 0xbf3   : > { %v2018_v19 = vmax.f32 %v2005_v13, 0.0  ;;  %v2022_v22 = vpack.c.bf16 %v2020_v16, %v2020_v16 }
 0xbf4   : > { %v2007_v14 = vpop.f32.mrf.mxu0 }
 0xbf5   : > { %v2008_v15 = vadd.f32 %v2648_v9, %v2007_v14 }
 0xbf7   : > { %v2019_v0 = vmax.f32 %v2008_v15, 0.0 }
 0xbf9   : > { %v2021_v21 = vpack.c.bf16 %v2019_v0, %v2018_v19 }
 0xbfb   : > { %2819 = vmatprep.mubr.msk.bf16.mxu1 %vm2062_vm5, %v2021_v21 }
 0xbfc   : > { %2820 = vmatmul.mubr.msk.bf16.vlgmr.msra.gmra.mxu1 %vm2062_vm5, %v2022_v22 }
 0xcbc   : > { %v2821_v3 = vpop.f32.mrf.mxu1 }
 0xcbd   : > { %v2112_v24 = vadd.f32 %v2821_v3, %v2653_v23 }
 0xcbe   : > { %v2103_v4 = vpop.f32.mrf.mxu1 }
 0xcbf   : > { %v2119_v25 = vadd.f32 %v2112_v24, %v3966_v20  ;;  %v2104_v26 = vadd.f32 %v2653_v23, %v2103_v4 }
 0xcc0   : > { %v2822_v27 = vpop.f32.mrf.mxu1 }
 0xcc1   : > { %2122 = vst.msk [vmem:[#allocation2 + $0x10] sm:$0xff] %vm1295_vm1, %v2119_v25  ;;  %v2117_v62 = vadd.f32 %v2104_v26, %v3963_v18 }
 0xcc2   : > { %v2106_v5 = vpop.f32.mrf.mxu1 }
 0xcc3   : > { %2120 = vst.msk [vmem:[#allocation2] sm:$0xff] %vm1295_vm1, %v2117_v62  ;;  %v2107_v28 = vadd.f32 %v2653_v23, %v2106_v5  ;;  %2126 = sbr.rel (%p2660_p10) target bundleno = 3807 (0xedf), region = 156 }
 0xcc5   : > { %v2118_v29 = vadd.f32 %v2107_v28, %v3971_v2 }
 0xcc7   : > { %2121 = vst.msk [vmem:[#allocation2 + $0x8] sm:$0xff] %vm1295_vm1, %v2118_v29 }
 0xcc8   : > { %v2129_v55 = vsel %vm1295_vm1, %v2117_v62, 0.0  ;;  %v2135_v20 = vsel %vm1295_vm1, %v2119_v25, 0.0  ;;  %v2132_v30 = vsel %vm1295_vm1, %v2118_v29, 0.0  ;;  %v3061_v44 = vld [vmem:[%s4222_s3 + $0x8] sm:$0xff]   ;;  %v3062_v45 = vld [vmem:[%s4222_s3] sm:$0xff]   ;;  %v2266_v3 = vand.u32 127, %v1282_v17 }
 0xcc9   : > { %2130 = vadd.xlane.f32.xlu0 %v2129_v55  ;;  %2136 = vadd.xlane.f32.xlu1 %v2135_v20  ;;  %v2661_v58 = vld [vmem:[#allocation12] ss:$0 sm:$0xff]  ;;  %v2662_v6 = vld [vmem:[#allocation14] ss:$0 sm:$0xff]  ;;  %v2663_v14 = vld [vmem:[#allocation15] ss:$0 sm:$0xff] }
 0xcca   : > { %2823 = vmatprep.subr.bf16.mxu0 %v3061_v44  ;;  %vm2267_vm6 = vcmp.lt.s32.totalorder %v2266_v3, 4 }
 0xccb   : > { %2824 = vmatpush3.bf16.msra.mxu0 %v3061_v44 }
 0xccc   : > { %2825 = vmatprep.subr.bf16.mxu0 %v3062_v45 }
 0xccd   : > { %2133 = vadd.xlane.f32.xlu0 %v2132_v30 }
 0xccf   : > { %2826 = vmatpush3.bf16.msra.mxu0 %v3062_v45 }
 0xd52   : > { %v2131_v18 = vpop.xlane.xlu0 %2130  ;;  %v2137_v31 = vpop.xlane.xlu1 %2136 }
 0xd53   : > { %v2138_v32 = vmul.f32 0.03125, %v2131_v18  ;;  %v2140_v33 = vmul.f32 0.03125, %v2137_v31 }
 0xd55   : > { %v2141_v34 = vsub.f32 %v2117_v62, %v2138_v32  ;;  %v2143_v2 = vsub.f32 %v2119_v25, %v2140_v33 }
 0xd56   : > { %v2134_v35 = vpop.xlane.xlu0 %2133 }
 0xd57   : > { %v2139_v36 = vmul.f32 0.03125, %v2134_v35  ;;  %v2144_v37 = vmul.f32 %v2141_v34, %v2141_v34  ;;  %v2146_v38 = vmul.f32 %v2143_v2, %v2143_v2 }
 0xd59   : > { %v2142_v39 = vsub.f32 %v2118_v29, %v2139_v36  ;;  %v2147_v40 = vsel %vm1295_vm1, %v2144_v37, 0.0  ;;  %v2153_v41 = vsel %vm1295_vm1, %v2146_v38, 0.0 }
 0xd5a   : > { %2148 = vadd.xlane.f32.xlu1 %v2147_v40 }
 0xd5b   : > { %v2145_v42 = vmul.f32 %v2142_v39, %v2142_v39 }
 0xd5d   : > { %v2150_v43 = vsel %vm1295_vm1, %v2145_v42, 0.0 }
 0xd5e   : > { %2154 = vadd.xlane.f32.xlu1 %v2153_v41  ;;  %2151 = vadd.xlane.f32.xlu0 %v2150_v43 }
 0xde3   : > { %v2149_v46 = vpop.xlane.xlu1 %2148 }
 0xde4   : > { %v2156_v47 = vmul.f32 0.03125, %v2149_v46 }
 0xde6   : > { %v2159_v48 = vadd.f32 1e-05, %v2156_v47 }
 0xde7   : > { %v2155_v49 = vpop.xlane.xlu1 %2154  ;;  %v2152_v50 = vpop.xlane.xlu0 %2151 }
 0xde8   : > { %3063 = vrsqrt.f32 %v2159_v48  ;;  %v2158_v51 = vmul.f32 0.03125, %v2155_v49  ;;  %v2157_v52 = vmul.f32 0.03125, %v2152_v50 }
 0xdea   : > { %v2161_v53 = vadd.f32 1e-05, %v2158_v51  ;;  %v2160_v54 = vadd.f32 1e-05, %v2157_v52 }
 0xdec   : > { %3065 = vrsqrt.f32 %v2161_v53 }
 0xded   : > { %3067 = vrsqrt.f32 %v2160_v54 }
 0xdf5   : > { %v3064_v56 = vpop.eup %3063 }
 0xdf6   : > { %v2165_v57 = vmul.f32 %v3064_v56, %v2141_v34 }
 0xdf8   : > { %v2174_v1 = vmul.f32 %v2661_v58, %v2165_v57 }
 0xdf9   : > { %v3066_v59 = vpop.eup %3065 }
 0xdfa   : > { %v3068_v60 = vpop.eup %3067  ;;  %v2167_v61 = vmul.f32 %v3066_v59, %v2143_v2  ;;  %v2183_v10 = vadd.f32 %v2662_v6, %v2174_v1 }
 0xdfb   : > { %v2166_v63 = vmul.f32 %v3068_v60, %v2142_v39 }
 0xdfc   : > { %v2176_v7 = vmul.f32 %v2661_v58, %v2167_v61 }
 0xdfd   : > { %v2175_v8 = vmul.f32 %v2661_v58, %v2166_v63 }
 0xdfe   : > { %v2185_v9 = vadd.f32 %v2662_v6, %v2176_v7 }
 0xdff   : > { %v2184_v11 = vadd.f32 %v2662_v6, %v2175_v8 }
 0xe00   : > { %v2187_v12 = vpack.c.bf16 %v2185_v9, %v2185_v9 }
 0xe01   : > { %v2186_v13 = vpack.c.bf16 %v2184_v11, %v2183_v10 }
 0xe03   : > { %2827 = vmatprep.mubr.msk.bf16.mxu0 %vm1295_vm1, %v2186_v13 }
 0xe04   : > { %2828 = vmatmul.mubr.msk.bf16.vlgmr.msra.gmra.mxu0 %vm1295_vm1, %v2187_v12 }
 0xec4   : > { %v2829_v15 = vpop.f32.mrf.mxu0 }
 0xec5   : > { %v2260_v16 = vadd.f32 %v2829_v15, %v2663_v14 }
 0xec6   : > { %v2251_v19 = vpop.f32.mrf.mxu0 }
 0xec7   : > { %3069 = vtanh.f32 %v2260_v16  ;;  %v2252_v0 = vadd.f32 %v2663_v14, %v2251_v19 }
 0xec8   : > { %v2830_v21 = vpop.f32.mrf.mxu0 }
 0xec9   : > { %3071 = vtanh.f32 %v2252_v0 }
 0xeca   : > { %v2254_v22 = vpop.f32.mrf.mxu0 }
 0xecb   : > { %v2255_v23 = vadd.f32 %v2663_v14, %v2254_v22 }
 0xecd   : > { %3073 = vtanh.f32 %v2255_v23 }
 0xed4   : > { %v3070_v24 = vpop.eup %3069 }
 0xed5   : > { %v2273_v4 = vsel %vm2267_vm6, %v3070_v24, %v2260_v16 }
 0xed6   : > { %v2680_v25 = vpack.c.bf16 %v2273_v4, %v2273_v4  ;;  %v3072_v26 = vpop.eup %3071 }
 0xed7   : > { %v2271_v62 = vsel %vm2267_vm6, %v3072_v26, %v2252_v0 }
 0xed8   : > { %2289 = vst [vmem:[%s3809_s14 + $0x8] sm:$0xf] %v2680_v25 }
 0xeda   : > { %v3074_v27 = vpop.eup %3073 }
 0xedb   : > { %v2272_v5 = vsel %vm2267_vm6, %v3074_v27, %v2255_v23 }
 0xedc   : > { %v2685_v28 = vpack.c.bf16 %v2272_v5, %v2271_v62 }
 0xede   : > { %2686 = vst [vmem:[%s3809_s14] sm:$0xff] %v2685_v28  }
 0xedf PF: > { %s4223_s27 = sld [smem:[#allocation27_spill]]  ;;  %s2304_s18 = sshll.u32 %s3809_s14, 4  ;;  %s4042_s18 = int_to_ptr.vmem [resolvable:$true] %s2304_s18 }
 0xee0   : > { %s4225_s4 = sld [smem:[#allocation58_spill]]  ;;  %s2291_s10 = scalar_lea.sflag [#allocation5], %s3720_s22 }
 0xee1   : > { %s3285_s11 = scalar_lea.vmem %s4042_s18, 192  ;;  %s3413_s25 = smov [#allocation17]  }
 0xee2   : > { %p3286_p5 = scmp.ne.s32.totalorder %s4042_s18, %s3285_s11  ;;  %s3289_s7 = sshll.u32 %s3413_s25, 4  ;;  %s3290_s7 = int_to_ptr.vmem [resolvable:$false] %s3289_s7 }
 0xee3   : > { %s3291_s14 = scalar_lea.vmem %s3290_s7, 384  ;;  %p3292_p13 = scmp.lt.s32.totalorder %s4042_s18, %s3290_s7 }
 0xee4   : > { %p3287_p11 = pnand %p3286_p5, %p3687_p7  ;;  %p3293_p2 = scmp.lt.s32.totalorder %s3291_s14, %s3285_s11 }
 0xee5   : > { %s2681_s8 = smul.u32 192, %s4223_s27 }
 0xee6   : > { %p3288_p12 = pneg %p3287_p11  ;;  %p3294_p9 = por %p3293_p2, %p3292_p13 }
 0xee7   : > { %s4040_s23 = scalar_lea.hbm %s4225_s4, %s2681_s8 }
 0xee8   : > { %p3295_p8 = pnand %p3294_p9, %p3288_p12 }
 0xeea   : > { %3298 = shalt.err (!%p3295_p8)
}
 0xeeb   : > { %s3299_s5 = scalar_lea.hbm %s4040_s23, 192  ;;  %s3303_s17 = scalar_lea.hbm %s4225_s4, 384 }
 0xeec   : > { %p3300_p3 = scmp.ne.s32.totalorder %s4040_s23, %s3299_s5  ;;  %p3304_p1 = scmp.lt.s32.totalorder %s4040_s23, %s4225_s4 }
 0xeed   : > { %p3305_p10 = scmp.lt.s32.totalorder %s3303_s17, %s3299_s5 }
 0xeee   : > { %p3301_p0 = pnand %p3300_p3, %p3687_p7 }
 0xeef   : > { %p3306_p5 = por %p3305_p10, %p3304_p1 }
 0xef0   : > { %p3302_p6 = pneg %p3301_p0 }
 0xef2   : > { %p3307_p11 = pnand %p3306_p5, %p3302_p6 }
 0xef4   : > { %3310 = shalt.err (!%p3307_p11)
}
 0xef5   : > { %s3414_s28 = smov 4  }
 0xef6   : > { %2868 = dma.vmem_to_hbm [thread:$0]  (%p3687_p7), %s4042_s18, 192, %s4040_s23, %s2291_s10, %s3411_s29, %s3411_s29, %s3414_s28  }
 0xef7 PF: > { %s4226_s6 = sld [smem:[#allocation30_spill]] }
 0xef8   : > { %s4227_s2 = sld [smem:[#allocation24_spill]] }
 0xefd   : > { %p2915_p12 = scmp.ge.s32.totalorder %s4226_s6, 2 }
 0xefe   : > { %s2319_s27 = sand.u32 1, %s4227_s2  }
 0xeff   : > { %p2897_p13 = pnand %p2915_p12, %p3691_p4  ;;  %s2320_s8 = scalar_lea.sflag [#allocation5], %s2319_s27 }
 0xf01   : > { %p2898_p2 = pneg %p2897_p13 }
 0xf03   : > { %3364 = dma.done.wait (%p2898_p2), %s2320_s8, 192  }
 0xf04   : > { %3366 = vsyncadd (%p2898_p2), %s2320_s8, 4294967104  ;;  %s44_s0 = sadd.s32 1, %s4226_s6   ;;  %s4229_s5 = sld [smem:[#allocation25_spill]] }
 0xf05   : > { %p41_p9 = scmp.ge.s32.totalorder %s44_s0, 6   ;;  %s4230_s26 = sld [smem:[#allocation26_spill]] }
 0xf06   : > { %s4231_s27 = sld [smem:[#allocation35_spill]] }
 0xf07   : > { %s4232_s28 = sld [smem:[#allocation28_spill]]  ;;  %43 = sbr.rel (!%p41_p9) target bundleno = 34 (0x22), region = 236 }
 0xf08   : > { %s4233_s6 = sld [smem:[#allocation29_spill]] }
 0xf09   : > { %s4234_s2 = sld [smem:[#allocation31_spill]] }
 0xf0a   : > { %s4235_s29 = sld [smem:[#allocation32_spill]] }
 0xf0c   :  { %2325 = vsyncpa [#allocation4], 1 }
 0xf0d   :  { %2327 = vsyncpa [#allocation4 + $0x1], 1 }
 0xf0e   :  { %2328 = vsyncpa [#allocation7], 1 }
 0xf0f   :  { %2329 = vsyncpa [#allocation10], 1 }
 0xf10   :  { %2330 = vsyncpa [#allocation13], 1 }
 0xf11   :  { %2331 = vsyncpa [#allocation16], 1 }
 0xf12   :  { %2332 = vsyncpa [#allocation5], 1 }
 0xf13   :  { %2334 = vsyncpa [#allocation5 + $0x1], 1 }

// kernel: tpu_custom_call.1
= control target key start
LH: loop header
LB: loop body
LE: loop exit
PB: predicated region body
PF: predicated region fallthrough
CT: control target
= control target key end

     0   :  { %s4097_s0 = inlined_call_operand.vmem [shape: bf16[48,128], index: 0, kind: input, shape index: {}]   ;;  %s4098_s1 = inlined_call_operand.hbm [shape: f32[2,1,24], index: 1, kind: input, shape index: {}]   ;;  %s4099_s2 = inlined_call_operand.vmem [shape: f32[24,24], index: 2, kind: input, shape index: {}]   ;;  %s4100_s3 = inlined_call_operand.vmem [shape: bf16[128,32], index: 3, kind: input, shape index: {}]   ;;  %s4101_s4 = inlined_call_operand.hbm [shape: f32[24,32], index: 4, kind: input, shape index: {}]   ;;  %s4102_s5 = inlined_call_operand.hbm [shape: f32[1,32], index: 5, kind: input, shape index: {}]   ;;  %s4103_s6 = inlined_call_operand.hbm [shape: f32[1,32], index: 6, kind: input, shape index: {}]   ;;  %s4104_s7 = inlined_call_operand.hbm [shape: f32[24,32], index: 7, kind: input, shape index: {}]   ;;  %s4105_s8 = inlined_call_operand.hbm [shape: f32[1,32], index: 8, kind: input, shape index: {}]   ;;  %s4106_s9 = inlined_call_operand.hbm [shape: f32[1,32], index: 9, kind: input, shape index: {}]   ;;  %s4107_s10 = inlined_call_operand.vmem [shape: bf16[32,128], index: 10, kind: input, shape index: {}]   ;;  %s4108_s11 = inlined_call_operand.hbm [shape: f32[1,128], index: 11, kind: input, shape index: {}]   ;;  %s4109_s12 = inlined_call_operand.vmem [shape: f32[2,1,32], index: 12, kind: input, shape index: {}]   ;;  %s4110_s13 = inlined_call_operand.vmem [shape: f32[2,1,32], index: 13, kind: input, shape index: {}]   ;;  %s4111_s14 = inlined_call_operand.vmem [shape: bf16[2,32,96], index: 14, kind: input, shape index: {}]   ;;  %s4112_s15 = inlined_call_operand.vmem [shape: f32[2,1,96], index: 15, kind: input, shape index: {}]   ;;  %s4113_s16 = inlined_call_operand.vmem [shape: bf16[2,32,32], index: 16, kind: input, shape index: {}]   ;;  %s4114_s17 = inlined_call_operand.vmem [shape: f32[2,1,32], index: 17, kind: input, shape index: {}]   ;;  %s4115_s18 = inlined_call_operand.vmem [shape: f32[2,1,32], index: 18, kind: input, shape index: {}]   ;;  %s4116_s19 = inlined_call_operand.vmem [shape: f32[2,1,32], index: 19, kind: input, shape index: {}]   ;;  %s4117_s20 = inlined_call_operand.vmem [shape: bf16[2,32,64], index: 20, kind: input, shape index: {}]   ;;  %s4118_s21 = inlined_call_operand.vmem [shape: f32[2,1,64], index: 21, kind: input, shape index: {}]   ;;  %s4119_s22 = inlined_call_operand.vmem [shape: bf16[2,64,32], index: 22, kind: input, shape index: {}]   ;;  %s4120_s23 = inlined_call_operand.vmem [shape: f32[2,1,32], index: 23, kind: input, shape index: {}]   ;;  %s4121_s24 = inlined_call_operand.hbm [shape: bf16[48,128], index: 24, kind: output, shape index: {}]  }
   0x1   :  { %4143 = sst [smem:[#allocation37_spill]] %s4097_s0 }
   0x2   :  { %4144 = sst [smem:[#allocation38_spill]] %s4098_s1 }
   0x3   :  { %4145 = sst [smem:[#allocation39_spill]] %s4099_s2 }
   0x4   :  { %4146 = sst [smem:[#allocation40_spill]] %s4100_s3 }
   0x5   :  { %4147 = sst [smem:[#allocation41_spill]] %s4101_s4 }
   0x6   :  { %4148 = sst [smem:[#allocation42_spill]] %s4102_s5 }
   0x7   :  { %4149 = sst [smem:[#allocation43_spill]] %s4103_s6 }
   0x8   :  { %4150 = sst [smem:[#allocation44_spill]] %s4104_s7 }
   0x9   :  { %4151 = sst [smem:[#allocation45_spill]] %s4105_s8 }
   0xa   :  { %4152 = sst [smem:[#allocation46_spill]] %s4106_s9 }
   0xb   :  { %4153 = sst [smem:[#allocation47_spill]] %s4107_s10 }
   0xc   :  { %4154 = sst [smem:[#allocation48_spill]] %s4108_s11 }
   0xd   :  { %4155 = sst [smem:[#allocation49_spill]] %s4111_s14 }
   0xe   :  { %4156 = sst [smem:[#allocation50_spill]] %s4113_s16 }
   0xf   :  { %4157 = sst [smem:[#allocation51_spill]] %s4114_s17 }
  0x10   :  { %4158 = sst [smem:[#allocation52_spill]] %s4115_s18 }
  0x11   :  { %4159 = sst [smem:[#allocation53_spill]] %s4116_s19 }
  0x12   :  { %4160 = sst [smem:[#allocation54_spill]] %s4117_s20 }
  0x13   :  { %4161 = sst [smem:[#allocation55_spill]] %s4118_s21 }
  0x14   :  { %4162 = sst [smem:[#allocation56_spill]] %s4119_s22 }
  0x15   :  { %4163 = sst [smem:[#allocation57_spill]] %s4120_s23 }
  0x16   :  { %4164 = sst [smem:[#allocation58_spill]] %s4121_s24 }
  0x17   :  { %29 = vsyncpa [#allocation4], 0 }
  0x18   :  { %31 = vsyncpa [#allocation4 + $0x1], 0 }
  0x19   :  { %32 = vsyncpa [#allocation7], 0 }
  0x1a   :  { %33 = vsyncpa [#allocation10], 0 }
  0x1b   :  { %34 = vsyncpa [#allocation13], 0 }
  0x1c   :  { %35 = vsyncpa [#allocation16], 0 }
  0x1d   :  { %36 = vsyncpa [#allocation5], 0 }
  0x1e   :  { %38 = vsyncpa [#allocation5 + $0x1], 0  ;;  %s3540_s5 = smov 0   ;;  %s3542_s26 = smov 0  }
  0x1f   :  { %s3544_s27 = smov 0   ;;  %s3546_s28 = smov 0  }
  0x20   :  { %s3548_s6 = smov 0   ;;  %s3550_s2 = smov 0  }
  0x21   :  { %s3552_s29 = smov 0   ;;  %s3554_s0 = smov 0  }
  0x22 LB: > { %4165 = sst [smem:[#allocation24_spill]] %s3369_s5  ;;  %s4124_s7 = sadd.s32 4294967295, %s3397_s0   ;;  %s3397_s0 = sphi %s3554_s0, %s44_s0   ;;  %s3393_s29 = sphi %s3552_s29, %s4235_s29   ;;  %s3389_s2 = sphi %s3550_s2, %s4234_s2   ;;  %s3385_s6 = sphi %s3548_s6, %s4233_s6   ;;  %s3381_s28 = sphi %s3546_s28, %s4232_s28   ;;  %s3377_s27 = sphi %s3544_s27, %s4231_s27   ;;  %s3373_s26 = sphi %s3542_s26, %s4230_s26   ;;  %s3369_s5 = sphi %s3540_s5, %s4229_s5  }
  0x23   : > { %4166 = sst [smem:[#allocation25_spill]] %s3373_s26  ;;  %p2586_p0 = scmp.ge.s32.totalorder %s3397_s0, 1 }
  0x24   : > { %4167 = sst [smem:[#allocation26_spill]] %s3377_s27  ;;  %p3584_p1 = scmp.eq.s32.totalorder %s4124_s7, 0 }
  0x25   : > { %4168 = sst [smem:[#allocation27_spill]] %s3385_s6  ;;  %p661_p2 = scmp.lt.s32.totalorder %s3397_s0, 5 }
  0x26   : > { %4169 = sst [smem:[#allocation28_spill]] %s3389_s2  ;;  %s3399_s25 = smov [#allocation6]  }
  0x27   : > { %4170 = sst [smem:[#allocation29_spill]] %s3393_s29  ;;  %p3589_p3 = pnand %p2586_p0, %p661_p2 }
  0x28   : > { %4171 = sst [smem:[#allocation30_spill]] %s3397_s0  ;;  %s679_s8 = sshll.u32 %s3399_s25, 4  ;;  %s680_s8 = int_to_ptr.vmem [resolvable:$true] %s679_s8 }
  0x29   : > { %s4172_s30 = scalar_select %p3584_p1, 1, 0 }
  0x2a   : > { %s4173_s3 = scalar_select %p3589_p3, 1, 0 }
  0x2b   : > { %p2870_p4 = pneg %p3589_p3  ;;  %s3400_s1 = smov [#allocation9]  }
  0x2c   : > { %s704_s7 = sshll.u32 %s3400_s1, 4  ;;  %s3401_s24 = smov [#allocation12]   ;;  %s705_s7 = int_to_ptr.vmem [resolvable:$true] %s704_s7 }
  0x2d   : > { %p3597_p5 = pnand %p2870_p4, %p3584_p1  ;;  %s728_s10 = sshll.u32 %s3401_s24, 4  ;;  %s729_s10 = int_to_ptr.vmem [resolvable:$true] %s728_s10 }
  0x2e   : > { %s3086_s25 = scalar_lea.vmem %s680_s8, 384  ;;  %p3094_p10 = scmp.lt.s32.totalorder %s680_s8, %s680_s8 }
  0x2f   : > { %p3603_p6 = pneg %p3597_p5  ;;  %p3087_p7 = scmp.ne.s32.totalorder %s680_s8, %s3086_s25 }
  0x30   : > { %p3095_p11 = scmp.lt.s32.totalorder %s3086_s25, %s3086_s25 }
  0x31   : > { %p3089_p8 = pnand %p3087_p7, %p3603_p6 }
  0x32   : > { %p3096_p12 = por %p3095_p11, %p3094_p10 }
  0x33   : > { %p3090_p9 = pneg %p3089_p8 }
  0x35   : > { %p3097_p13 = pnand %p3096_p12, %p3090_p9 }
  0x37   : > { %3100 = shalt.err (!%p3097_p13)
}
  0x38   : > { %s3402_s1 = smov 128   ;;  %s3403_s24 = smov 8  }
  0x39   : > { %s4176_s20 = sld [smem:[#allocation41_spill]]  ;;  %s3112_s19 = scalar_lea.vmem %s705_s7, 16 }
  0x3a   : > { %p3113_p0 = scmp.ne.s32.totalorder %s705_s7, %s3112_s19  ;;  %s3119_s25 = scalar_lea.vmem %s705_s7, 32 }
  0x3b   : > { %p3120_p7 = scmp.lt.s32.totalorder %s705_s7, %s705_s7  ;;  %p3121_p8 = scmp.lt.s32.totalorder %s3119_s25, %s3112_s19 }
  0x3c   : > { %p3115_p2 = pnand %p3113_p0, %p3603_p6 }
  0x3d   : > { %p3122_p9 = por %p3121_p8, %p3120_p7 }
  0x3e   : > { %p3116_p4 = pneg %p3115_p2 }
  0x3f   : > { %2873 = dma.hbm_to_vmem [thread:$0]  (!%p3597_p5), %s4176_s20, 384, %s680_s8, [#allocation7], %s3402_s1, %s3402_s1, %s3403_s24  }
  0x40   : > { %p3123_p10 = pnand %p3122_p9, %p3116_p4 }
  0x42   : > { %3126 = shalt.err (!%p3123_p10)
}
  0x43   : > { %s4177_s16 = sld [smem:[#allocation43_spill]]  ;;  %s3138_s20 = scalar_lea.vmem %s729_s10, 16 }
  0x44   : > { %p3139_p11 = scmp.ne.s32.totalorder %s729_s10, %s3138_s20  ;;  %s3145_s21 = scalar_lea.vmem %s729_s10, 32 }
  0x45   : > { %p3146_p0 = scmp.lt.s32.totalorder %s729_s10, %s729_s10  ;;  %p3147_p2 = scmp.lt.s32.totalorder %s3145_s21, %s3138_s20 }
  0x46   : > { %p3141_p12 = pnand %p3139_p11, %p3603_p6 }
  0x47   : > { %p3148_p3 = por %p3147_p2, %p3146_p0 }
  0x48   : > { %p3142_p13 = pneg %p3141_p12 }
  0x49   : > { %2879 = dma.hbm_to_vmem [thread:$0]  (!%p3597_p5), %s4177_s16, 16, %s705_s7, [#allocation10]  }
  0x4a   : > { %p3149_p7 = pnand %p3148_p3, %p3142_p13 }
  0x4c   : > { %3152 = shalt.err (!%p3149_p7)
}
  0x4d   : > { %s4178_s8 = sld [smem:[#allocation45_spill]]  ;;  %s3404_s16 = smov [#allocation8]  }
  0x4e   : > { %s693_s17 = sshll.u32 %s3404_s16, 4  ;;  %s3405_s18 = smov [#allocation11]   ;;  %s694_s17 = int_to_ptr.vmem [resolvable:$true] %s693_s17 }
  0x4f   : > { %s714_s7 = sshll.u32 %s3405_s18, 4  ;;  %s3164_s25 = scalar_lea.vmem %s694_s17, 16  ;;  %s715_s7 = int_to_ptr.vmem [resolvable:$true] %s714_s7 }
  0x50   : > { %p3165_p4 = scmp.ne.s32.totalorder %s694_s17, %s3164_s25  ;;  %s3171_s20 = scalar_lea.vmem %s694_s17, 32 }
  0x51   : > { %p3172_p3 = scmp.lt.s32.totalorder %s694_s17, %s694_s17  ;;  %p3173_p10 = scmp.lt.s32.totalorder %s3171_s20, %s3164_s25 }
  0x52   : > { %p3167_p8 = pnand %p3165_p4, %p3603_p6 }
  0x53   : > { %2885 = dma.hbm_to_vmem [thread:$0]  (!%p3597_p5), %s4178_s8, 16, %s729_s10, [#allocation13]  }
  0x54   : > { %p3168_p9 = pneg %p3167_p8  ;;  %p3174_p11 = por %p3173_p10, %p3172_p3 }
  0x56   : > { %p3175_p12 = pnand %p3174_p11, %p3168_p9 }
  0x58   : > { %3178 = shalt.err (!%p3175_p12)
}
  0x59   : > { %s4179_s19 = sld [smem:[#allocation42_spill]]  ;;  %s3190_s22 = scalar_lea.vmem %s715_s7, 384 }
  0x5a   : > { %p3191_p13 = scmp.ne.s32.totalorder %s715_s7, %s3190_s22  ;;  %p3198_p7 = scmp.lt.s32.totalorder %s715_s7, %s715_s7 }
  0x5b   : > { %p3199_p4 = scmp.lt.s32.totalorder %s3190_s22, %s3190_s22 }
  0x5c   : > { %p3193_p0 = pnand %p3191_p13, %p3603_p6 }
  0x5d   : > { %p3200_p8 = por %p3199_p4, %p3198_p7 }
  0x5e   : > { %p3194_p2 = pneg %p3193_p0 }
  0x5f   : > { %2876 = dma.hbm_to_vmem [thread:$0]  (!%p3597_p5), %s4179_s19, 16, %s694_s17, [#allocation7]  }
  0x60   : > { %p3201_p1 = pnand %p3200_p8, %p3194_p2 }
  0x62   : > { %3204 = shalt.err (!%p3201_p1)
}
  0x63   : > { %s4180_s18 = sld [smem:[#allocation44_spill]]  ;;  %s3406_s17 = smov [#allocation14]  }
  0x64   : > { %s739_s25 = sshll.u32 %s3406_s17, 4  ;;  %s3407_s20 = smov [#allocation15]   ;;  %s740_s25 = int_to_ptr.vmem [resolvable:$true] %s739_s25 }
  0x65   : > { %s753_s21 = sshll.u32 %s3407_s20, 4  ;;  %s3216_s10 = scalar_lea.vmem %s740_s25, 16  ;;  %s754_s21 = int_to_ptr.vmem [resolvable:$true] %s753_s21 }
  0x66   : > { %p3217_p9 = scmp.ne.s32.totalorder %s740_s25, %s3216_s10  ;;  %s3223_s19 = scalar_lea.vmem %s740_s25, 32 }
  0x67   : > { %p3224_p10 = scmp.lt.s32.totalorder %s740_s25, %s740_s25  ;;  %p3225_p11 = scmp.lt.s32.totalorder %s3223_s19, %s3216_s10 }
  0x68   : > { %p3219_p3 = pnand %p3217_p9, %p3603_p6 }
  0x69   : > { %2882 = dma.hbm_to_vmem [thread:$0]  (!%p3597_p5), %s4180_s18, 384, %s715_s7, [#allocation10], %s3402_s1, %s3402_s1, %s3403_s24  }
  0x6a   : > { %p3220_p1 = pneg %p3219_p3  ;;  %p3226_p12 = por %p3225_p11, %p3224_p10 }
  0x6c   : > { %p3227_p13 = pnand %p3226_p12, %p3220_p1 }
  0x6e   : > { %3230 = shalt.err (!%p3227_p13)
}
  0x6f   : > { %s4181_s9 = sld [smem:[#allocation46_spill]]  ;;  %s3242_s24 = scalar_lea.vmem %s754_s21, 16 }
  0x70   : > { %p3243_p0 = scmp.ne.s32.totalorder %s754_s21, %s3242_s24  ;;  %s3249_s7 = scalar_lea.vmem %s754_s21, 32 }
  0x71   : > { %p3250_p4 = scmp.lt.s32.totalorder %s754_s21, %s754_s21  ;;  %p3251_p8 = scmp.lt.s32.totalorder %s3249_s7, %s3242_s24 }
  0x72   : > { %p3245_p2 = pnand %p3243_p0, %p3603_p6 }
  0x73   : > { %p3252_p9 = por %p3251_p8, %p3250_p4 }
  0x74   : > { %p3246_p7 = pneg %p3245_p2 }
  0x75   : > { %2888 = dma.hbm_to_vmem [thread:$0]  (!%p3597_p5), %s4181_s9, 16, %s740_s25, [#allocation13]  }
  0x76   : > { %p3253_p3 = pnand %p3252_p9, %p3246_p7 }
  0x78   : > { %3256 = shalt.err (!%p3253_p3)
}
  0x79   : > { %s4182_s11 = sld [smem:[#allocation48_spill]]  ;;  %s2585_s23 = sadd.s32 4294967294, %s3397_s0  }
  0x7a   : > { %s53_s4 = sadd.s32 1, %s3389_s2  ;;  %s56_s18 = sadd.s32 1, %s3393_s29 }
  0x7b   : > { %p54_p6 = scmp.ge.s32.totalorder %s53_s4, 2  ;;  %s89_s17 = sadd.s32 1, %s3377_s27 }
  0x7c   : > { %p96_p1 = scmp.ne.s32.totalorder %s3377_s27, %s3373_s26  ;;  %p97_p10 = scmp.eq.s32.totalorder %s3397_s0, 0 }
  0x7d   : > { %s4237_s4 = smov (%p54_p6, %s53_s4), 0  ;;  %s4239_s18 = smov (!%p54_p6, %s56_s18), %s3393_s29 }
  0x7e   : > { %4183 = sst [smem:[#allocation31_spill]] %s4237_s4  ;;  %p58_p11 = scmp.ge.s32.totalorder %s4239_s18, 2 }
  0x7f   : > { %2891 = dma.hbm_to_vmem [thread:$0]  (!%p3597_p5), %s4182_s11, 16, %s754_s21, [#allocation16]  }
  0x80   : > { %p102_p5 = scmp.ne.s32.totalorder %s3373_s26, %s3369_s5  ;;  %s4184_s25 = sadd.s32 4294967295, %s3397_s0  }
  0x81   : > { %p648_p12 = scmp.eq.s32.totalorder %s4184_s25, 3  ;;  %p4185_p13 = scmp.ne.s32.totalorder %s4172_s30, 0 }
  0x82   : > { %p654_p2 = scmp.eq.s32.totalorder %s2585_s23, 3  ;;  %s4241_s18 = smov (%p58_p11, %s4239_s18), 0 }
  0x83   : > { %p3678_p0 = por %p4185_p13, %p102_p5  ;;  %4187 = sst [smem:[#allocation32_spill]] %s4241_s18 }
  0x84   : > { %p3687_p7 = por %p648_p12, %p96_p1  ;;  %p3691_p4 = por %p654_p2, %p102_p5 }
  0x85   : > { %s86_s19 = ssub.s32 %s3393_s29, %s4241_s18  ;;  %p98_p8 = por %p97_p10, %p96_p1 }
  0x86   : > { %s4188_s21 = scalar_select %p3687_p7, 1, 0 }
  0x87   : > { %s4190_s10 = scalar_select %p3691_p4, 1, 0 }
  0x88   : > { %4189 = sst [smem:[#allocation33_spill]] %s4188_s21  ;;  %p87_p9 = scmp.eq.s32.totalorder %s86_s19, 0 }
  0x89   : > { %4191 = sst [smem:[#allocation34_spill]] %s4190_s10  ;;  %s773_s22 = sand.u32 1, %s3377_s27  }
  0x8a   : > { %p2907_p3 = scmp.lt.s32.totalorder %s3397_s0, 4  ;;  %s2595_s24 = sshll.u32 %s3393_s29, 4 }
  0x8b   : > { %s3703_s1 = scalar_select %p87_p9, %s3377_s27, %s89_s17  }
  0x8c   : > { %s776_s7 = scalar_lea.vmem [#allocation3], %s773_s22  ;;  %s4193_s25 = sld [smem:[#allocation38_spill]] }
  0x8d   : > { %4192 = sst [smem:[#allocation35_spill]] %s3703_s1  ;;  %s783_s8 = sshll.u32 %s776_s7, 4  ;;  %s784_s8 = int_to_ptr.vmem [resolvable:$true] %s783_s8 }
  0x8e   : > { %p3709_p6 = pnand %p2907_p3, %p98_p8  ;;  %s774_s18 = scalar_lea.sflag [#allocation4], %s773_s22 }
  0x8f   : > { %s3270_s19 = scalar_lea.vmem %s784_s8, 16  ;;  %s3408_s17 = smov [#allocation3]  }
  0x90   : > { %p3259_p1 = pneg %p3709_p6  ;;  %p3271_p10 = scmp.ne.s32.totalorder %s784_s8, %s3270_s19 }
  0x91   : > { %s3275_s4 = sshll.u32 %s3408_s17, 4  ;;  %s3276_s4 = int_to_ptr.vmem [resolvable:$false] %s3275_s4 }
  0x92   : > { %s781_s9 = scalar_lea.hbm %s4193_s25, %s2595_s24  ;;  %p3273_p5 = pnand %p3271_p10, %p3259_p1 }
  0x93   : > { %s3277_s7 = scalar_lea.vmem %s3276_s4, 32  ;;  %p3278_p12 = scmp.lt.s32.totalorder %s784_s8, %s3276_s4 }
  0x94   : > { %p3274_p11 = pneg %p3273_p5  ;;  %p3279_p13 = scmp.lt.s32.totalorder %s3277_s7, %s3270_s19 }
  0x96   : > { %p3280_p2 = por %p3279_p13, %p3278_p12 }
  0x98   : > { %p3281_p9 = pnand %p3280_p2, %p3274_p11 }
  0x9a   : > { %3284 = shalt.err (!%p3281_p9)
}
  0x9b   : > { %2895 = dma.hbm_to_vmem [thread:$0]  (!%p3709_p6), %s781_s9, 16, %s784_s8, %s774_s18  }
  0x9c   : > { %p4195_p8 = scmp.ne.s32.totalorder %s4173_s3, 0 }
  0x9e   : > { %872 = sbr.rel (%p4195_p8) target bundleno = 3831 (0xef7), region = 116 }
  0xa3   : > { %s3720_s22 = sand.u32 1, %s3373_s26  }
  0xa4   : > { %s875_s24 = scalar_lea.sflag [#allocation4], %s3720_s22 }
  0xa5   : > { %3344 = dma.done.wait (%p3678_p0), %s875_s24, 16  }
  0xa6   : > { %3346 = vsyncadd (%p3678_p0), %s875_s24, 4294967280  ;;  %p4196_p3 = scmp.ne.s32.totalorder %s4172_s30, 0 }
  0xa8   : > { %3348 = dma.done.wait (%p4196_p3), [#allocation7], 400  }
  0xa9   : > { %3350 = vsyncadd (%p4196_p3), [#allocation7], 4294966896 }
  0xaa   : > { %3352 = dma.done.wait (%p4196_p3), [#allocation10], 400  }
  0xab   : > { %3354 = vsyncadd (%p4196_p3), [#allocation10], 4294966896 }
  0xac   : > { %3356 = dma.done.wait (%p4196_p3), [#allocation13], 32  }
  0xad   : > { %3358 = vsyncadd (%p4196_p3), [#allocation13], 4294967264 }
  0xae   : > { %3360 = dma.done.wait (%p4196_p3), [#allocation16], 16  }
  0xaf   : > { %3362 = vsyncadd (%p4196_p3), [#allocation16], 4294967280  ;;  %s2837_s9 = smul.u32 12, %s3720_s22  ;;  %p1024_p0 = scmp.lt.s32.totalorder %s3381_s28, 1 }
  0xb0   : > { %s1018_s11 = smul.u32 3, %s3385_s6  ;;  %s4197_s24 = sld [smem:[#allocation37_spill]] }
  0xb1   : > { %s3748_s3 = scalar_select %p1024_p0, %s3381_s28, 1 }
  0xb2   : > { %p1019_p6 = scmp.lt.s32.totalorder %s1018_s11, 5  ;;  %s4198_s14 = sld [smem:[#allocation49_spill]] }
  0xb3   : > { %s2674_s19 = sshll.u32 %s3748_s3, 4  ;;  %s4199_s20 = sld [smem:[#allocation50_spill]] }
  0xb4   : > { %s4243_s11 = smov (!%p1019_p6, %s1018_s11), 5  ;;  %s4204_s30 = sld [smem:[#allocation54_spill]] }
  0xb5   : > { %s2604_s25 = sshll.u32 %s4243_s11, 2  ;;  %s4206_s11 = sld [smem:[#allocation56_spill]] }
  0xb6   : > { %s3762_s16 = scalar_lea.vmem %s4197_s24, %s2604_s25  ;;  %s4202_s24 = sld [smem:[#allocation52_spill]] }
  0xb7   : > { %p2613_p1 = scmp.ne.s32.totalorder %s3381_s28, 0 }
  0xb8   : > { %s3767_s1 = scalar_lea.vmem %s4198_s14, %s2674_s19  ;;  %s4203_s14 = sld [smem:[#allocation53_spill]] }
  0xb9   : > { %s3776_s8 = scalar_lea.vmem %s4199_s20, %s2674_s19  ;;  %s4205_s20 = sld [smem:[#allocation55_spill]] }
  0xba   : > { %4200 = sst [smem:[#allocation36_spill]] %s3776_s8  ;;  %s3793_s4 = scalar_lea.vmem %s4204_s30, %s2674_s19 }
  0xbb   : > { %s2677_s8 = sshll.u32 %s3748_s3, 5  ;;  %s4208_s29 = sld [smem:[#allocation40_spill]] (!%p2613_p1) }
  0xbc   : > { %s1048_s5 = scalar_lea.vmem %s4202_s24, %s3748_s3  ;;  %s3803_s17 = scalar_lea.vmem %s4206_s11, %s2677_s8 }
  0xbd   : > { %s4207_s24 = sld [smem:[#allocation57_spill]] }
  0xbe   : > { %s1051_s0 = scalar_lea.vmem %s4203_s14, %s3748_s3  ;;  %s3809_s14 = scalar_lea.vmem [#allocation17], %s2837_s9 }
  0xbf   : > { %s1059_s6 = scalar_lea.vmem %s4205_s20, %s3748_s3  ;;  %1073 = sbr.rel (%p2613_p1) target bundleno = 742 (0x2e6), region = 152 }
  0xc1   : > { %s4209_s30 = smov (!%p2613_p1), %s4208_s29 }
  0xc3   : > { %s1067_s2 = scalar_lea.vmem %s4207_s24, %s3748_s3 }
  0xc4   : > { %v2994_v0 = vld [vmem:[%s4208_s29 + $0x38] sm:$0xff]   ;;  %v2995_v1 = vld [vmem:[%s4209_s30 + $0x30] sm:$0xff]   ;;  %v2996_v2 = vld [vmem:[%s4209_s30 + $0x28] sm:$0xff]   ;;  %vm1207_vm0 = vcmask 261120  }
  0xc5   : > { %2735 = vmatprep.subr.bf16.mxu0 %v2994_v0  ;;  %v2997_v3 = vld [vmem:[%s4209_s30 + $0x20] sm:$0xff]   ;;  %v2998_v5 = vld [vmem:[%s4209_s30 + $0x18] sm:$0xff]   ;;  %v2999_v6 = vld [vmem:[%s4209_s30 + $0x10] sm:$0xff]  }
  0xc6   : > { %2736 = vmatpush3.bf16.msra.mxu0 %v2994_v0  ;;  %v3002_v4 = vld [vmem:[%s3762_s16] sm:$0xff]   ;;  %v3000_v7 = vld [vmem:[%s4209_s30 + $0x8] sm:$0xff]   ;;  %v2624_v48 = vld [vmem:[#allocation8] ss:$0 sm:$0xff] }
  0xc7   : > { %2737 = vmatprep.subr.bf16.mxu0 %v2995_v1  ;;  %2751 = vmatprep.mubr.bf16.mxu0 %v3002_v4  ;;  %v3001_v8 = vld [vmem:[%s4209_s30] sm:$0xff]   ;;  %v3003_v9 = vld [vmem:[%s3762_s16 + $0x8] ss:$0 sps:$4 sm:$0xff]   ;;  %v1201_v10 = vld [vmem:[#allocation6 + $0x10] sm:$0xff] }
  0xc8   : > { %v1199_v12 = vld [vmem:[#allocation6] sm:$0xff]  ;;  %v1200_v18 = vld [vmem:[#allocation6 + $0x8] sm:$0xff]  ;;  %v2625_v50 = vld [vmem:[#allocation9] ss:$0 sm:$0xff] }
  0xc9   : > { %v1266_v53 = vld [vmem:[#allocation11] sm:$0xff]  ;;  %v1268_v60 = vld [vmem:[#allocation11 + $0x10] sm:$0xff]  ;;  %v1267_v63 = vld [vmem:[#allocation11 + $0x8] sm:$0xff] }
  0xca   : > { %2738 = vmatpush3.bf16.msra.mxu0 %v2995_v1 }
  0xcb   : > { %2739 = vmatprep.subr.bf16.mxu0 %v2996_v2 }
  0xce   : > { %2740 = vmatpush3.bf16.msra.mxu0 %v2996_v2 }
  0xcf   : > { %2741 = vmatprep.subr.bf16.mxu0 %v2997_v3 }
  0xd2   : > { %2742 = vmatpush3.bf16.msra.mxu0 %v2997_v3 }
  0xd3   : > { %2743 = vmatprep.subr.bf16.mxu0 %v2998_v5 }
  0xd6   : > { %2744 = vmatpush3.bf16.msra.mxu0 %v2998_v5 }
  0xd7   : > { %2745 = vmatprep.subr.bf16.mxu0 %v2999_v6 }
  0xda   : > { %2746 = vmatpush3.bf16.msra.mxu0 %v2999_v6 }
  0xdb   : > { %2747 = vmatprep.subr.bf16.mxu0 %v3000_v7 }
  0xde   : > { %2748 = vmatpush3.bf16.msra.mxu0 %v3000_v7 }
  0xdf   : > { %2749 = vmatprep.subr.bf16.mxu0 %v3001_v8 }
  0xe2   : > { %2750 = vmatpush3.bf16.msra.mxu0 %v3001_v8 }
  0xe5   : > { %2752 = vmatmul.mubr.bf16.vlgmr.msra.gmra.mxu0 %v3003_v9 }
 0x1a5   : > { %v2753_v11 = vpop.f32.mrf.mxu0 }
 0x1a6   : > { %v1204_v13 = vadd.f32 %v2753_v11, %v1201_v10 }
 0x1a7   : > { %v1185_v14 = vpop.f32.mrf.mxu0 }
 0x1a8   : > { %v1202_v15 = vadd.f32 %v1199_v12, %v1185_v14  ;;  %v1214_v16 = vsel %vm1207_vm0, %v1204_v13, 0.0 }
 0x1a9   : > { %1215 = vadd.xlane.f32.xlu1 %v1214_v16  ;;  %v2754_v17 = vpop.f32.mrf.mxu0 }
 0x1aa   : > { %v1208_v19 = vsel %vm1207_vm0, %v1202_v15, 0.0 }
 0x1ab   : > { %1209 = vadd.xlane.f32.xlu0 %v1208_v19  ;;  %v1188_v20 = vpop.f32.mrf.mxu0 }
 0x1ac   : > { %v1203_v21 = vadd.f32 %v1200_v18, %v1188_v20 }
 0x1ae   : > { %v1211_v22 = vsel %vm1207_vm0, %v1203_v21, 0.0 }
 0x1af   : > { %1212 = vadd.xlane.f32.xlu0 %v1211_v22 }
 0x232   : > { %v1216_v23 = vpop.xlane.xlu1 %1215 }
 0x233   : > { %v1220_v24 = vmul.f32 0.03125, %v1216_v23 }
 0x234   : > { %v1210_v25 = vpop.xlane.xlu0 %1209 }
 0x235   : > { %v1218_v26 = vmul.f32 0.03125, %v1210_v25  ;;  %v1223_v27 = vsub.f32 %v1204_v13, %v1220_v24 }
 0x237   : > { %v1221_v28 = vsub.f32 %v1202_v15, %v1218_v26  ;;  %v1226_v34 = vmul.f32 %v1223_v27, %v1223_v27 }
 0x238   : > { %v1213_v29 = vpop.xlane.xlu0 %1212 }
 0x239   : > { %v1219_v30 = vmul.f32 0.03125, %v1213_v29  ;;  %v1224_v31 = vmul.f32 %v1221_v28, %v1221_v28  ;;  %v1233_v36 = vsel %vm1207_vm0, %v1226_v34, 0.0 }
 0x23b   : > { %v1222_v32 = vsub.f32 %v1203_v21, %v1219_v30  ;;  %v1227_v33 = vsel %vm1207_vm0, %v1224_v31, 0.0 }
 0x23c   : > { %1228 = vadd.xlane.f32.xlu1 %v1227_v33 }
 0x23d   : > { %v1225_v35 = vmul.f32 %v1222_v32, %v1222_v32 }
 0x23f   : > { %v1230_v37 = vsel %vm1207_vm0, %v1225_v35, 0.0 }
 0x240   : > { %1234 = vadd.xlane.f32.xlu1 %v1233_v36  ;;  %1231 = vadd.xlane.f32.xlu0 %v1230_v37 }
 0x2c5   : > { %v1229_v38 = vpop.xlane.xlu1 %1228 }
 0x2c6   : > { %v1236_v39 = vmul.f32 0.03125, %v1229_v38 }
 0x2c8   : > { %v1239_v40 = vadd.f32 1e-05, %v1236_v39 }
 0x2c9   : > { %v1235_v41 = vpop.xlane.xlu1 %1234  ;;  %v1232_v42 = vpop.xlane.xlu0 %1231 }
 0x2ca   : > { %3004 = vrsqrt.f32 %v1239_v40  ;;  %v1238_v43 = vmul.f32 0.03125, %v1235_v41  ;;  %v1237_v44 = vmul.f32 0.03125, %v1232_v42 }
 0x2cc   : > { %v1241_v45 = vadd.f32 1e-05, %v1238_v43  ;;  %v1240_v46 = vadd.f32 1e-05, %v1237_v44 }
 0x2ce   : > { %3006 = vrsqrt.f32 %v1241_v45 }
 0x2cf   : > { %3008 = vrsqrt.f32 %v1240_v46 }
 0x2d7   : > { %v3005_v47 = vpop.eup %3004 }
 0x2d8   : > { %v1245_v49 = vmul.f32 %v3005_v47, %v1221_v28 }
 0x2da   : > { %v1254_v51 = vmul.f32 %v2624_v48, %v1245_v49 }
 0x2db   : > { %v3007_v52 = vpop.eup %3006 }
 0x2dc   : > { %v3009_v54 = vpop.eup %3008  ;;  %v1263_v55 = vadd.f32 %v2625_v50, %v1254_v51  ;;  %v1247_v56 = vmul.f32 %v3007_v52, %v1223_v27 }
 0x2dd   : > { %v1246_v57 = vmul.f32 %v3009_v54, %v1222_v32 }
 0x2de   : > { %v1269_v58 = vadd.f32 %v1266_v53, %v1263_v55  ;;  %v1256_v59 = vmul.f32 %v2624_v48, %v1247_v56 }
 0x2df   : > { %v1255_v61 = vmul.f32 %v2624_v48, %v1246_v57 }
 0x2e0   : > { %1272 = vst.msk [vmem:[#allocation2] sm:$0xff] %vm1207_vm0, %v1269_v58  ;;  %v1265_v62 = vadd.f32 %v2625_v50, %v1256_v59 }
 0x2e1   : > { %v1264_v0 = vadd.f32 %v2625_v50, %v1255_v61 }
 0x2e2   : > { %v1271_v1 = vadd.f32 %v1268_v60, %v1265_v62 }
 0x2e3   : > { %v1270_v2 = vadd.f32 %v1267_v63, %v1264_v0 }
 0x2e4   : > { %1274 = vst.msk [vmem:[#allocation2 + $0x10] sm:$0xff] %vm1207_vm0, %v1271_v1 }
 0x2e5   : > { %1273 = vst.msk [vmem:[#allocation2 + $0x8] sm:$0xff] %vm1207_vm0, %v1270_v2 }
 0x2e6 PF: > { %vm1295_vm1 = vcmask 261120   ;;  %v3015_v24 = vld [vmem:[%s3767_s1 + $0x8] sm:$0xff]   ;;  %v3016_v25 = vld [vmem:[%s3767_s1] sm:$0xff]   ;;  %s4210_s29 = scalar_lea.vmem %s4109_s12, %s3748_s3  ;;  %s4211_s8 = scalar_lea.vmem %s4110_s13, %s3748_s3  ;;  %vm1456_vm2 = vcmask 130048   ;;  %vm1587_vm3 = vcmask 195584   ;;  %vm1669_vm4 = vcmask 1043456  }
 0x2e7   : > { %v3847_v3 = vld [vmem:[#allocation2] sm:$0xff]  ;;  %2755 = vmatprep.subr.bf16.mxu0 %v3015_v24  ;;  %s4212_s20 = scalar_lea.vmem %s4112_s15, %s3748_s3  ;;  %s3409_s23 = smov 112   ;;  %vm2062_vm5 = vcmask 523264  }
 0x2e8   : > { %v1296_v6 = vsel %vm1295_vm1, %v3847_v3, 0.0  ;;  %2756 = vmatpush3.bf16.msra.mxu0 %v3015_v24  ;;  %v2626_v37 = vld [vmem:[%s4210_s29] ss:$0 sm:$0xff]  ;;  %s3410_s10 = smov 96   ;;  %s4213_s11 = scalar_lea.vmem [#allocation3], %s3720_s22 }
 0x2e9   : > { %1297 = vadd.xlane.f32.xlu0 %v1296_v6  ;;  %2757 = vmatprep.subr.bf16.mxu0 %v3016_v25  ;;  %v2627_v43 = vld [vmem:[%s4211_s8] ss:$0 sm:$0xff]  ;;  %s4214_s24 = sld [smem:[#allocation39_spill]]  ;;  %s3411_s29 = smov 64  }
 0x2ea   : > { %v2628_v51 = vld [vmem:[%s4212_s20] ss:$0 sm:$0xff]  ;;  %s4215_s27 = sld [smem:[#allocation36_spill]]  ;;  %s3412_s26 = smov 16  }
 0x2eb   : > { %v3849_v4 = vld [vmem:[#allocation2 + $0x10] sm:$0xff]  ;;  %s4216_s9 = sld [smem:[#allocation51_spill]]  ;;  %p2660_p10 = scmp.ne.s32.totalorder %s3381_s28, 1 }
 0x2ec   : > { %v3851_v5 = vld [vmem:[#allocation2 + $0x8] sm:$0xff]  ;;  %v1302_v7 = vsel %vm1295_vm1, %v3849_v4, 0.0  ;;  %2758 = vmatpush3.bf16.msra.mxu0 %v3016_v25 }
 0x2ed   : > { %v1299_v8 = vsel %vm1295_vm1, %v3851_v5, 0.0  ;;  %1303 = vadd.xlane.f32.xlu1 %v1302_v7 }
 0x2ee   : > { %1300 = vadd.xlane.f32.xlu0 %v1299_v8 }
 0x2ef   : > { %v1280_v25 = vld [vmem:[%s4214_s24 + $0x10] sm:$0xff] }
 0x2f1   : > { %s4217_s20 = scalar_lea.vmem %s4216_s9, %s3748_s3  ;;  %s4222_s3 = sld [smem:[#allocation47_spill]] (!%p2660_p10) }
 0x372   : > { %v1298_v9 = vpop.xlane.xlu0 %1297 }
 0x373   : > { %v1306_v11 = vmul.f32 0.03125, %v1298_v9 }
 0x375   : > { %v1309_v13 = vsub.f32 %v3847_v3, %v1306_v11 }
 0x376   : > { %v1304_v10 = vpop.xlane.xlu1 %1303 }
 0x377   : > { %v1308_v12 = vmul.f32 0.03125, %v1304_v10  ;;  %v1301_v15 = vpop.xlane.xlu0 %1300  ;;  %v1312_v17 = vmul.f32 %v1309_v13, %v1309_v13 }
 0x378   : > { %v1307_v16 = vmul.f32 0.03125, %v1301_v15 }
 0x379   : > { %v1311_v14 = vsub.f32 %v3849_v4, %v1308_v12  ;;  %v1315_v20 = vsel %vm1295_vm1, %v1312_v17, 0.0  ;;  %v1282_v17 = vlaneseq }
 0x37a   : > { %v1310_v19 = vsub.f32 %v3851_v5, %v1307_v16  ;;  %1316 = vadd.xlane.f32.xlu1 %v1315_v20 }
 0x37b   : > { %v1314_v18 = vmul.f32 %v1311_v14, %v1311_v14  ;;  %v1283_v20 = vshrl.u32 %v1282_v17, 7 }
 0x37c   : > { %v1313_v22 = vmul.f32 %v1310_v19, %v1310_v19 }
 0x37d   : > { %v1321_v21 = vsel %vm1295_vm1, %v1314_v18, 0.0  ;;  %v1275_v18 = vld [vmem:[%s4213_s11] sm:$0x1] }
 0x37e   : > { %v1318_v23 = vsel %vm1295_vm1, %v1313_v22, 0.0  ;;  %1322 = vadd.xlane.f32.xlu1 %v1321_v21  ;;  %v1284_v22 = vsub.s32 0, %v1283_v20 }
 0x37f   : > { %1319 = vadd.xlane.f32.xlu0 %v1318_v23  ;;  %v1278_v23 = vld [vmem:[%s4214_s24] sm:$0xff] }
 0x403   : > { %v1317_v26 = vpop.xlane.xlu1 %1316 }
 0x404   : > { %v1324_v27 = vmul.f32 0.03125, %v1317_v26 }
 0x406   : > { %v1327_v28 = vadd.f32 1e-05, %v1324_v27 }
 0x407   : > { %v1323_v29 = vpop.xlane.xlu1 %1322 }
 0x408   : > { %v1320_v30 = vpop.xlane.xlu0 %1319  ;;  %3025 = vrsqrt.f32 %v1327_v28  ;;  %v1326_v31 = vmul.f32 0.03125, %v1323_v29  ;;  %v1279_v28 = vld [vmem:[%s4214_s24 + $0x8] sm:$0xff] }
 0x409   : > { %v1325_v32 = vmul.f32 0.03125, %v1320_v30 }
 0x40a   : > { %v1329_v33 = vadd.f32 1e-05, %v1326_v31 }
 0x40b   : > { %v1328_v34 = vadd.f32 1e-05, %v1325_v32 }
 0x40c   : > { %3027 = vrsqrt.f32 %v1329_v33 }
 0x40d   : > { %3029 = vrsqrt.f32 %v1328_v34 }
 0x415   : > { %v3026_v35 = vpop.eup %3025 }
 0x416   : > { %v1333_v36 = vmul.f32 %v3026_v35, %v1309_v13 }
 0x418   : > { %v1342_v42 = vmul.f32 %v2626_v37, %v1333_v36 }
 0x419   : > { %v3028_v38 = vpop.eup %3027 }
 0x41a   : > { %v3030_v39 = vpop.eup %3029  ;;  %v1335_v40 = vmul.f32 %v3028_v38, %v1311_v14  ;;  %v1351_v47 = vadd.f32 %v2627_v43, %v1342_v42 }
 0x41b   : > { %v1334_v41 = vmul.f32 %v3030_v39, %v1310_v19  ;;  %v1276_v19 = vsub.f32 1.0, %v1275_v18 }
 0x41c   : > { %v1344_v44 = vmul.f32 %v2626_v37, %v1335_v40 }
 0x41d   : > { %v1343_v45 = vmul.f32 %v2626_v37, %v1334_v41  ;;  %v1277_v21 = vmul.f32 -10000.0, %v1276_v19 }
 0x41e   : > { %v1353_v46 = vadd.f32 %v2627_v43, %v1344_v44 }
 0x41f   : > { %v1352_v48 = vadd.f32 %v2627_v43, %v1343_v45  ;;  %v1285_v24 = vrot.slane %v1277_v21, %v1284_v22 }
 0x420   : > { %v1355_v49 = vpack.c.bf16 %v1353_v46, %v1353_v46 }
 0x421   : > { %v1354_v50 = vpack.c.bf16 %v1352_v48, %v1351_v47  ;;  %v1287_v26 = vadd.f32 %v1285_v24, %v1278_v23  ;;  %v1289_v29 = vadd.f32 %v1285_v24, %v1280_v25  ;;  %v1288_v32 = vadd.f32 %v1285_v24, %v1279_v28 }
 0x423   : > { %2759 = vmatprep.mubr.msk.bf16.mxu0 %vm1295_vm1, %v1354_v50 }
 0x424   : > { %2760 = vmatmul.mubr.msk.bf16.vlgmr.msra.gmra.mxu0 %vm1295_vm1, %v1355_v49 }
 0x4e4   : > { %v2761_v52 = vpop.f32.mrf.mxu0 }
 0x4e5   : > { %v1428_v53 = vadd.f32 %v2761_v52, %v2628_v51 }
 0x4e6   : > { %v1419_v54 = vpop.f32.mrf.mxu0 }
 0x4e7   : > { %v3884_v55 = vpack.c.bf16 %v1428_v53, %v1428_v53  ;;  %v1420_v57 = vadd.f32 %v2628_v51, %v1419_v54  ;;  %v1435_v1 = vmul.f32 0.25, %v1428_v53 }
 0x4e8   : > { %v2762_v56 = vpop.f32.mrf.mxu0 }
 0x4e9   : > { %1450 = vrot.lane.b32.xlu0 %v3884_v55, %s3409_s23  ;;  %v1433_v60 = vmul.f32 0.25, %v1420_v57  ;;  %v1437_v7 = vpack.c.bf16 %v1435_v1, %v1435_v1 }
 0x4ea   : > { %v1422_v58 = vpop.f32.mrf.mxu0 }
 0x4eb   : > { %v1423_v59 = vadd.f32 %v2628_v51, %v1422_v58 }
 0x4ed   : > { %v1434_v61 = vmul.f32 0.25, %v1423_v59  ;;  %v3887_v62 = vpack.c.bf16 %v1423_v59, %v1420_v57 }
 0x4ef   : > { %1448 = vrot.lane.b32.xlu1 %v3887_v62, %s3409_s23  ;;  %v1436_v63 = vpack.c.bf16 %v1434_v61, %v1433_v60 }
 0x4f1   : > { %1440 = vrot.lane.b32.xlu0 %v1436_v63, %s3409_s23  ;;  %2767 = vmatprep.mubr.msk.bf16.mxu1 %vm1456_vm2, %v1436_v63 }
 0x4f5   : > { %1454 = vrot.lane.b32.xlu0 %v3884_v55, %s3410_s10 }
 0x55b   : > { %v3892_v0 = vpop.permute.xlu0 %1450 }
 0x55c   : > { %1519 = vrot.lane.b32.xlu1 %v3892_v0, %s3410_s10 }
 0x561   : > { %v3895_v2 = vpop.permute.xlu1 %1448 }
 0x562   : > { %1517 = vrot.lane.b32.xlu1 %v3895_v2, %s3410_s10 }
 0x563   : > { %v1441_v6 = vpop.permute.xlu0 %1440 }
 0x564   : > { %2775 = vmatprep.mubr.msk.bf16.mxu0 %vm1456_vm2, %v1441_v6 }
 0x566   : > { %1442 = vrot.lane.b32.xlu1 %v1437_v7, %s3409_s23 }
 0x567   : > { %v1455_v8 = vpop.permute.xlu0 %1454 }
 0x568   : > { %2831 = vmatprep.subr.msk.bf16.mxu1 %vm1456_vm2, %v1455_v8  ;;  %v1467_v9 = vsel %vm1456_vm2, %v1455_v8, 0 }
 0x569   : > { %2764 = vmatpush3.bf16.xpose.msra.mxu1 %v1467_v9 }
 0x56a   : > { %1452 = vrot.lane.b32.xlu1 %v3887_v62, %s3410_s10 }
 0x5ce   : > { %v1520_v10 = vpop.permute.xlu1 %1519 }
 0x5cf   : > { %v1531_v11 = vsel %vm1456_vm2, %v1520_v10, 0  ;;  %2833 = vmatprep.subr.msk.bf16.mxu0 %vm1456_vm2, %v1520_v10 }
 0x5d0   : > { %2772 = vmatpush3.bf16.xpose.msra.mxu0 %v1531_v11 }
 0x5d4   : > { %v1518_v12 = vpop.permute.xlu1 %1517 }
 0x5d5   : > { %2834 = vmatprep.subr.msk.bf16.mxu0 %vm1456_vm2, %v1518_v12  ;;  %v1528_v13 = vsel %vm1456_vm2, %v1518_v12, 0 }
 0x5d8   : > { %2774 = vmatpush3.bf16.xpose.msra.mxu0 %v1528_v13  ;;  %v1443_v14 = vpop.permute.xlu1 %1442 }
 0x5dc   : > { %v1453_v15 = vpop.permute.xlu1 %1452 }
 0x5dd   : > { %2832 = vmatprep.subr.msk.bf16.mxu1 %vm1456_vm2, %v1453_v15  ;;  %v1464_v16 = vsel %vm1456_vm2, %v1453_v15, 0 }
 0x5de   : > { %2766 = vmatpush3.bf16.xpose.msra.mxu1 %v1464_v16 }
 0x5df   : > { %2776 = vmatmul.mubr.msk.bf16.vlgmr.msra.gmra.mxu0 %vm1456_vm2, %v1443_v14 }
 0x5e5   : > { %2768 = vmatmul.mubr.msk.bf16.vlgmr.msra.gmra.mxu1 %vm1456_vm2, %v1437_v7 }
 0x69f   : > { %v2777_v27 = vpop.f32.mrf.mxu0 }
 0x6a0   : > { %v1586_v34 = vadd.f32 %v2777_v27, %v1289_v29 }
 0x6a1   : > { %v1567_v30 = vpop.f32.mrf.mxu0 }
 0x6a2   : > { %v1584_v31 = vadd.f32 %v1567_v30, %v1287_v26  ;;  %v1603_v43 = vsel %vm1587_vm3, %v1586_v34, -inf }
 0x6a3   : > { %v2778_v33 = vpop.f32.mrf.mxu0 }
 0x6a4   : > { %v1597_v35 = vsel %vm1587_vm3, %v1584_v31, -inf }
 0x6a5   : > { %v2769_v36 = vpop.f32.mrf.mxu1  ;;  %v1570_v37 = vpop.f32.mrf.mxu0  ;;  %1598 = vmax.xlane.f32.xlu0 %v1597_v35 }
 0x6a6   : > { %v1585_v38 = vadd.f32 %v1570_v37, %v1288_v32  ;;  %v1583_v40 = vadd.f32 %v2769_v36, %v1289_v29 }
 0x6a7   : > { %v1503_v39 = vpop.f32.mrf.mxu1 }
 0x6a8   : > { %v1581_v41 = vadd.f32 %v1503_v39, %v1287_v26  ;;  %v1600_v42 = vsel %vm1587_vm3, %v1585_v38, -inf  ;;  %v1594_v47 = vsel %vm1587_vm3, %v1583_v40, -inf }
 0x6a9   : > { %v2770_v44 = vpop.f32.mrf.mxu1  ;;  %1601 = vmax.xlane.f32.xlu1 %v1600_v42  ;;  %1604 = vmax.xlane.f32.xlu0 %v1603_v43 }
 0x6aa   : > { %v1588_v48 = vsel %vm1587_vm3, %v1581_v41, -inf }
 0x6ab   : > { %v1506_v45 = vpop.f32.mrf.mxu1 }
 0x6ac   : > { %v1582_v46 = vadd.f32 %v1506_v45, %v1288_v32 }
 0x6ad   : > { %1595 = vmax.xlane.f32.xlu1 %v1594_v47  ;;  %1589 = vmax.xlane.f32.xlu0 %v1588_v48  ;;  %v3017_v48 = vld [vmem:[%s4215_s27 + $0x8] sm:$0xff]  }
 0x6ae   : > { %v1591_v49 = vsel %vm1587_vm3, %v1582_v46, -inf }
 0x6b1   : > { %1592 = vmax.xlane.f32.xlu0 %v1591_v49  ;;  %v3018_v49 = vld [vmem:[%s4215_s27] sm:$0xff]  }
 0x72e   : > { %v1599_v50 = vpop.xlane.xlu0 %1598 }
 0x72f   : > { %v1609_v51 = vsub.f32 %v1584_v31, %v1599_v50 }
 0x731   : > { %v1618_v59 = vmul.f32 1.442695, %v1609_v51 }
 0x732   : > { %v1602_v52 = vpop.xlane.xlu1 %1601  ;;  %v1605_v53 = vpop.xlane.xlu0 %1604 }
 0x733   : > { %v1610_v54 = vsub.f32 %v1585_v38, %v1602_v52  ;;  %v1611_v56 = vsub.f32 %v1586_v34, %v1605_v53 }
 0x735   : > { %v1620_v57 = vmul.f32 1.442695, %v1610_v54  ;;  %v1622_v58 = vmul.f32 1.442695, %v1611_v56 }
 0x736   : > { %v1590_v8 = vpop.xlane.xlu0 %1589  ;;  %v1596_v10 = vpop.xlane.xlu1 %1595 }
 0x737   : > { %3031 = vpow2.f32 %v1620_v57  ;;  %v1606_v9 = vsub.f32 %v1581_v41, %v1590_v8  ;;  %v1608_v12 = vsub.f32 %v1583_v40, %v1596_v10 }
 0x738   : > { %3033 = vpow2.f32 %v1622_v58 }
 0x739   : > { %3035 = vpow2.f32 %v1618_v59  ;;  %v1612_v13 = vmul.f32 1.442695, %v1606_v9  ;;  %v1616_v15 = vmul.f32 1.442695, %v1608_v12  ;;  %v2641_v12 = vld [vmem:[%s4217_s20] ss:$0 sm:$0xff] }
 0x73a   : > { %v1593_v11 = vpop.xlane.xlu0 %1592 }
 0x73b   : > { %v1607_v14 = vsub.f32 %v1582_v46, %v1593_v11  ;;  %3037 = vpow2.f32 %v1612_v13 }
 0x73c   : > { %3039 = vpow2.f32 %v1616_v15 }
 0x73d   : > { %v1614_v16 = vmul.f32 1.442695, %v1607_v14 }
 0x73f   : > { %3041 = vpow2.f32 %v1614_v16 }
 0x744   : > { %v3032_v60 = vpop.eup %3031 }
 0x745   : > { %v3034_v61 = vpop.eup %3033  ;;  %v1636_v63 = vsel %vm1587_vm3, %v3032_v60, 0.0 }
 0x746   : > { %1637 = vadd.xlane.f32.xlu1 %v1636_v63  ;;  %v1639_v1 = vsel %vm1587_vm3, %v3034_v61, 0.0  ;;  %v3036_v6 = vpop.eup %3035 }
 0x747   : > { %1640 = vadd.xlane.f32.xlu0 %v1639_v1  ;;  %v1633_v7 = vsel %vm1587_vm3, %v3036_v6, 0.0 }
 0x748   : > { %v3038_v18 = vpop.eup %3037 }
 0x749   : > { %v1624_v19 = vsel %vm1587_vm3, %v3038_v18, 0.0  ;;  %v3040_v20 = vpop.eup %3039 }
 0x74a   : > { %v1630_v21 = vsel %vm1587_vm3, %v3040_v20, 0.0 }
 0x74b   : > { %1634 = vadd.xlane.f32.xlu0 %v1633_v7 }
 0x757   : > { %1723 = vrot.lane.b32.xlu1 %v3892_v0, %s3411_s29  ;;  %v3042_v0 = vpop.eup %3041 }
 0x761   : > { %1721 = vrot.lane.b32.xlu0 %v3895_v2, %s3411_s29  ;;  %v1627_v2 = vsel %vm1587_vm3, %v3042_v0, 0.0 }
 0x77b   : > { %1625 = vadd.xlane.f32.xlu1 %v1624_v19 }
 0x77f   : > { %1631 = vadd.xlane.f32.xlu1 %v1630_v21 }
 0x780   : > { %1628 = vadd.xlane.f32.xlu0 %v1627_v2 }
 0x790   : > { %1658 = vrot.lane.b32.xlu1 %v3887_v62, %s3411_s29 }
 0x796   : > { %1660 = vrot.lane.b32.xlu0 %v3884_v55, %s3411_s29 }
 0x7cf   : > { %v1638_v22 = vpop.xlane.xlu1 %1637 }
 0x7d0   : > { %v1641_v23 = vpop.xlane.xlu0 %1640 }
 0x7d1   : > { %3043 = vrcp.f32 %v1641_v23 }
 0x7d2   : > { %3045 = vrcp.f32 %v1638_v22 }
 0x7d3   : > { %v1724_v24 = vpop.permute.xlu1 %1723 }
 0x7d4   : > { %v1733_v25 = vsel %vm1669_vm4, %v1724_v24, 0  ;;  %v1635_v26 = vpop.xlane.xlu0 %1634  ;;  %2836 = vmatprep.subr.msk.bf16.mxu0 %vm1669_vm4, %v1724_v24 }
 0x7d5   : > { %3047 = vrcp.f32 %v1635_v26  ;;  %2788 = vmatpush3.bf16.msra.mxu0 %v1733_v25 }
 0x7d8   : > { %v1722_v27 = vpop.permute.xlu0 %1721 }
 0x7d9   : > { %2789 = vmatprep.subr.bf16.mxu0 %v1722_v27 }
 0x7da   : > { %2790 = vmatpush3.bf16.msra.mxu0 %v1722_v27 }
 0x7de   : > { %v3044_v62 = vpop.eup %3043 }
 0x7df   : > { %v3046_v28 = vpop.eup %3045  ;;  %v1653_v55 = vmul.f32 %v3044_v62, %v3034_v61 }
 0x7e0   : > { %v1652_v31 = vmul.f32 %v3046_v28, %v3032_v60 }
 0x7e1   : > { %v1657_v33 = vpack.c.bf16 %v1653_v55, %v1653_v55 }
 0x7e2   : > { %v3048_v29 = vpop.eup %3047 }
 0x7e3   : > { %v1651_v30 = vmul.f32 %v3048_v29, %v3036_v6 }
 0x7e5   : > { %v1656_v32 = vpack.c.bf16 %v1652_v31, %v1651_v30 }
 0x7e7   : > { %2791 = vmatprep.mubr.msk.bf16.mxu0 %vm1587_vm3, %v1656_v32 }
 0x7e8   : > { %2792 = vmatmul.mubr.msk.bf16.vlgmr.msra.gmra.mxu0 %vm1587_vm3, %v1657_v33 }
 0x804   : > { %v1626_v34 = vpop.xlane.xlu1 %1625 }
 0x805   : > { %3049 = vrcp.f32 %v1626_v34  ;;  %v3019_v34 = vld [vmem:[%s3793_s4 + $0x8] sm:$0xff]  }
 0x806   : > { %2803 = vmatprep.subr.bf16.mxu0 %v3019_v34 }
 0x807   : > { %2804 = vmatpush3.bf16.msra.mxu0 %v3019_v34 }
 0x808   : > { %v1632_v35 = vpop.xlane.xlu1 %1631 }
 0x809   : > { %3051 = vrcp.f32 %v1632_v35  ;;  %v1629_v36 = vpop.xlane.xlu0 %1628  ;;  %v3020_v35 = vld [vmem:[%s3793_s4] sm:$0xff]  }
 0x80a   : > { %3053 = vrcp.f32 %v1629_v36  ;;  %2805 = vmatprep.subr.bf16.mxu0 %v3020_v35  ;;  %v3021_v36 = vld [vmem:[%s3803_s17 + $0x18] sm:$0xff]  }
 0x80b   : > { %2806 = vmatpush3.bf16.msra.mxu0 %v3020_v35 }
 0x80c   : > { %v1659_v39 = vpop.permute.xlu1 %1658 }
 0x80d   : > { %v1661_v37 = vpop.permute.xlu0 %1660 }
 0x80e   : > { %v1671_v38 = vsel %vm1669_vm4, %v1661_v37, 0  ;;  %2835 = vmatprep.subr.msk.bf16.mxu1 %vm1669_vm4, %v1661_v37 }
 0x80f   : > { %2780 = vmatpush3.bf16.msra.mxu1 %v1671_v38 }
 0x810   : > { %2781 = vmatprep.subr.bf16.mxu1 %v1659_v39 }
 0x812   : > { %v3050_v40 = vpop.eup %3049 }
 0x813   : > { %2782 = vmatpush3.bf16.msra.mxu1 %v1659_v39  ;;  %v1648_v44 = vmul.f32 %v3050_v40, %v3038_v18 }
 0x814   : > { %2795 = vmatprep.subr.bf16.mxu1 %v3017_v48 }
 0x816   : > { %v3052_v41 = vpop.eup %3051 }
 0x817   : > { %v3054_v42 = vpop.eup %3053  ;;  %v1650_v43 = vmul.f32 %v3052_v41, %v3040_v20 }
 0x818   : > { %v1649_v45 = vmul.f32 %v3054_v42, %v3042_v0 }
 0x819   : > { %v1655_v46 = vpack.c.bf16 %v1650_v43, %v1650_v43 }
 0x81a   : > { %v1654_v47 = vpack.c.bf16 %v1649_v45, %v1648_v44 }
 0x81c   : > { %2783 = vmatprep.mubr.msk.bf16.mxu1 %vm1587_vm3, %v1654_v47 }
 0x81d   : > { %2784 = vmatmul.mubr.msk.bf16.vlgmr.msra.gmra.mxu1 %vm1587_vm3, %v1655_v46 }
 0x81e   : > { %2796 = vmatpush3.bf16.msra.mxu1 %v3017_v48  ;;  %v2646_v48 = vld [vmem:[%s1048_s5] ss:$0 sm:$0xff] }
 0x81f   : > { %2797 = vmatprep.subr.bf16.mxu1 %v3018_v49 }
 0x822   : > { %2798 = vmatpush3.bf16.msra.mxu1 %v3018_v49 }
 0x823   : > { %2811 = vmatprep.subr.bf16.mxu1 %v3021_v36 }
 0x8a8   : > { %v2793_v50 = vpop.f32.mrf.mxu0 }
 0x8aa   : > { %v1769_v51 = vpop.f32.mrf.mxu0 }
 0x8ac   : > { %v2794_v52 = vpop.f32.mrf.mxu0 }
 0x8ae   : > { %v1772_v53 = vpop.f32.mrf.mxu0 }
 0x8af   : > { %v3010_v54 = vpack.i.bf16 %v1772_v53, %v1769_v51 }
 0x8b1   : > { %3011 = vrot.lane.b32.xlu1 %v3010_v54, %s3412_s26  ;;  %v2647_v54 = vld [vmem:[%s1051_s0] ss:$0 sm:$0xff] }
 0x8b5   : > { %1790 = vrot.lane.b32.xlu1 %v2793_v50, %s3412_s26 }
 0x8dd   : > { %v2785_v56 = vpop.f32.mrf.mxu1 }
 0x8df   : > { %v1707_v57 = vpop.f32.mrf.mxu1 }
 0x8e1   : > { %v2786_v58 = vpop.f32.mrf.mxu1 }
 0x8e3   : > { %v1710_v63 = vpop.f32.mrf.mxu1 }
 0x923   : > { %v3012_v59 = vpop.permute.xlu1 %3011 }
 0x924   : > { %v3014_v60 = vunpack.i.h.bf16 %v3012_v59  ;;  %v3013_v61 = vunpack.i.l.bf16 %v3012_v59 }
 0x926   : > { %v1795_v1 = vsel %vm1456_vm2, %v1707_v57, %v3013_v61  ;;  %v1796_v6 = vsel %vm1456_vm2, %v1710_v63, %v3014_v60 }
 0x927   : > { %v1798_v7 = vpack.c.bf16 %v1796_v6, %v1795_v1  ;;  %v1791_v8 = vpop.permute.xlu1 %1790  ;;  %v3022_v1 = vld [vmem:[%s3803_s17 + $0x10] sm:$0xff]   ;;  %v3023_v6 = vld [vmem:[%s3803_s17 + $0x8] sm:$0xff]  }
 0x928   : > { %v1797_v9 = vsel %vm1456_vm2, %v2785_v56, %v1791_v8 }
 0x929   : > { %v1799_v10 = vpack.c.bf16 %v1797_v9, %v1797_v9  ;;  %2799 = vmatprep.mubr.msk.bf16.mxu1 %vm1295_vm1, %v1798_v7  ;;  %v3024_v7 = vld [vmem:[%s3803_s17] sm:$0xff]  }
 0x92a   : > { %v2648_v9 = vld [vmem:[%s1059_s6] ss:$0 sm:$0xff] }
 0x92b   : > { %2800 = vmatmul.mubr.msk.bf16.vlgmr.msra.gmra.mxu1 %vm1295_vm1, %v1799_v10 }
 0x92c   : > { %2812 = vmatpush3.bf16.msra.mxu1 %v3021_v36 }
 0x92d   : > { %2813 = vmatprep.subr.bf16.mxu1 %v3022_v1 }
 0x930   : > { %2814 = vmatpush3.bf16.msra.mxu1 %v3022_v1 }
 0x931   : > { %2815 = vmatprep.subr.bf16.mxu1 %v3023_v6 }
 0x934   : > { %2816 = vmatpush3.bf16.msra.mxu1 %v3023_v6 }
 0x935   : > { %2817 = vmatprep.subr.bf16.mxu1 %v3024_v7 }
 0x938   : > { %2818 = vmatpush3.bf16.msra.mxu1 %v3024_v7 }
 0x9eb   : > { %v2801_v11 = vpop.f32.mrf.mxu1 }
 0x9ec   : > { %v1872_v14 = vadd.f32 %v2801_v11, %v2641_v12 }
 0x9ed   : > { %v1863_v13 = vpop.f32.mrf.mxu1 }
 0x9ee   : > { %v1864_v15 = vadd.f32 %v2641_v12, %v1863_v13  ;;  %v3966_v20 = vadd.f32 %v1872_v14, %v3849_v4 }
 0x9ef   : > { %v2802_v16 = vpop.f32.mrf.mxu1 }
 0x9f0   : > { %v3963_v18 = vadd.f32 %v1864_v15, %v3847_v3  ;;  %v1888_v23 = vsel %vm1295_vm1, %v3966_v20, 0.0 }
 0x9f1   : > { %v1866_v19 = vpop.f32.mrf.mxu1 }
 0x9f2   : > { %v1867_v0 = vadd.f32 %v2641_v12, %v1866_v19  ;;  %v1882_v21 = vsel %vm1295_vm1, %v3963_v18, 0.0 }
 0x9f3   : > { %1883 = vadd.xlane.f32.xlu0 %v1882_v21 }
 0x9f4   : > { %v3971_v2 = vadd.f32 %v1867_v0, %v3851_v5 }
 0x9f6   : > { %v1885_v22 = vsel %vm1295_vm1, %v3971_v2, 0.0 }
 0x9f7   : > { %1886 = vadd.xlane.f32.xlu1 %v1885_v22  ;;  %1889 = vadd.xlane.f32.xlu0 %v1888_v23  ;;  %v2653_v23 = vld [vmem:[%s1067_s2] ss:$0 sm:$0xff] }
 0xa7c   : > { %v1884_v3 = vpop.xlane.xlu0 %1883 }
 0xa7d   : > { %v1891_v24 = vmul.f32 0.03125, %v1884_v3 }
 0xa7f   : > { %v1894_v4 = vsub.f32 %v3963_v18, %v1891_v24 }
 0xa80   : > { %v1887_v25 = vpop.xlane.xlu1 %1886  ;;  %v1890_v26 = vpop.xlane.xlu0 %1889 }
 0xa81   : > { %v1892_v27 = vmul.f32 0.03125, %v1887_v25  ;;  %v1893_v62 = vmul.f32 0.03125, %v1890_v26  ;;  %v1897_v5 = vmul.f32 %v1894_v4, %v1894_v4 }
 0xa83   : > { %v1895_v28 = vsub.f32 %v3971_v2, %v1892_v27  ;;  %v1896_v29 = vsub.f32 %v3966_v20, %v1893_v62  ;;  %v1900_v55 = vsel %vm1295_vm1, %v1897_v5, 0.0 }
 0xa84   : > { %1901 = vadd.xlane.f32.xlu0 %v1900_v55 }
 0xa85   : > { %v1898_v30 = vmul.f32 %v1895_v28, %v1895_v28  ;;  %v1899_v31 = vmul.f32 %v1896_v29, %v1896_v29 }
 0xa87   : > { %v1903_v32 = vsel %vm1295_vm1, %v1898_v30, 0.0  ;;  %v1906_v33 = vsel %vm1295_vm1, %v1899_v31, 0.0 }
 0xa88   : > { %1904 = vadd.xlane.f32.xlu0 %v1903_v32  ;;  %1907 = vadd.xlane.f32.xlu1 %v1906_v33 }
 0xb0d   : > { %v1902_v37 = vpop.xlane.xlu0 %1901 }
 0xb0e   : > { %v1909_v38 = vmul.f32 0.03125, %v1902_v37 }
 0xb10   : > { %v1912_v39 = vadd.f32 1e-05, %v1909_v38 }
 0xb11   : > { %v1908_v40 = vpop.xlane.xlu1 %1907  ;;  %v1905_v41 = vpop.xlane.xlu0 %1904 }
 0xb12   : > { %3055 = vrsqrt.f32 %v1912_v39  ;;  %v1911_v42 = vmul.f32 0.03125, %v1908_v40  ;;  %v1910_v43 = vmul.f32 0.03125, %v1905_v41 }
 0xb14   : > { %v1914_v44 = vadd.f32 1e-05, %v1911_v42  ;;  %v1913_v45 = vadd.f32 1e-05, %v1910_v43 }
 0xb16   : > { %3057 = vrsqrt.f32 %v1914_v44 }
 0xb17   : > { %3059 = vrsqrt.f32 %v1913_v45 }
 0xb1f   : > { %v3056_v46 = vpop.eup %3055 }
 0xb20   : > { %v1918_v47 = vmul.f32 %v3056_v46, %v1894_v4 }
 0xb22   : > { %v1927_v53 = vmul.f32 %v2646_v48, %v1918_v47 }
 0xb23   : > { %v3058_v49 = vpop.eup %3057 }
 0xb24   : > { %v3060_v50 = vpop.eup %3059  ;;  %v1920_v51 = vmul.f32 %v3058_v49, %v1896_v29  ;;  %v1936_v59 = vadd.f32 %v2647_v54, %v1927_v53 }
 0xb25   : > { %v1919_v52 = vmul.f32 %v3060_v50, %v1895_v28 }
 0xb26   : > { %v1929_v56 = vmul.f32 %v2646_v48, %v1920_v51 }
 0xb27   : > { %v1928_v57 = vmul.f32 %v2646_v48, %v1919_v52 }
 0xb28   : > { %v1938_v58 = vadd.f32 %v2647_v54, %v1929_v56 }
 0xb29   : > { %v1937_v60 = vadd.f32 %v2647_v54, %v1928_v57 }
 0xb2a   : > { %v1940_v61 = vpack.c.bf16 %v1938_v58, %v1938_v58 }
 0xb2b   : > { %v1939_v63 = vpack.c.bf16 %v1937_v60, %v1936_v59 }
 0xb2d   : > { %2807 = vmatprep.mubr.msk.bf16.mxu0 %vm1295_vm1, %v1939_v63 }
 0xb2e   : > { %2808 = vmatmul.mubr.msk.bf16.vlgmr.msra.gmra.mxu0 %vm1295_vm1, %v1940_v61 }
 0xbee   : > { %v2809_v8 = vpop.f32.mrf.mxu0 }
 0xbef   : > { %v2013_v11 = vadd.f32 %v2809_v8, %v2648_v9 }
 0xbf0   : > { %v2004_v10 = vpop.f32.mrf.mxu0 }
 0xbf1   : > { %v2005_v13 = vadd.f32 %v2648_v9, %v2004_v10  ;;  %v2020_v16 = vmax.f32 %v2013_v11, 0.0 }
 0xbf2   : > { %v2810_v12 = vpop.f32.mrf.mxu0 }
 0xbf3   : > { %v2018_v19 = vmax.f32 %v2005_v13, 0.0  ;;  %v2022_v22 = vpack.c.bf16 %v2020_v16, %v2020_v16 }
 0xbf4   : > { %v2007_v14 = vpop.f32.mrf.mxu0 }
 0xbf5   : > { %v2008_v15 = vadd.f32 %v2648_v9, %v2007_v14 }
 0xbf7   : > { %v2019_v0 = vmax.f32 %v2008_v15, 0.0 }
 0xbf9   : > { %v2021_v21 = vpack.c.bf16 %v2019_v0, %v2018_v19 }
 0xbfb   : > { %2819 = vmatprep.mubr.msk.bf16.mxu1 %vm2062_vm5, %v2021_v21 }
 0xbfc   : > { %2820 = vmatmul.mubr.msk.bf16.vlgmr.msra.gmra.mxu1 %vm2062_vm5, %v2022_v22 }
 0xcbc   : > { %v2821_v3 = vpop.f32.mrf.mxu1 }
 0xcbd   : > { %v2112_v24 = vadd.f32 %v2821_v3, %v2653_v23 }
 0xcbe   : > { %v2103_v4 = vpop.f32.mrf.mxu1 }
 0xcbf   : > { %v2119_v25 = vadd.f32 %v2112_v24, %v3966_v20  ;;  %v2104_v26 = vadd.f32 %v2653_v23, %v2103_v4 }
 0xcc0   : > { %v2822_v27 = vpop.f32.mrf.mxu1 }
 0xcc1   : > { %2122 = vst.msk [vmem:[#allocation2 + $0x10] sm:$0xff] %vm1295_vm1, %v2119_v25  ;;  %v2117_v62 = vadd.f32 %v2104_v26, %v3963_v18 }
 0xcc2   : > { %v2106_v5 = vpop.f32.mrf.mxu1 }
 0xcc3   : > { %2120 = vst.msk [vmem:[#allocation2] sm:$0xff] %vm1295_vm1, %v2117_v62  ;;  %v2107_v28 = vadd.f32 %v2653_v23, %v2106_v5  ;;  %2126 = sbr.rel (%p2660_p10) target bundleno = 3807 (0xedf), region = 156 }
 0xcc5   : > { %v2118_v29 = vadd.f32 %v2107_v28, %v3971_v2 }
 0xcc7   : > { %2121 = vst.msk [vmem:[#allocation2 + $0x8] sm:$0xff] %vm1295_vm1, %v2118_v29 }
 0xcc8   : > { %v2129_v55 = vsel %vm1295_vm1, %v2117_v62, 0.0  ;;  %v2135_v20 = vsel %vm1295_vm1, %v2119_v25, 0.0  ;;  %v2132_v30 = vsel %vm1295_vm1, %v2118_v29, 0.0  ;;  %v3061_v44 = vld [vmem:[%s4222_s3 + $0x8] sm:$0xff]   ;;  %v3062_v45 = vld [vmem:[%s4222_s3] sm:$0xff]   ;;  %v2266_v3 = vand.u32 127, %v1282_v17 }
 0xcc9   : > { %2130 = vadd.xlane.f32.xlu0 %v2129_v55  ;;  %2136 = vadd.xlane.f32.xlu1 %v2135_v20  ;;  %v2661_v58 = vld [vmem:[#allocation12] ss:$0 sm:$0xff]  ;;  %v2662_v6 = vld [vmem:[#allocation14] ss:$0 sm:$0xff]  ;;  %v2663_v14 = vld [vmem:[#allocation15] ss:$0 sm:$0xff] }
 0xcca   : > { %2823 = vmatprep.subr.bf16.mxu0 %v3061_v44  ;;  %vm2267_vm6 = vcmp.lt.s32.totalorder %v2266_v3, 4 }
 0xccb   : > { %2824 = vmatpush3.bf16.msra.mxu0 %v3061_v44 }
 0xccc   : > { %2825 = vmatprep.subr.bf16.mxu0 %v3062_v45 }
 0xccd   : > { %2133 = vadd.xlane.f32.xlu0 %v2132_v30 }
 0xccf   : > { %2826 = vmatpush3.bf16.msra.mxu0 %v3062_v45 }
 0xd52   : > { %v2131_v18 = vpop.xlane.xlu0 %2130  ;;  %v2137_v31 = vpop.xlane.xlu1 %2136 }
 0xd53   : > { %v2138_v32 = vmul.f32 0.03125, %v2131_v18  ;;  %v2140_v33 = vmul.f32 0.03125, %v2137_v31 }
 0xd55   : > { %v2141_v34 = vsub.f32 %v2117_v62, %v2138_v32  ;;  %v2143_v2 = vsub.f32 %v2119_v25, %v2140_v33 }
 0xd56   : > { %v2134_v35 = vpop.xlane.xlu0 %2133 }
 0xd57   : > { %v2139_v36 = vmul.f32 0.03125, %v2134_v35  ;;  %v2144_v37 = vmul.f32 %v2141_v34, %v2141_v34  ;;  %v2146_v38 = vmul.f32 %v2143_v2, %v2143_v2 }
 0xd59   : > { %v2142_v39 = vsub.f32 %v2118_v29, %v2139_v36  ;;  %v2147_v40 = vsel %vm1295_vm1, %v2144_v37, 0.0  ;;  %v2153_v41 = vsel %vm1295_vm1, %v2146_v38, 0.0 }
 0xd5a   : > { %2148 = vadd.xlane.f32.xlu1 %v2147_v40 }
 0xd5b   : > { %v2145_v42 = vmul.f32 %v2142_v39, %v2142_v39 }
 0xd5d   : > { %v2150_v43 = vsel %vm1295_vm1, %v2145_v42, 0.0 }
 0xd5e   : > { %2154 = vadd.xlane.f32.xlu1 %v2153_v41  ;;  %2151 = vadd.xlane.f32.xlu0 %v2150_v43 }
 0xde3   : > { %v2149_v46 = vpop.xlane.xlu1 %2148 }
 0xde4   : > { %v2156_v47 = vmul.f32 0.03125, %v2149_v46 }
 0xde6   : > { %v2159_v48 = vadd.f32 1e-05, %v2156_v47 }
 0xde7   : > { %v2155_v49 = vpop.xlane.xlu1 %2154  ;;  %v2152_v50 = vpop.xlane.xlu0 %2151 }
 0xde8   : > { %3063 = vrsqrt.f32 %v2159_v48  ;;  %v2158_v51 = vmul.f32 0.03125, %v2155_v49  ;;  %v2157_v52 = vmul.f32 0.03125, %v2152_v50 }
 0xdea   : > { %v2161_v53 = vadd.f32 1e-05, %v2158_v51  ;;  %v2160_v54 = vadd.f32 1e-05, %v2157_v52 }
 0xdec   : > { %3065 = vrsqrt.f32 %v2161_v53 }
 0xded   : > { %3067 = vrsqrt.f32 %v2160_v54 }
 0xdf5   : > { %v3064_v56 = vpop.eup %3063 }
 0xdf6   : > { %v2165_v57 = vmul.f32 %v3064_v56, %v2141_v34 }
 0xdf8   : > { %v2174_v1 = vmul.f32 %v2661_v58, %v2165_v57 }
 0xdf9   : > { %v3066_v59 = vpop.eup %3065 }
 0xdfa   : > { %v3068_v60 = vpop.eup %3067  ;;  %v2167_v61 = vmul.f32 %v3066_v59, %v2143_v2  ;;  %v2183_v10 = vadd.f32 %v2662_v6, %v2174_v1 }
 0xdfb   : > { %v2166_v63 = vmul.f32 %v3068_v60, %v2142_v39 }
 0xdfc   : > { %v2176_v7 = vmul.f32 %v2661_v58, %v2167_v61 }
 0xdfd   : > { %v2175_v8 = vmul.f32 %v2661_v58, %v2166_v63 }
 0xdfe   : > { %v2185_v9 = vadd.f32 %v2662_v6, %v2176_v7 }
 0xdff   : > { %v2184_v11 = vadd.f32 %v2662_v6, %v2175_v8 }
 0xe00   : > { %v2187_v12 = vpack.c.bf16 %v2185_v9, %v2185_v9 }
 0xe01   : > { %v2186_v13 = vpack.c.bf16 %v2184_v11, %v2183_v10 }
 0xe03   : > { %2827 = vmatprep.mubr.msk.bf16.mxu0 %vm1295_vm1, %v2186_v13 }
 0xe04   : > { %2828 = vmatmul.mubr.msk.bf16.vlgmr.msra.gmra.mxu0 %vm1295_vm1, %v2187_v12 }
 0xec4   : > { %v2829_v15 = vpop.f32.mrf.mxu0 }
 0xec5   : > { %v2260_v16 = vadd.f32 %v2829_v15, %v2663_v14 }
 0xec6   : > { %v2251_v19 = vpop.f32.mrf.mxu0 }
 0xec7   : > { %3069 = vtanh.f32 %v2260_v16  ;;  %v2252_v0 = vadd.f32 %v2663_v14, %v2251_v19 }
 0xec8   : > { %v2830_v21 = vpop.f32.mrf.mxu0 }
 0xec9   : > { %3071 = vtanh.f32 %v2252_v0 }
 0xeca   : > { %v2254_v22 = vpop.f32.mrf.mxu0 }
 0xecb   : > { %v2255_v23 = vadd.f32 %v2663_v14, %v2254_v22 }
 0xecd   : > { %3073 = vtanh.f32 %v2255_v23 }
 0xed4   : > { %v3070_v24 = vpop.eup %3069 }
 0xed5   : > { %v2273_v4 = vsel %vm2267_vm6, %v3070_v24, %v2260_v16 }
 0xed6   : > { %v2680_v25 = vpack.c.bf16 %v2273_v4, %v2273_v4  ;;  %v3072_v26 = vpop.eup %3071 }
 0xed7   : > { %v2271_v62 = vsel %vm2267_vm6, %v3072_v26, %v2252_v0 }
 0xed8   : > { %2289 = vst [vmem:[%s3809_s14 + $0x8] sm:$0xf] %v2680_v25 }
 0xeda   : > { %v3074_v27 = vpop.eup %3073 }
 0xedb   : > { %v2272_v5 = vsel %vm2267_vm6, %v3074_v27, %v2255_v23 }
 0xedc   : > { %v2685_v28 = vpack.c.bf16 %v2272_v5, %v2271_v62 }
 0xede   : > { %2686 = vst [vmem:[%s3809_s14] sm:$0xff] %v2685_v28  }
 0xedf PF: > { %s4223_s27 = sld [smem:[#allocation27_spill]]  ;;  %s2304_s18 = sshll.u32 %s3809_s14, 4  ;;  %s4042_s18 = int_to_ptr.vmem [resolvable:$true] %s2304_s18 }
 0xee0   : > { %s4225_s4 = sld [smem:[#allocation58_spill]]  ;;  %s2291_s10 = scalar_lea.sflag [#allocation5], %s3720_s22 }
 0xee1   : > { %s3285_s11 = scalar_lea.vmem %s4042_s18, 192  ;;  %s3413_s25 = smov [#allocation17]  }
 0xee2   : > { %p3286_p5 = scmp.ne.s32.totalorder %s4042_s18, %s3285_s11  ;;  %s3289_s7 = sshll.u32 %s3413_s25, 4  ;;  %s3290_s7 = int_to_ptr.vmem [resolvable:$false] %s3289_s7 }
 0xee3   : > { %s3291_s14 = scalar_lea.vmem %s3290_s7, 384  ;;  %p3292_p13 = scmp.lt.s32.totalorder %s4042_s18, %s3290_s7 }
 0xee4   : > { %p3287_p11 = pnand %p3286_p5, %p3687_p7  ;;  %p3293_p2 = scmp.lt.s32.totalorder %s3291_s14, %s3285_s11 }
 0xee5   : > { %s2681_s8 = smul.u32 192, %s4223_s27 }
 0xee6   : > { %p3288_p12 = pneg %p3287_p11  ;;  %p3294_p9 = por %p3293_p2, %p3292_p13 }
 0xee7   : > { %s4040_s23 = scalar_lea.hbm %s4225_s4, %s2681_s8 }
 0xee8   : > { %p3295_p8 = pnand %p3294_p9, %p3288_p12 }
 0xeea   : > { %3298 = shalt.err (!%p3295_p8)
}
 0xeeb   : > { %s3299_s5 = scalar_lea.hbm %s4040_s23, 192  ;;  %s3303_s17 = scalar_lea.hbm %s4225_s4, 384 }
 0xeec   : > { %p3300_p3 = scmp.ne.s32.totalorder %s4040_s23, %s3299_s5  ;;  %p3304_p1 = scmp.lt.s32.totalorder %s4040_s23, %s4225_s4 }
 0xeed   : > { %p3305_p10 = scmp.lt.s32.totalorder %s3303_s17, %s3299_s5 }
 0xeee   : > { %p3301_p0 = pnand %p3300_p3, %p3687_p7 }
 0xeef   : > { %p3306_p5 = por %p3305_p10, %p3304_p1 }
 0xef0   : > { %p3302_p6 = pneg %p3301_p0 }
 0xef2   : > { %p3307_p11 = pnand %p3306_p5, %p3302_p6 }
 0xef4   : > { %3310 = shalt.err (!%p3307_p11)
}
 0xef5   : > { %s3414_s28 = smov 4  }
 0xef6   : > { %2868 = dma.vmem_to_hbm [thread:$0]  (%p3687_p7), %s4042_s18, 192, %s4040_s23, %s2291_s10, %s3411_s29, %s3411_s29, %s3414_s28  }
 0xef7 PF: > { %s4226_s6 = sld [smem:[#allocation30_spill]] }
 0xef8   : > { %s4227_s2 = sld [smem:[#allocation24_spill]] }
 0xefd   : > { %p2915_p12 = scmp.ge.s32.totalorder %s4226_s6, 2 }
 0xefe   : > { %s2319_s27 = sand.u32 1, %s4227_s2  }
 0xeff   : > { %p2897_p13 = pnand %p2915_p12, %p3691_p4  ;;  %s2320_s8 = scalar_lea.sflag [#allocation5], %s2319_s27 }
 0xf01   : > { %p2898_p2 = pneg %p2897_p13 }
 0xf03   : > { %3364 = dma.done.wait (%p2898_p2), %s2320_s8, 192  }
 0xf04   : > { %3366 = vsyncadd (%p2898_p2), %s2320_s8, 4294967104  ;;  %s44_s0 = sadd.s32 1, %s4226_s6   ;;  %s4229_s5 = sld [smem:[#allocation25_spill]] }
 0xf05   : > { %p41_p9 = scmp.ge.s32.totalorder %s44_s0, 6   ;;  %s4230_s26 = sld [smem:[#allocation26_spill]] }
 0xf06   : > { %s4231_s27 = sld [smem:[#allocation35_spill]] }
 0xf07   : > { %s4232_s28 = sld [smem:[#allocation28_spill]]  ;;  %43 = sbr.rel (!%p41_p9) target bundleno = 34 (0x22), region = 236 }
 0xf08   : > { %s4233_s6 = sld [smem:[#allocation29_spill]] }
 0xf09   : > { %s4234_s2 = sld [smem:[#allocation31_spill]] }
 0xf0a   : > { %s4235_s29 = sld [smem:[#allocation32_spill]] }
 0xf0c   :  { %2325 = vsyncpa [#allocation4], 1 }
 0xf0d   :  { %2327 = vsyncpa [#allocation4 + $0x1], 1 }
 0xf0e   :  { %2328 = vsyncpa [#allocation7], 1 }
 0xf0f   :  { %2329 = vsyncpa [#allocation10], 1 }
 0xf10   :  { %2330 = vsyncpa [#allocation13], 1 }
 0xf11   :  { %2331 = vsyncpa [#allocation16], 1 }
 0xf12   :  { %2332 = vsyncpa [#allocation5], 1 }
 0xf13   :  { %2334 = vsyncpa [#allocation5 + $0x1], 1 }

</bundles_post_ra>
